<compile_context>
chip_gen: v6e
topology: v6e:2x2x1
jax: 0.10.0
libtpu: 0.0.40
codegen_flags: <defaults>
</compile_context>

<pallas_src>
import functools

import jax
import jax.numpy as jnp
import numpy as np
from jax.experimental import pallas as pl
from jax.experimental.pallas import tpu as pltpu

_EPS = 1e-5   # PyTorch BatchNorm2d default eps
_HALO = 3     # 3 chained 3x3 convs -> halo of 3 rows/cols


# --------------------------------------------------------------------------
# Fused Pallas kernel: conv1+BN1+PReLU -> conv2+BN2+residual -> conv3+b+PReLU
# All tensors are flattened row-major with stride Wp (padded width); a 3x3
# conv is one (M, 9*Cin) x (9*Cin, Cout) matmul on the MXU.
# --------------------------------------------------------------------------
def _fused_sr_kernel(x_ref, m1_ref, m2_ref, w1_ref, w2_ref, w3_ref,
                     p1_ref, p2_ref, p3_ref, out_ref, *, Wp, M1, M2, M3):
    x = x_ref[0, 0]                                   # (LB, C) bf16, flat band

    def conv3x3(src, w_ref, m_out):
        # 9 shifted slices of the flat (stride-Wp) layout, concatenated along
        # the channel (lane) dim -> a single big-K matmul on the MXU.
        taps = [src[dy * Wp + dx: dy * Wp + dx + m_out, :]
                for dy in range(3) for dx in range(3)]
        tap = jnp.concatenate(taps, axis=-1)          # (m_out, 9*Cin) bf16
        return jnp.dot(tap, w_ref[...], preferred_element_type=jnp.float32)

    # --- conv1 -> folded BN1 -> PReLU -----------------------------------
    t1 = conv3x3(x, w1_ref, M1)
    t1 = t1 * p1_ref[0:1, :] + p1_ref[1:2, :]
    t1 = jnp.where(t1 > 0, t1, p1_ref[2:3, :] * t1)
    # zero out-of-image positions so conv2 sees proper zero padding
    t1 = (t1 * m1_ref[0]).astype(jnp.bfloat16)

    # --- conv2 -> folded BN2 -> + residual ------------------------------
    t2 = conv3x3(t1, w2_ref, M2)
    t2 = t2 * p2_ref[0:1, :] + p2_ref[1:2, :]
    t2 = t2 + x[2 * Wp + 2: 2 * Wp + 2 + M2, :].astype(jnp.float32)
    t2 = (t2 * m2_ref[0]).astype(jnp.bfloat16)

    # --- conv3 (C -> C*r*r) -> bias -> PReLU ----------------------------
    # (PixelShuffle is a pure permutation and commutes with the elementwise
    #  PReLU; it is done in the wrapper.)
    u = conv3x3(t2, w3_ref, M3)
    u = u + p3_ref[0:1, :]
    u = jnp.where(u > 0, u, p3_ref[1:2, :] * u)
    out_ref[0, 0] = u.astype(out_ref.dtype)


# --------------------------------------------------------------------------
# Wrapper
# --------------------------------------------------------------------------
def _pick_tile_h(H, target):
    th = max(1, min(target, H))
    while H % th:
        th -= 1
    return th


def _stage_mask(n_tiles, tile_h, stage, length, H, W, Wp):
    """1/0 mask (n_tiles, length, 1): keep positions that lie inside the image."""
    idx = np.arange(length)
    i, j = idx // Wp, idx % Wp
    col = j + stage - _HALO
    col_ok = (col >= 0) & (col < W)
    rows = np.arange(n_tiles)[:, None] * tile_h + i[None, :] + stage - _HALO
    ok = (rows >= 0) & (rows < H) & col_ok[None, :]
    return jnp.asarray(ok.astype(np.float32)[..., None])


@functools.partial(jax.jit, static_argnames=("upscale_factor", "tile_h"))
def feature_sr_forward(x_nchw, p, upscale_factor, tile_h=8):
    r = upscale_factor
    N, C, H, W = x_nchw.shape
    CUP = C * r * r
    x = jnp.transpose(x_nchw, (0, 2, 3, 1)).astype(jnp.float32)   # NCHW -> NHWC

    # Row tiling.  NOTE: for real feature-map sizes pick TILE_H so the
    # per-step VMEM footprint (band + intermediates, bf16, double-buffered)
    # stays under the scoped VMEM limit; roughly halve it on v7x (64 MiB).
    TILE_H = _pick_tile_h(H, tile_h)
    n_tiles = H // TILE_H
    Wp = W + 2 * _HALO
    LB = (TILE_H + 2 * _HALO) * Wp + 2 * _HALO   # flat band rows (+tail pad)
    M1 = (TILE_H + 4) * Wp + 4                   # conv1 output rows
    M2 = (TILE_H + 2) * Wp + 2                   # conv2 output rows
    M3 = TILE_H * Wp                             # conv3 output rows

    # Halo'd row bands of the zero-padded input (one gather), flattened
    # row-major, then 2*HALO zero tail entries so the last tap stays in-bounds.
    xp = jnp.pad(x, ((0, 0), (_HALO, _HALO), (_HALO, _HALO), (0, 0)))
    row_idx = (np.arange(n_tiles)[:, None] * TILE_H
               + np.arange(TILE_H + 2 * _HALO)[None, :]).reshape(-1)
    xb = jnp.take(xp, jnp.asarray(row_idx), axis=1)       # (N, T*(TILE_H+6), Wp, C)
    xb = xb.reshape(N, n_tiles, (TILE_H + 2 * _HALO) * Wp, C)
    xb = jnp.pad(xb, ((0, 0), (0, 0), (0, 2 * _HALO), (0, 0)))  # -> LB rows
    xb = xb.astype(jnp.bfloat16)

    # Weights: HWIO (3,3,Cin,Cout) -> (9*Cin, Cout) bf16 (MXU operands).
    w1 = p["w1"].reshape(9 * C, C).astype(jnp.bfloat16)
    w2 = p["w2"].reshape(9 * C, C).astype(jnp.bfloat16)
    w3 = p["w3"].reshape(9 * C, CUP).astype(jnp.bfloat16)

    # Fold eval-mode BN into per-channel scale/bias (f32).
    s1 = p["g1"] / jnp.sqrt(p["v1"] + _EPS)
    b1 = (p["b1"] - p["m1"]) * s1 + p["be1"]
    s2 = p["g2"] / jnp.sqrt(p["v2"] + _EPS)
    b2 = (p["b2"] - p["m2"]) * s2 + p["be2"]
    a1 = jnp.broadcast_to(jnp.asarray(p["a1"], jnp.float32), (C,))
    a3 = jnp.broadcast_to(jnp.asarray(p["a3"], jnp.float32), (CUP,))
    p1 = jnp.stack([s1, b1, a1]).astype(jnp.float32)            # (3, C)
    p2 = jnp.stack([s2, b2]).astype(jnp.float32)                # (2, C)
    p3 = jnp.stack([p["b3"], a3]).astype(jnp.float32)           # (2, CUP)

    m1 = _stage_mask(n_tiles, TILE_H, 1, M1, H, W, Wp)          # (T, M1, 1)
    m2 = _stage_mask(n_tiles, TILE_H, 2, M2, H, W, Wp)          # (T, M2, 1)

    kernel = functools.partial(_fused_sr_kernel, Wp=Wp, M1=M1, M2=M2, M3=M3)

    out = pl.pallas_call(
        kernel,
        out_shape=jax.ShapeDtypeStruct((N, n_tiles, M3, CUP), jnp.float32),
        grid=(N, n_tiles),
        in_specs=[
            pl.BlockSpec((1, 1, LB, C), lambda n, t: (n, t, 0, 0)),
            pl.BlockSpec((1, M1, 1), lambda n, t: (t, 0, 0)),
            pl.BlockSpec((1, M2, 1), lambda n, t: (t, 0, 0)),
            pl.BlockSpec((9 * C, C), lambda n, t: (0, 0)),
            pl.BlockSpec((9 * C, C), lambda n, t: (0, 0)),
            pl.BlockSpec((9 * C, CUP), lambda n, t: (0, 0)),
            pl.BlockSpec((3, C), lambda n, t: (0, 0)),
            pl.BlockSpec((2, C), lambda n, t: (0, 0)),
            pl.BlockSpec((2, CUP), lambda n, t: (0, 0)),
        ],
        out_specs=pl.BlockSpec((1, 1, M3, CUP), lambda n, t: (n, t, 0, 0)),
        compiler_params=pltpu.CompilerParams(
            dimension_semantics=("parallel", "parallel"),
            vmem_limit_bytes=64 * 1024 * 1024),
    )(xb, m1, m2, w1, w2, w3, p1, p2, p3)

    # Un-flatten rows, drop right-edge pad columns.
    u = out.reshape(N, H, Wp, CUP)[:, :, :W, :]                 # (N, H, W, CUP)
    # PixelShuffle(r): channel k = c*r*r + i*r + j -> (h*r+i, w*r+j, c)
    u = u.reshape(N, H, W, C, r, r)
    u = jnp.transpose(u, (0, 1, 4, 2, 5, 3)).reshape(N, H * r, W * r, C)
    return jnp.transpose(u, (0, 3, 1, 2))                       # NHWC -> NCHW


# --------------------------------------------------------------------------
# Pure-JAX reference (for correctness check)
# --------------------------------------------------------------------------
def _conv3x3_ref(x, w, b):
    return jax.lax.conv_general_dilated(
        x, w, (1, 1), "SAME",
        dimension_numbers=("NHWC", "HWIO", "NHWC")) + b


def reference_forward(x_nchw, p, r):
    def bn(t, g, be, m, v):
        return g * (t - m) / jnp.sqrt(v + _EPS) + be

    def prelu(t, a):
        return jnp.where(t > 0, t, a * t)

    x = jnp.transpose(x_nchw, (0, 2, 3, 1)).astype(jnp.float32)
    t = _conv3x3_ref(x, p["w1"], p["b1"])
    t = prelu(bn(t, p["g1"], p["be1"], p["m1"], p["v1"]), p["a1"])
    t = _conv3x3_ref(t, p["w2"], p["b2"])
    t = bn(t, p["g2"], p["be2"], p["m2"], p["v2"])
    t = x + t
    u = _conv3x3_ref(t, p["w3"], p["b3"])
    n, h, w, cup = u.shape
    c = cup // (r * r)
    u = u.reshape(n, h, w, c, r, r)
    u = jnp.transpose(u, (0, 1, 4, 2, 5, 3)).reshape(n, h * r, w * r, c)
    u = prelu(u, p["a3"])
    return jnp.transpose(u, (0, 3, 1, 2))


# --------------------------------------------------------------------------
# Deterministic parameter init (synthetic; mirrors the module's shapes)
# --------------------------------------------------------------------------
def init_params(key, in_channels, r):
    c = in_channels
    cup = c * r * r
    ks = jax.random.split(key, 14)

    def w_init(k, shape, fan_in):
        bound = 1.0 / np.sqrt(fan_in)
        return jax.random.uniform(k, shape, jnp.float32, -bound, bound)

    p = {}
    # ResidualBlock.conv1 / bn1
    p["w1"] = w_init(ks[0], (3, 3, c, c), 9 * c)          # HWIO
    p["b1"] = w_init(ks[1], (c,), 9 * c)
    p["g1"] = 1.0 + 0.1 * jax.random.normal(ks[2], (c,), jnp.float32)
    p["be1"] = 0.05 * jax.random.normal(ks[3], (c,), jnp.float32)
    p["m1"] = 0.1 * jax.random.normal(ks[4], (c,), jnp.float32)
    p["v1"] = 1.0 + 0.1 * jax.random.uniform(ks[5], (c,), jnp.float32)
    p["a1"] = jnp.float32(0.25)                           # nn.PReLU default
    # ResidualBlock.conv2 / bn2
    p["w2"] = w_init(ks[6], (3, 3, c, c), 9 * c)
    p["b2"] = w_init(ks[7], (c,), 9 * c)
    p["g2"] = 1.0 + 0.1 * jax.random.normal(ks[8], (c,), jnp.float32)
    p["be2"] = 0.05 * jax.random.normal(ks[9], (c,), jnp.float32)
    p["m2"] = 0.1 * jax.random.normal(ks[10], (c,), jnp.float32)
    p["v2"] = 1.0 + 0.1 * jax.random.uniform(ks[11], (c,), jnp.float32)
    # upsample conv / PReLU
    p["w3"] = w_init(ks[12], (3, 3, c, cup), 9 * c)
    p["b3"] = w_init(ks[13], (cup,), 9 * c)
    p["a3"] = jnp.float32(0.25)
    return p


if __name__ == "__main__":
    N, C, H, W = 2, 4, 16, 16
    R = 2  # upscale_factor

    key = jax.random.PRNGKey(0)
    pkey, xkey = jax.random.split(key)
    params = init_params(pkey, C, R)
    x = jax.random.normal(xkey, (N, C, H, W), jnp.float32)

    out = jax.block_until_ready(feature_sr_forward(x, params, R))
    assert out.shape == (N, C, H * R, W * R), out.shape

    ref = reference_forward(x, params, R)
    # bf16 MXU operands with f32 accumulation -> loosen tolerance vs f32 ref.
    np.testing.assert_allclose(np.asarray(out), np.asarray(ref),
                               rtol=2e-2, atol=2e-2)
    print("KERNEL_OK")
</pallas_src>

<mosaic_0001>
module attributes {stable_mosaic.version = 11 : i64} {
  func.func @_fused_sr_kernel(%arg0: i32, %arg1: i32, %arg2: memref<1x1x314x4xbf16, #tpu.memory_space<vmem>>, %arg3: memref<1x268x1xf32, #tpu.memory_space<vmem>>, %arg4: memref<1x222x1xf32, #tpu.memory_space<vmem>>, %arg5: memref<36x4xbf16, #tpu.memory_space<vmem>>, %arg6: memref<36x4xbf16, #tpu.memory_space<vmem>>, %arg7: memref<36x16xbf16, #tpu.memory_space<vmem>>, %arg8: memref<3x4xf32, #tpu.memory_space<vmem>>, %arg9: memref<2x4xf32, #tpu.memory_space<vmem>>, %arg10: memref<2x16xf32, #tpu.memory_space<vmem>>, %arg11: memref<1x1x176x16xf32, #tpu.memory_space<vmem>>) attributes {dimension_semantics = [#tpu.dimension_semantics<parallel>, #tpu.dimension_semantics<parallel>], iteration_bounds = array<i64: 2, 2>, scalar_prefetch = 0 : i64, scratch_operands = 0 : i64, tpu.core_type = #tpu.core_type<tc>, window_params = [{transform_indices = @transform_0, window_bounds = array<i64: 1, 1, 314, 4>}, {transform_indices = @transform_1, window_bounds = array<i64: 1, 268, 1>}, {transform_indices = @transform_2, window_bounds = array<i64: 1, 222, 1>}, {pipeline_mode = #tpu.pipeline_mode<synchronous>, transform_indices = @transform_3, window_bounds = array<i64: 36, 4>}, {pipeline_mode = #tpu.pipeline_mode<synchronous>, transform_indices = @transform_4, window_bounds = array<i64: 36, 4>}, {pipeline_mode = #tpu.pipeline_mode<synchronous>, transform_indices = @transform_5, window_bounds = array<i64: 36, 16>}, {pipeline_mode = #tpu.pipeline_mode<synchronous>, transform_indices = @transform_6, window_bounds = array<i64: 3, 4>}, {pipeline_mode = #tpu.pipeline_mode<synchronous>, transform_indices = @transform_7, window_bounds = array<i64: 2, 4>}, {pipeline_mode = #tpu.pipeline_mode<synchronous>, transform_indices = @transform_8, window_bounds = array<i64: 2, 16>}, {transform_indices = @transform_9, window_bounds = array<i64: 1, 1, 176, 16>}]} {
    %c0 = arith.constant 0 : index
    %c0_0 = arith.constant 0 : index
    %c0_1 = arith.constant 0 : index
    %c0_2 = arith.constant 0 : index
    %0 = vector.load %arg2[%c0, %c0_0, %c0_1, %c0_2] : memref<1x1x314x4xbf16, #tpu.memory_space<vmem>>, vector<1x1x314x4xbf16>
    %1 = vector.shape_cast %0 : vector<1x1x314x4xbf16> to vector<314x4xbf16>
    %2 = vector.extract_strided_slice %1 {offsets = [0, 0], sizes = [268, 4], strides = [1, 1]} : vector<314x4xbf16> to vector<268x4xbf16>
    %3 = vector.extract_strided_slice %1 {offsets = [1, 0], sizes = [268, 4], strides = [1, 1]} : vector<314x4xbf16> to vector<268x4xbf16>
    %4 = vector.extract_strided_slice %1 {offsets = [2, 0], sizes = [268, 4], strides = [1, 1]} : vector<314x4xbf16> to vector<268x4xbf16>
    %5 = vector.extract_strided_slice %1 {offsets = [22, 0], sizes = [268, 4], strides = [1, 1]} : vector<314x4xbf16> to vector<268x4xbf16>
    %6 = vector.extract_strided_slice %1 {offsets = [23, 0], sizes = [268, 4], strides = [1, 1]} : vector<314x4xbf16> to vector<268x4xbf16>
    %7 = vector.extract_strided_slice %1 {offsets = [24, 0], sizes = [268, 4], strides = [1, 1]} : vector<314x4xbf16> to vector<268x4xbf16>
    %8 = vector.extract_strided_slice %1 {offsets = [44, 0], sizes = [268, 4], strides = [1, 1]} : vector<314x4xbf16> to vector<268x4xbf16>
    %9 = vector.extract_strided_slice %1 {offsets = [45, 0], sizes = [268, 4], strides = [1, 1]} : vector<314x4xbf16> to vector<268x4xbf16>
    %10 = vector.extract_strided_slice %1 {offsets = [46, 0], sizes = [268, 4], strides = [1, 1]} : vector<314x4xbf16> to vector<268x4xbf16>
    %11 = tpu.concatenate %2, %3, %4, %5, %6, %7, %8, %9, %10 in 1 : vector<268x4xbf16>, vector<268x4xbf16>, vector<268x4xbf16>, vector<268x4xbf16>, vector<268x4xbf16>, vector<268x4xbf16>, vector<268x4xbf16>, vector<268x4xbf16>, vector<268x4xbf16> -> vector<268x36xbf16>
    %c0_3 = arith.constant 0 : index
    %c0_4 = arith.constant 0 : index
    %12 = vector.load %arg5[%c0_3, %c0_4] : memref<36x4xbf16, #tpu.memory_space<vmem>>, vector<36x4xbf16>
    %cst = arith.constant dense<0.000000e+00> : vector<268x4xf32>
    %13 = tpu.matmul %11, %12, %cst {dimension_numbers = #tpu.dot_dimension_numbers<[1], [0], [0], [1], [0, 0, 1, 1], [], []>} : vector<268x36xbf16>, vector<36x4xbf16>, vector<268x4xf32> -> vector<268x4xf32>
    %c0_5 = arith.constant 0 : index
    %c0_6 = arith.constant 0 : index
    %14 = vector.load %arg8[%c0_5, %c0_6] : memref<3x4xf32, #tpu.memory_space<vmem>>, vector<1x4xf32>
    %15 = vector.broadcast %14 : vector<1x4xf32> to vector<268x4xf32>
    %16 = arith.mulf %13, %15 : vector<268x4xf32>
    %c1 = arith.constant 1 : index
    %c0_7 = arith.constant 0 : index
    %17 = vector.load %arg8[%c1, %c0_7] : memref<3x4xf32, #tpu.memory_space<vmem>>, vector<1x4xf32>
    %18 = vector.broadcast %17 : vector<1x4xf32> to vector<268x4xf32>
    %19 = arith.addf %16, %18 : vector<268x4xf32>
    %cst_8 = arith.constant 0.000000e+00 : f32
    %20 = vector.broadcast %cst_8 : f32 to vector<268x4xf32>
    %21 = arith.cmpf ogt, %19, %20 : vector<268x4xf32>
    %c2 = arith.constant 2 : index
    %c0_9 = arith.constant 0 : index
    %22 = vector.load %arg8[%c2, %c0_9] : memref<3x4xf32, #tpu.memory_space<vmem>>, vector<1x4xf32>
    %23 = vector.broadcast %22 : vector<1x4xf32> to vector<268x4xf32>
    %24 = arith.mulf %23, %19 : vector<268x4xf32>
    %25 = arith.select %21, %19, %24 : vector<268x4xi1>, vector<268x4xf32>
    %c0_10 = arith.constant 0 : index
    %c0_11 = arith.constant 0 : index
    %c0_12 = arith.constant 0 : index
    %26 = vector.load %arg3[%c0_10, %c0_11, %c0_12] : memref<1x268x1xf32, #tpu.memory_space<vmem>>, vector<1x268x1xf32>
    %27 = vector.shape_cast %26 : vector<1x268x1xf32> to vector<268x1xf32>
    %28 = vector.broadcast %27 : vector<268x1xf32> to vector<268x4xf32>
    %29 = arith.mulf %25, %28 : vector<268x4xf32>
    %30 = arith.truncf %29 : vector<268x4xf32> to vector<268x4xbf16>
    %31 = vector.extract_strided_slice %30 {offsets = [0, 0], sizes = [222, 4], strides = [1, 1]} : vector<268x4xbf16> to vector<222x4xbf16>
    %32 = vector.extract_strided_slice %30 {offsets = [1, 0], sizes = [222, 4], strides = [1, 1]} : vector<268x4xbf16> to vector<222x4xbf16>
    %33 = vector.extract_strided_slice %30 {offsets = [2, 0], sizes = [222, 4], strides = [1, 1]} : vector<268x4xbf16> to vector<222x4xbf16>
    %34 = vector.extract_strided_slice %30 {offsets = [22, 0], sizes = [222, 4], strides = [1, 1]} : vector<268x4xbf16> to vector<222x4xbf16>
    %35 = vector.extract_strided_slice %30 {offsets = [23, 0], sizes = [222, 4], strides = [1, 1]} : vector<268x4xbf16> to vector<222x4xbf16>
    %36 = vector.extract_strided_slice %30 {offsets = [24, 0], sizes = [222, 4], strides = [1, 1]} : vector<268x4xbf16> to vector<222x4xbf16>
    %37 = vector.extract_strided_slice %30 {offsets = [44, 0], sizes = [222, 4], strides = [1, 1]} : vector<268x4xbf16> to vector<222x4xbf16>
    %38 = vector.extract_strided_slice %30 {offsets = [45, 0], sizes = [222, 4], strides = [1, 1]} : vector<268x4xbf16> to vector<222x4xbf16>
    %39 = vector.extract_strided_slice %30 {offsets = [46, 0], sizes = [222, 4], strides = [1, 1]} : vector<268x4xbf16> to vector<222x4xbf16>
    %40 = tpu.concatenate %31, %32, %33, %34, %35, %36, %37, %38, %39 in 1 : vector<222x4xbf16>, vector<222x4xbf16>, vector<222x4xbf16>, vector<222x4xbf16>, vector<222x4xbf16>, vector<222x4xbf16>, vector<222x4xbf16>, vector<222x4xbf16>, vector<222x4xbf16> -> vector<222x36xbf16>
    %c0_13 = arith.constant 0 : index
    %c0_14 = arith.constant 0 : index
    %41 = vector.load %arg6[%c0_13, %c0_14] : memref<36x4xbf16, #tpu.memory_space<vmem>>, vector<36x4xbf16>
    %cst_15 = arith.constant dense<0.000000e+00> : vector<222x4xf32>
    %42 = tpu.matmul %40, %41, %cst_15 {dimension_numbers = #tpu.dot_dimension_numbers<[1], [0], [0], [1], [0, 0, 1, 1], [], []>} : vector<222x36xbf16>, vector<36x4xbf16>, vector<222x4xf32> -> vector<222x4xf32>
    %c0_16 = arith.constant 0 : index
    %c0_17 = arith.constant 0 : index
    %43 = vector.load %arg9[%c0_16, %c0_17] : memref<2x4xf32, #tpu.memory_space<vmem>>, vector<1x4xf32>
    %44 = vector.broadcast %43 : vector<1x4xf32> to vector<222x4xf32>
    %45 = arith.mulf %42, %44 : vector<222x4xf32>
    %c1_18 = arith.constant 1 : index
    %c0_19 = arith.constant 0 : index
    %46 = vector.load %arg9[%c1_18, %c0_19] : memref<2x4xf32, #tpu.memory_space<vmem>>, vector<1x4xf32>
    %47 = vector.broadcast %46 : vector<1x4xf32> to vector<222x4xf32>
    %48 = arith.addf %45, %47 : vector<222x4xf32>
    %49 = vector.extract_strided_slice %1 {offsets = [46, 0], sizes = [222, 4], strides = [1, 1]} : vector<314x4xbf16> to vector<222x4xbf16>
    %50 = arith.extf %49 : vector<222x4xbf16> to vector<222x4xf32>
    %51 = arith.addf %48, %50 : vector<222x4xf32>
    %c0_20 = arith.constant 0 : index
    %c0_21 = arith.constant 0 : index
    %c0_22 = arith.constant 0 : index
    %52 = vector.load %arg4[%c0_20, %c0_21, %c0_22] : memref<1x222x1xf32, #tpu.memory_space<vmem>>, vector<1x222x1xf32>
    %53 = vector.shape_cast %52 : vector<1x222x1xf32> to vector<222x1xf32>
    %54 = vector.broadcast %53 : vector<222x1xf32> to vector<222x4xf32>
    %55 = arith.mulf %51, %54 : vector<222x4xf32>
    %56 = arith.truncf %55 : vector<222x4xf32> to vector<222x4xbf16>
    %57 = vector.extract_strided_slice %56 {offsets = [0, 0], sizes = [176, 4], strides = [1, 1]} : vector<222x4xbf16> to vector<176x4xbf16>
    %58 = vector.extract_strided_slice %56 {offsets = [1, 0], sizes = [176, 4], strides = [1, 1]} : vector<222x4xbf16> to vector<176x4xbf16>
    %59 = vector.extract_strided_slice %56 {offsets = [2, 0], sizes = [176, 4], strides = [1, 1]} : vector<222x4xbf16> to vector<176x4xbf16>
    %60 = vector.extract_strided_slice %56 {offsets = [22, 0], sizes = [176, 4], strides = [1, 1]} : vector<222x4xbf16> to vector<176x4xbf16>
    %61 = vector.extract_strided_slice %56 {offsets = [23, 0], sizes = [176, 4], strides = [1, 1]} : vector<222x4xbf16> to vector<176x4xbf16>
    %62 = vector.extract_strided_slice %56 {offsets = [24, 0], sizes = [176, 4], strides = [1, 1]} : vector<222x4xbf16> to vector<176x4xbf16>
    %63 = vector.extract_strided_slice %56 {offsets = [44, 0], sizes = [176, 4], strides = [1, 1]} : vector<222x4xbf16> to vector<176x4xbf16>
    %64 = vector.extract_strided_slice %56 {offsets = [45, 0], sizes = [176, 4], strides = [1, 1]} : vector<222x4xbf16> to vector<176x4xbf16>
    %65 = vector.extract_strided_slice %56 {offsets = [46, 0], sizes = [176, 4], strides = [1, 1]} : vector<222x4xbf16> to vector<176x4xbf16>
    %66 = tpu.concatenate %57, %58, %59, %60, %61, %62, %63, %64, %65 in 1 : vector<176x4xbf16>, vector<176x4xbf16>, vector<176x4xbf16>, vector<176x4xbf16>, vector<176x4xbf16>, vector<176x4xbf16>, vector<176x4xbf16>, vector<176x4xbf16>, vector<176x4xbf16> -> vector<176x36xbf16>
    %c0_23 = arith.constant 0 : index
    %c0_24 = arith.constant 0 : index
    %67 = vector.load %arg7[%c0_23, %c0_24] : memref<36x16xbf16, #tpu.memory_space<vmem>>, vector<36x16xbf16>
    %cst_25 = arith.constant dense<0.000000e+00> : vector<176x16xf32>
    %68 = tpu.matmul %66, %67, %cst_25 {dimension_numbers = #tpu.dot_dimension_numbers<[1], [0], [0], [1], [0, 0, 1, 1], [], []>} : vector<176x36xbf16>, vector<36x16xbf16>, vector<176x16xf32> -> vector<176x16xf32>
    %c0_26 = arith.constant 0 : index
    %c0_27 = arith.constant 0 : index
    %69 = vector.load %arg10[%c0_26, %c0_27] : memref<2x16xf32, #tpu.memory_space<vmem>>, vector<1x16xf32>
    %70 = vector.broadcast %69 : vector<1x16xf32> to vector<176x16xf32>
    %71 = arith.addf %68, %70 : vector<176x16xf32>
    %cst_28 = arith.constant 0.000000e+00 : f32
    %72 = vector.broadcast %cst_28 : f32 to vector<176x16xf32>
    %73 = arith.cmpf ogt, %71, %72 : vector<176x16xf32>
    %c1_29 = arith.constant 1 : index
    %c0_30 = arith.constant 0 : index
    %74 = vector.load %arg10[%c1_29, %c0_30] : memref<2x16xf32, #tpu.memory_space<vmem>>, vector<1x16xf32>
    %75 = vector.broadcast %74 : vector<1x16xf32> to vector<176x16xf32>
    %76 = arith.mulf %75, %71 : vector<176x16xf32>
    %77 = arith.select %73, %71, %76 : vector<176x16xi1>, vector<176x16xf32>
    %c0_31 = arith.constant 0 : index
    %c0_32 = arith.constant 0 : index
    %c0_33 = arith.constant 0 : index
    %c0_34 = arith.constant 0 : index
    %78 = vector.load %arg11[%c0_31, %c0_32, %c0_33, %c0_34] : memref<1x1x176x16xf32, #tpu.memory_space<vmem>>, vector<1x1x176x16xf32>
    %79 = vector.shape_cast %78 : vector<1x1x176x16xf32> to vector<176x16xf32>
    %80 = vector.shape_cast %77 : vector<176x16xf32> to vector<1x1x176x16xf32>
    tpu.vector_store %arg11[%c0_31, %c0_32, %c0_33, %c0_34], %80 {strides = array<i32>} : memref<1x1x176x16xf32, #tpu.memory_space<vmem>>, vector<1x1x176x16xf32>,
    return
  }
  func.func @transform_0(%arg0: i32, %arg1: i32) -> (i32, i32, i32, i32) {
    %c0_i32 = arith.constant 0 : i32
    %c0_i32_0 = arith.constant 0 : i32
    %c0_i32_1 = arith.constant 0 : i32
    return %arg0, %arg1, %c0_i32, %c0_i32_0 : i32, i32, i32, i32
  }
  func.func @transform_1(%arg0: i32, %arg1: i32) -> (i32, i32, i32) {
    %c0_i32 = arith.constant 0 : i32
    %c0_i32_0 = arith.constant 0 : i32
    %c0_i32_1 = arith.constant 0 : i32
    return %arg1, %c0_i32, %c0_i32_0 : i32, i32, i32
  }
  func.func @transform_2(%arg0: i32, %arg1: i32) -> (i32, i32, i32) {
    %c0_i32 = arith.constant 0 : i32
    %c0_i32_0 = arith.constant 0 : i32
    %c0_i32_1 = arith.constant 0 : i32
    return %arg1, %c0_i32, %c0_i32_0 : i32, i32, i32
  }
  func.func @transform_3(%arg0: i32, %arg1: i32) -> (i32, i32) {
    %c0_i32 = arith.constant 0 : i32
    %c0_i32_0 = arith.constant 0 : i32
    %c0_i32_1 = arith.constant 0 : i32
    return %c0_i32, %c0_i32_0 : i32, i32
  }
  func.func @transform_4(%arg0: i32, %arg1: i32) -> (i32, i32) {
    %c0_i32 = arith.constant 0 : i32
    %c0_i32_0 = arith.constant 0 : i32
    %c0_i32_1 = arith.constant 0 : i32
    return %c0_i32, %c0_i32_0 : i32, i32
  }
  func.func @transform_5(%arg0: i32, %arg1: i32) -> (i32, i32) {
    %c0_i32 = arith.constant 0 : i32
    %c0_i32_0 = arith.constant 0 : i32
    %c0_i32_1 = arith.constant 0 : i32
    return %c0_i32, %c0_i32_0 : i32, i32
  }
  func.func @transform_6(%arg0: i32, %arg1: i32) -> (i32, i32) {
    %c0_i32 = arith.constant 0 : i32
    %c0_i32_0 = arith.constant 0 : i32
    %c0_i32_1 = arith.constant 0 : i32
    return %c0_i32, %c0_i32_0 : i32, i32
  }
  func.func @transform_7(%arg0: i32, %arg1: i32) -> (i32, i32) {
    %c0_i32 = arith.constant 0 : i32
    %c0_i32_0 = arith.constant 0 : i32
    %c0_i32_1 = arith.constant 0 : i32
    return %c0_i32, %c0_i32_0 : i32, i32
  }
  func.func @transform_8(%arg0: i32, %arg1: i32) -> (i32, i32) {
    %c0_i32 = arith.constant 0 : i32
    %c0_i32_0 = arith.constant 0 : i32
    %c0_i32_1 = arith.constant 0 : i32
    return %c0_i32, %c0_i32_0 : i32, i32
  }
  func.func @transform_9(%arg0: i32, %arg1: i32) -> (i32, i32, i32, i32) {
    %c0_i32 = arith.constant 0 : i32
    %c0_i32_0 = arith.constant 0 : i32
    %c0_i32_1 = arith.constant 0 : i32
    return %arg0, %arg1, %c0_i32, %c0_i32_0 : i32, i32, i32, i32
  }
}

</mosaic_0001>

<bundles_post_ra>
// kernel: feature_sr_forward.1
= control target key start
LH: loop header
LB: loop body
LE: loop exit
PB: predicated region body
PF: predicated region fallthrough
CT: control target
= control target key end

     0   :  { %s5422_s30 = smov 0   ;;  %s5424_s10 = smov 0   ;;  %s8754_s0 = inlined_call_operand.vmem [shape: bf16[2,2,314,4], index: 0, kind: input, shape index: {}]   ;;  %s8755_s1 = inlined_call_operand.vmem [shape: f32[2,268,1], index: 1, kind: input, shape index: {}]   ;;  %s8756_s2 = inlined_call_operand.vmem [shape: f32[2,222,1], index: 2, kind: input, shape index: {}]   ;;  %s8757_s3 = inlined_call_operand.vmem [shape: bf16[36,4], index: 3, kind: input, shape index: {}]   ;;  %s8758_s4 = inlined_call_operand.vmem [shape: bf16[36,4], index: 4, kind: input, shape index: {}]   ;;  %s8759_s5 = inlined_call_operand.vmem [shape: bf16[36,16], index: 5, kind: input, shape index: {}]   ;;  %s8760_s6 = inlined_call_operand.vmem [shape: f32[3,4], index: 6, kind: input, shape index: {}]   ;;  %s8761_s7 = inlined_call_operand.vmem [shape: f32[2,4], index: 7, kind: input, shape index: {}]   ;;  %s8762_s8 = inlined_call_operand.vmem [shape: f32[2,16], index: 8, kind: input, shape index: {}]   ;;  %s8763_s9 = inlined_call_operand.vmem [shape: f32[2,2,176,16], index: 9, kind: output, shape index: {}]  }
   0x1   :  { %s5426_s11 = smov 0   ;;  %s5428_s12 = smov 0  }
   0x2   :  { %s5430_s13 = smov 0  }
   0x3 LB: > { %s28_s14 = sadd.s32 1, %s5351_s11  ;;  %s31_s15 = sadd.s32 1, %s5355_s12  ;;  %s5359_s13 = sphi %s5430_s13, %s19_s13   ;;  %s5355_s12 = sphi %s5428_s12, %s9013_s12   ;;  %s5351_s11 = sphi %s5426_s11, %s9012_s11   ;;  %s5347_s10 = sphi %s5424_s10, %s9011_s10   ;;  %s5343_s30 = sphi %s5422_s30, %s9010_s30  }
   0x4   : > { %p29_p0 = scmp.ge.s32.totalorder %s28_s14, 2  ;;  %p4868_p1 = scmp.ge.s32.totalorder %s5359_s13, 1 }
   0x5   : > { %p327_p2 = scmp.lt.s32.totalorder %s5359_s13, 5 }
   0x6   : > { %s9015_s14 = smov (%p29_p0, %s28_s14), 0  ;;  %s9017_s15 = smov (!%p29_p0, %s31_s15), %s5355_s12 }
   0x7   : > { %p328_p3 = pnand %p4868_p1, %p327_p2  ;;  %p33_p4 = scmp.ge.s32.totalorder %s9017_s15, 2 }
   0x8   : > { %p381_p5 = scmp.lt.s32.totalorder (!%p328_p3), %s5347_s10, 1  ;;  %p383_p6 = scmp.lt.s32.totalorder (!%p328_p3), %s5343_s30, 1 }
   0x9   : > { %s9019_s15 = smov (%p33_p4, %s9017_s15), 0  ;;  %331 = sbr.rel (%p328_p3) target bundleno = 1334 (0x536), region = 56 }
   0xa   : > { %s5361_s23 = smov (!%p328_p3), 20   ;;  %s5362_s24 = smov (!%p328_p3), 12  }
   0xb   : > { %s5363_s25 = smov (!%p328_p3), 8   ;;  %s5364_s26 = smov (!%p328_p3), 24  }
   0xc   : > { %s5365_s27 = smov (!%p328_p3), 4   ;;  %s5366_s28 = smov (!%p328_p3), 32  }
   0xd   : > { %s5367_s29 = smov (!%p328_p3), 28  }
   0xe   : > { %s9021_s10 = smov (!%p381_p5, %s5347_s10), 1  ;;  %s9023_s30 = smov (!%p383_p6, %s5343_s30), 1  ;;  %vm8780_vm0 = vcmask 1044480   ;;  %vm705_vm1 = vcmask 1046528   ;;  %vm1023_vm2 = vcmask 1045504   ;;  %vm8764_vm6 = vcmask 1041408  }
   0xf   : > { %s5182_s16 = smul.u32 80, %s9021_s10  ;;  %vm535_vm3 = vsmask.f32 7424  ;;  %vm1094_vm4 = vsmask.f32 5376  ;;  %vm8765_vm7 = vmmov 0  }
  0x10   : > { %s5181_s17 = smul.u32 40, %s9023_s30  ;;  %vm8778_vm5 = vsmask.f32 4352  ;;  %vm1355_vm8 = vcmask 31744   ;;  %vm1390_vm9 = vcmask 64512   ;;  %vm1425_vm10 = vcmask 97280  }
  0x11   : > { %vm1460_vm11 = vcmask 130048   ;;  %vm8776_vm12 = vcmask 162816   ;;  %vm8770_vm13 = vcmask 195584   ;;  %vm8769_vm14 = vcmask 228352  }
  0x12   : > { %s387_s18 = sadd.s32 %s5182_s16, %s5181_s17  ;;  %s5368_s16 = smov 16   ;;  %vm8768_vm15 = vcmask 261120  }
  0x13   : > { %s4869_s19 = sshll.u32 %s387_s18, 2  ;;  %s5183_s18 = smul.u32 272, %s9023_s30 }
  0x14   : > { %s5461_s22 = scalar_lea.vmem %s8754_s0, %s4869_s19  ;;  %s5184_s17 = smul.u32 224, %s9023_s30 }
  0x15   : > { %v413_v0 = vld [vmem:[%s5461_s22 + $0xc] sm:$0xf]  ;;  %v414_v1 = vld [vmem:[%s5461_s22 + $0x10] sm:$0xf]  ;;  %v415_v2 = vld [vmem:[%s5461_s22 + $0x14] sm:$0xf]  ;;  %s6429_s21 = scalar_lea.vmem %s8755_s1, %s5183_s18 }
  0x16   : > { %v416_v3 = vld [vmem:[%s5461_s22 + $0x18] sm:$0xf]  ;;  %v417_v4 = vld [vmem:[%s5461_s22 + $0x1c] sm:$0xf]  ;;  %v5469_v5 = vld [vmem:[%s5461_s22 + $0x20] sm:$0xf]  ;;  %v5471_v6 = vcombine.low %v414_v1, %v415_v2  ;;  %v4892_v7 = vcombine.low %v413_v0, %v414_v1  ;;  %s7594_s20 = scalar_lea.vmem %s8756_s2, %s5184_s17 }
  0x17   : > { %v5473_v8 = vcombine.low %v415_v2, %v416_v3  ;;  %v5476_v9 = vcombine.low %v417_v4, %v5469_v5  ;;  %v412_v10 = vld [vmem:[%s5461_s22 + $0x8] sm:$0xf]  ;;  %v5484_v13 = vld [vmem:[%s5461_s22] sm:$0xff]   ;;  %v5486_v14 = vcombine.low %v416_v3, %v417_v4 }
  0x18   : > { %984 = vrot.lane.b32.xlu0 %v4892_v7, %s5361_s23  ;;  %v5480_v11 = vcombine.low %v412_v10, %v413_v0  ;;  %v783_v12 = vrot.slane %v5471_v6, 3  ;;  %v706_v18 = vrot.slane %v5484_v13, 1  ;;  %v537_v21 = vshrl.u32 %v5484_v13, 16  ;;  %v419_v48 = vld [vmem:[%s5461_s22 + $0x24] sm:$0xf] }
  0x19   : > { %v1024_v15 = vrot.slane %v5473_v8, 2  ;;  %v1025_v16 = vrot.slane %v5476_v9, 2  ;;  %v1286_v20 = vrot.slane %v5473_v8, 3  ;;  %v539_v22 = vshll.u32 %v5484_v13, 16  ;;  %v5522_v49 = vld [vmem:[%s5461_s22 + $0x28] sm:$0xf] }
  0x1a   : > { %v782_v17 = vrot.slane %v5480_v11, 3  ;;  %v707_v19 = vrot.slane %v5480_v11, 1  ;;  %v544_v23 = vshll.u32 %v5480_v11, 16  ;;  %v1287_v24 = vrot.slane %v5476_v9, 3 }
  0x1b   : > { %v1096_v27 = vshrl.u32 %v5473_v8, 16  ;;  %v1099_v28 = vshll.u32 %v5473_v8, 16  ;;  %v541_v29 = vrot.slane %v539_v22, 1  ;;  %v1104_v31 = vshrl.u32 %v5476_v9, 16  ;;  %v421_v22 = vld [vmem:[%s5461_s22 + $0x2c] sm:$0xf] }
  0x1c   : > { %v784_v25 = vsel %vm8780_vm0, %v782_v17, %v783_v12  ;;  %v708_v26 = vsel %vm705_vm1, %v706_v18, %v707_v19  ;;  %v546_v30 = vrot.slane %v544_v23, 1  ;;  %v1107_v32 = vshll.u32 %v5476_v9, 16 }
  0x1d   : > { %817 = vrot.lane.b32.xlu1 %v784_v25, %s5362_s24  ;;  %739 = vrot.lane.b32.xlu0 %v708_v26, %s5363_s25  ;;  %v1026_v33 = vsel %vm1023_vm2, %v1024_v15, %v1025_v16  ;;  %v1098_v34 = vrot.slane %v1096_v27, 2  ;;  %v1101_v35 = vrot.slane %v1099_v28, 3  ;;  %v548_v36 = vshrl.u32 %v5480_v11, 16 }
  0x1e   : > { %v542_v37 = vor.u32 %v541_v29, %v537_v21  ;;  %v1106_v38 = vrot.slane %v1104_v31, 2  ;;  %v1109_v39 = vrot.slane %v1107_v32, 3  ;;  %v552_v40 = vshll.u32 %v5471_v6, 16 }
  0x1f   : > { %v1102_v41 = vor.u32 %v1101_v35, %v1098_v34  ;;  %v709_v42 = vrot.slane %v5471_v6, 1  ;;  %v556_v43 = vshrl.u32 %v5471_v6, 16  ;;  %v1288_v45 = vsel %vm8780_vm0, %v1286_v20, %v1287_v24 }
  0x20   : > { %v547_v44 = vsel %vm535_vm3, %v542_v37, %v546_v30  ;;  %v1110_v46 = vor.u32 %v1109_v39, %v1106_v38  ;;  %v852_v47 = vrot.slane %v548_v36, 3  ;;  %v853_v50 = vrot.slane %v544_v23, 4  ;;  %v5557_v23 = vld [vmem:[%s5461_s22 + $0x30] sm:$0xf] }
  0x21   : > { %1057 = vrot.lane.b32.xlu1 %v1026_v33, %s5364_s26  ;;  %671 = vrot.lane.b32.xlu0 %v547_v44, %s5365_s27  ;;  %v855_v51 = vrot.slane %v556_v43, 3  ;;  %v856_v52 = vrot.slane %v552_v40, 4  ;;  %v560_v53 = vshll.u32 %v5486_v14, 16  ;;  %v550_v55 = vor.u32 %v548_v36, %v546_v30 }
  0x22   : > { %v1111_v54 = vsel %vm1094_vm4, %v1102_v41, %v1110_v46  ;;  %v554_v56 = vrot.slane %v552_v40, 1  ;;  %v564_v57 = vshrl.u32 %v5486_v14, 16  ;;  %v5529_v58 = vcombine.low %v419_v48, %v5522_v49 }
  0x23   : > { %v710_v59 = vsel %vm705_vm1, %v707_v19, %v709_v42  ;;  %v854_v60 = vor.u32 %v853_v50, %v852_v47  ;;  %v857_v61 = vor.u32 %v856_v52, %v855_v51  ;;  %v860_v63 = vrot.slane %v560_v53, 4  ;;  %v5599_v47 = vld [vmem:[%s5461_s22 + $0x38] sm:$0xf] }
  0x24   : > { %v859_v62 = vrot.slane %v564_v57, 3  ;;  %v555_v0 = vsel %vm535_vm3, %v550_v55, %v554_v56  ;;  %v785_v1 = vrot.slane %v5486_v14, 3  ;;  %v1113_v2 = vshrl.u32 %v5529_v58, 16 }
  0x25   : > { %1321 = vrot.lane.b32.xlu1 %v1288_v45, %s5366_s28  ;;  %1252 = vrot.lane.b32.xlu0 %v1111_v54, %s5367_s29  ;;  %v1116_v3 = vshll.u32 %v5529_v58, 16  ;;  %v858_v4 = vsel %vm8778_vm5, %v854_v60, %v857_v61  ;;  %v1027_v19 = vrot.slane %v5529_v58, 2  ;;  %v5553_v20 = vcombine.low %v5469_v5, %v419_v48 }
  0x26   : > { %v861_v7 = vor.u32 %v860_v63, %v859_v62  ;;  %v786_v10 = vsel %vm8780_vm0, %v783_v12, %v785_v1  ;;  %v1115_v15 = vrot.slane %v1113_v2, 2  ;;  %v1289_v25 = vrot.slane %v5529_v58, 3  ;;  %v5260_v63 = vld [vmem:[%s8757_s3 + $0x10] ss:$0 sps:$4 sm:$0x33]  }
  0x27   : > { %v1118_v17 = vrot.slane %v1116_v3, 3  ;;  %v1028_v12 = vsel %vm1023_vm2, %v1025_v16, %v1027_v19  ;;  %v568_v26 = vshll.u32 %v5553_v20, 16  ;;  %v572_v5 = vshrl.u32 %v5553_v20, 16 }
  0x28   : > { %v862_v18 = vsel %vm8778_vm5, %v857_v61, %v861_v7  ;;  %v558_v28 = vor.u32 %v556_v43, %v554_v56  ;;  %v562_v29 = vrot.slane %v560_v53, 1  ;;  %v5570_v30 = vcombine.low %v421_v22, %v5557_v23 }
  0x29   : > { %741 = vrot.lane.b32.xlu1 %v710_v59, %s5363_s25  ;;  %673 = vrot.lane.b32.xlu0 %v555_v0, %s5365_s27  ;;  %v1119_v21 = vor.u32 %v1118_v17, %v1115_v15  ;;  %v711_v16 = vrot.slane %v5486_v14, 1  ;;  %v863_v31 = vrot.slane %v572_v5, 3  ;;  %v864_v32 = vrot.slane %v568_v26, 4 }
  0x2a   : > { %v563_v33 = vsel %vm535_vm3, %v558_v28, %v562_v29  ;;  %v787_v34 = vrot.slane %v5553_v20, 3  ;;  %v1122_v35 = vshrl.u32 %v5570_v30, 16  ;;  %v1125_v36 = vshll.u32 %v5570_v30, 16  ;;  %v5263_v28 = vld [vmem:[%s8757_s3] sm:$0xff]  }
  0x2b   : > { %v1120_v27 = vsel %vm1094_vm4, %v1110_v46, %v1119_v21  ;;  %v865_v37 = vor.u32 %v864_v32, %v863_v31  ;;  %v1029_v43 = vrot.slane %v5570_v30, 2  ;;  %v5595_v44 = vcombine.low %v5522_v49, %v421_v22  ;;  %v423_v46 = vld [vmem:[%s5461_s22 + $0x34] sm:$0xf]  ;;  %v425_v22 = vld [vmem:[%s5461_s22 + $0x3c] sm:$0xf] }
  0x2c   : > { %v788_v38 = vsel %vm8780_vm0, %v785_v1, %v787_v34  ;;  %v1124_v39 = vrot.slane %v1122_v35, 2  ;;  %v1127_v40 = vrot.slane %v1125_v36, 3  ;;  %v1291_v48 = vrot.slane %v5570_v30, 3 }
  0x2d   : > { %933 = vrot.lane.b32.xlu1 %v858_v4, %s5368_s16  ;;  %819 = vrot.lane.b32.xlu0 %v786_v10, %s5362_s24  ;;  %v866_v41 = vsel %vm8778_vm5, %v861_v7, %v865_v37  ;;  %v576_v50 = vshll.u32 %v5595_v44, 16  ;;  %v580_v51 = vshrl.u32 %v5595_v44, 16  ;;  %v566_v52 = vor.u32 %v564_v57, %v562_v29 }
  0x2e   : > { %v1128_v45 = vor.u32 %v1127_v40, %v1124_v39  ;;  %v570_v53 = vrot.slane %v568_v26, 1  ;;  %v5612_v54 = vcombine.low %v423_v46, %v5599_v47  ;;  %v713_v55 = vrot.slane %v5553_v20, 1 }
  0x2f   : > { %v867_v56 = vrot.slane %v580_v51, 3  ;;  %v868_v59 = vrot.slane %v576_v50, 4  ;;  %v789_v57 = vrot.slane %v5595_v44, 3  ;;  %v8771_v7 = vmov 0.0  }
  0x30   : > { %v1129_v49 = vsel %vm1094_vm4, %v1119_v21, %v1128_v45  ;;  %v571_v60 = vsel %vm535_vm3, %v566_v52, %v570_v53  ;;  %v1131_v61 = vshrl.u32 %v5612_v54, 16  ;;  %v1134_v62 = vshll.u32 %v5612_v54, 16  ;;  %5022 = vmatprep.subr.bf16.mxu0 %v8771_v7  ;;  %5028 = vmatprep.mubr.msk.bf16.mxu0 %vm8765_vm7, %v8771_v7 }
  0x31   : > { %935 = vrot.lane.b32.xlu1 %v862_v18, %s5368_s16  ;;  %986 = vrot.lane.b32.xlu0 %v5473_v8, %s5361_s23  ;;  %v1290_v8 = vsel %vm8780_vm0, %v1287_v24, %v1289_v25  ;;  %v712_v24 = vsel %vm705_vm1, %v709_v42, %v711_v16  ;;  %v1030_v42 = vsel %vm1023_vm2, %v1027_v19, %v1029_v43  ;;  %v1692_v10 = vsel %vm8764_vm6, %v5260_v63, 0  ;;  %v5261_v19 = vld [vmem:[%s8757_s3 + $0x8] sm:$0xff]  }
  0x32   : > { %v714_v0 = vsel %vm705_vm1, %v711_v16, %v713_v55  ;;  %v869_v1 = vor.u32 %v868_v59, %v867_v56  ;;  %v790_v2 = vsel %vm8780_vm0, %v787_v34, %v789_v57  ;;  %v1133_v3 = vrot.slane %v1131_v61, 2  ;;  %5023 = vmatpush3.bf16.msra.mxu0 %v1692_v10 }
  0x33   : > { %v1136_v4 = vrot.slane %v1134_v62, 3  ;;  %v1031_v17 = vrot.slane %v5612_v54, 2  ;;  %v5638_v18 = vcombine.low %v5557_v23, %v423_v46  ;;  %5024 = vmatprep.subr.bf16.mxu0 %v8771_v7  ;;  %v578_v16 = vrot.slane %v576_v50, 1  ;;  %v5690_v50 = vld [vmem:[%s5461_s22 + $0x48] sm:$0xf] }
  0x34   : > { %v870_v15 = vsel %vm8778_vm5, %v865_v37, %v869_v1  ;;  %v715_v32 = vrot.slane %v5595_v44, 1  ;;  %v5686_v46 = vcombine.low %v5599_v47, %v425_v22  ;;  %vm8767_vm6 = vcmask 293888  }
  0x35   : > { %1059 = vrot.lane.b32.xlu1 %v1028_v12, %s5364_s26  ;;  %1254 = vrot.lane.b32.xlu0 %v1120_v27, %s5367_s29  ;;  %v1137_v21 = vor.u32 %v1136_v4, %v1133_v3  ;;  %v5646_v12 = vld [vmem:[%s5461_s22 + $0x40] sm:$0xf]  ;;  %v1032_v23 = vsel %vm1023_vm2, %v1029_v43, %v1031_v17  ;;  %v584_v26 = vshll.u32 %v5638_v18, 16  ;;  %v588_v27 = vshrl.u32 %v5638_v18, 16 }
  0x36   : > { %5025 = vmatpush3.bf16.msra.mxu0 %v5261_v19  ;;  %v5662_v31 = vcombine.low %v425_v22, %v5646_v12  ;;  %v791_v35 = vrot.slane %v5638_v18, 3  ;;  %v716_v37 = vsel %vm705_vm1, %v713_v55, %v715_v32  ;;  %v582_v55 = vor.u32 %v580_v51, %v578_v16  ;;  %v429_v22 = vld [vmem:[%s5461_s22 + $0x4c] sm:$0xf] }
  0x37   : > { %v1138_v29 = vsel %vm1094_vm4, %v1128_v45, %v1137_v21  ;;  %5026 = vmatprep.subr.bf16.mxu0 %v8771_v7  ;;  %v586_v56 = vrot.slane %v584_v26, 1  ;;  %v793_v51 = vrot.slane %v5686_v46, 3 }
  0x38   : > { %v1140_v36 = vshrl.u32 %v5662_v31, 16  ;;  %v792_v39 = vsel %vm8780_vm0, %v789_v57, %v791_v35  ;;  %v1033_v45 = vrot.slane %v5662_v31, 2  ;;  %v1295_v52 = vrot.slane %v5662_v31, 3 }
  0x39   : > { %1323 = vrot.lane.b32.xlu1 %v1290_v8, %s5366_s28  ;;  %675 = vrot.lane.b32.xlu0 %v563_v33, %s5365_s27  ;;  %v574_v8 = vor.u32 %v572_v5, %v570_v53  ;;  %v871_v5 = vrot.slane %v588_v27, 3  ;;  %v872_v33 = vrot.slane %v584_v26, 4  ;;  %v592_v53 = vshll.u32 %v5686_v46, 16 }
  0x3a   : > { %5027 = vmatpush3.bf16.msra.mxu0 %v5263_v28  ;;  %v1142_v40 = vrot.slane %v1140_v36, 2  ;;  %v587_v62 = vsel %vm535_vm3, %v582_v55, %v586_v56  ;;  %v794_v3 = vsel %vm8780_vm0, %v791_v35, %v793_v51 }
  0x3b   : > { %v579_v34 = vsel %vm535_vm3, %v574_v8, %v578_v16  ;;  %v876_v61 = vrot.slane %v592_v53, 4  ;;  %v590_v8 = vor.u32 %v588_v27, %v586_v56  ;;  %v594_v16 = vrot.slane %v592_v53, 1 }
  0x3d   : > { %743 = vrot.lane.b32.xlu1 %v712_v24, %s5363_s25  ;;  %821 = vrot.lane.b32.xlu0 %v788_v38, %s5362_s24  ;;  %v1143_v24 = vshll.u32 %v5662_v31, 16  ;;  %v873_v38 = vor.u32 %v872_v33, %v871_v5 }
  0x3f   : > { %v874_v43 = vsel %vm8778_vm5, %v869_v1, %v873_v38 }
  0x41   : > { %937 = vrot.lane.b32.xlu1 %v866_v41, %s5368_s16  ;;  %988 = vrot.lane.b32.xlu0 %v5476_v9, %s5361_s23  ;;  %v1292_v9 = vsel %vm8780_vm0, %v1289_v25, %v1291_v48  ;;  %v1293_v25 = vrot.slane %v5612_v54, 3  ;;  %v1145_v41 = vrot.slane %v1143_v24, 3 }
  0x45   : > { %1061 = vrot.lane.b32.xlu1 %v1030_v42, %s5364_s26  ;;  %1256 = vrot.lane.b32.xlu0 %v1129_v49, %s5367_s29  ;;  %v1146_v42 = vor.u32 %v1145_v41, %v1142_v40  ;;  %v1034_v49 = vsel %vm1023_vm2, %v1031_v17, %v1033_v45 }
  0x47   : > { %v1147_v47 = vsel %vm1094_vm4, %v1137_v21, %v1146_v42 }
  0x49   : > { %1325 = vrot.lane.b32.xlu1 %v1292_v9, %s5366_s28  ;;  %677 = vrot.lane.b32.xlu0 %v571_v60, %s5365_s27  ;;  %v596_v9 = vshrl.u32 %v5686_v46, 16  ;;  %v717_v60 = vrot.slane %v5638_v18, 1 }
  0x4b   : > { %v875_v57 = vrot.slane %v596_v9, 3  ;;  %v718_v1 = vsel %vm705_vm1, %v715_v32, %v717_v60  ;;  %v719_v32 = vrot.slane %v5686_v46, 1  ;;  %v598_v56 = vor.u32 %v596_v9, %v594_v16 }
  0x4d   : > { %745 = vrot.lane.b32.xlu1 %v714_v0, %s5363_s25  ;;  %823 = vrot.lane.b32.xlu0 %v790_v2, %s5362_s24  ;;  %v877_v2 = vor.u32 %v876_v61, %v875_v57  ;;  %v720_v24 = vsel %vm705_vm1, %v717_v60, %v719_v32 }
  0x51   : > { %939 = vrot.lane.b32.xlu1 %v870_v15, %s5368_s16  ;;  %990 = vrot.lane.b32.xlu0 %v5529_v58, %s5361_s23  ;;  %v1294_v58 = vsel %vm8780_vm0, %v1291_v48, %v1293_v25  ;;  %v427_v48 = vld [vmem:[%s5461_s22 + $0x44] sm:$0xf]  ;;  %v878_v15 = vsel %vm8778_vm5, %v873_v38, %v877_v2 }
  0x52   : > { %v5703_v59 = vcombine.low %v427_v48, %v5690_v50  ;;  %v5724_v19 = vcombine.low %v5646_v12, %v427_v48  ;;  %v431_v48 = vld [vmem:[%s5461_s22 + $0x54] sm:$0xf] }
  0x54   : > { %v1149_v63 = vshrl.u32 %v5703_v59, 16  ;;  %v1152_v0 = vshll.u32 %v5703_v59, 16  ;;  %v1035_v17 = vrot.slane %v5703_v59, 2  ;;  %v1297_v26 = vrot.slane %v5703_v59, 3 }
  0x55   : > { %1063 = vrot.lane.b32.xlu1 %v1032_v23, %s5364_s26  ;;  %1258 = vrot.lane.b32.xlu0 %v1138_v29, %s5367_s29  ;;  %v600_v28 = vshll.u32 %v5724_v19, 16  ;;  %v604_v29 = vshrl.u32 %v5724_v19, 16  ;;  %v795_v27 = vrot.slane %v5724_v19, 3  ;;  %v721_v57 = vrot.slane %v5724_v19, 1 }
  0x56   : > { %v1151_v4 = vrot.slane %v1149_v63, 2  ;;  %v1154_v10 = vrot.slane %v1152_v0, 3  ;;  %v1036_v23 = vsel %vm1023_vm2, %v1033_v45, %v1035_v17  ;;  %v5762_v45 = vcombine.low %v5690_v50, %v429_v22 }
  0x57   : > { %v879_v5 = vrot.slane %v604_v29, 3  ;;  %v880_v33 = vrot.slane %v600_v28, 4  ;;  %v796_v38 = vsel %vm8780_vm0, %v793_v51, %v795_v27 }
  0x58   : > { %v1155_v21 = vor.u32 %v1154_v10, %v1151_v4  ;;  %v612_v55 = vshrl.u32 %v5762_v45, 16  ;;  %v797_v9 = vrot.slane %v5762_v45, 3 }
  0x59   : > { %1327 = vrot.lane.b32.xlu1 %v1294_v58, %s5366_s28  ;;  %679 = vrot.lane.b32.xlu0 %v579_v34, %s5365_s27  ;;  %v595_v34 = vsel %vm535_vm3, %v590_v8, %v594_v16  ;;  %v5808_v8 = vld [vmem:[%s5461_s22 + $0x60] sm:$0xf] }
  0x5a   : > { %v1156_v12 = vsel %vm1094_vm4, %v1146_v42, %v1155_v21  ;;  %v883_v61 = vrot.slane %v612_v55, 3  ;;  %v798_v4 = vsel %vm8780_vm0, %v795_v27, %v797_v9 }
  0x5d   : > { %747 = vrot.lane.b32.xlu1 %v716_v37, %s5363_s25  ;;  %825 = vrot.lane.b32.xlu0 %v792_v39, %s5362_s24  ;;  %v881_v37 = vor.u32 %v880_v33, %v879_v5 }
  0x5f   : > { %v882_v41 = vsel %vm8778_vm5, %v877_v2, %v881_v37  ;;  %v722_v2 = vsel %vm705_vm1, %v719_v32, %v721_v57 }
  0x61   : > { %941 = vrot.lane.b32.xlu1 %v874_v43, %s5368_s16  ;;  %992 = vrot.lane.b32.xlu0 %v5570_v30, %s5361_s23  ;;  %v1296_v30 = vsel %vm8780_vm0, %v1293_v25, %v1295_v52  ;;  %v5728_v25 = vld [vmem:[%s5461_s22 + $0x50] sm:$0xf] }
  0x62   : > { %v5741_v58 = vcombine.low %v429_v22, %v5728_v25  ;;  %v5802_v22 = vcombine.low %v5728_v25, %v431_v48 }
  0x64   : > { %v1158_v35 = vshrl.u32 %v5741_v58, 16  ;;  %v1161_v36 = vshll.u32 %v5741_v58, 16  ;;  %v1037_v43 = vrot.slane %v5741_v58, 2  ;;  %v1299_v53 = vrot.slane %v5741_v58, 3 }
  0x65   : > { %1065 = vrot.lane.b32.xlu1 %v1034_v49, %s5364_s26  ;;  %1260 = vrot.lane.b32.xlu0 %v1147_v47, %s5367_s29  ;;  %v5766_v49 = vld [vmem:[%s5461_s22 + $0x58] sm:$0xf]  ;;  %v608_v47 = vshll.u32 %v5762_v45, 16  ;;  %v616_v25 = vshll.u32 %v5802_v22, 16  ;;  %v620_v32 = vshrl.u32 %v5802_v22, 16 }
  0x66   : > { %v1160_v39 = vrot.slane %v1158_v35, 2  ;;  %v1163_v40 = vrot.slane %v1161_v36, 3  ;;  %v5779_v60 = vcombine.low %v431_v48, %v5766_v49 }
  0x67   : > { %v610_v27 = vrot.slane %v608_v47, 1 }
  0x68   : > { %v1164_v42 = vor.u32 %v1163_v40, %v1160_v39  ;;  %v1167_v63 = vshrl.u32 %v5779_v60, 16  ;;  %v1170_v0 = vshll.u32 %v5779_v60, 16  ;;  %v799_v40 = vrot.slane %v5802_v22, 3 }
  0x69   : > { %1329 = vrot.lane.b32.xlu1 %v1296_v30, %s5366_s28  ;;  %681 = vrot.lane.b32.xlu0 %v587_v62, %s5365_s27  ;;  %v602_v30 = vrot.slane %v600_v28, 1  ;;  %v884_v62 = vrot.slane %v608_v47, 4 }
  0x6a   : > { %v1165_v50 = vsel %vm1094_vm4, %v1155_v21, %v1164_v42  ;;  %v1169_v10 = vrot.slane %v1167_v63, 2  ;;  %v1039_v21 = vrot.slane %v5779_v60, 2 }
  0x6b   : > { %v603_v51 = vsel %vm535_vm3, %v598_v56, %v602_v30 }
  0x6c   : > { %v1040_v16 = vsel %vm1023_vm2, %v1037_v43, %v1039_v21 }
  0x6d   : > { %749 = vrot.lane.b32.xlu1 %v718_v1, %s5363_s25  ;;  %827 = vrot.lane.b32.xlu0 %v794_v3, %s5362_s24  ;;  %v885_v3 = vor.u32 %v884_v62, %v883_v61 }
  0x71   : > { %943 = vrot.lane.b32.xlu1 %v878_v15, %s5368_s16  ;;  %994 = vrot.lane.b32.xlu0 %v5612_v54, %s5361_s23  ;;  %v1298_v54 = vsel %vm8780_vm0, %v1295_v52, %v1297_v26  ;;  %v1038_v52 = vsel %vm1023_vm2, %v1035_v17, %v1037_v43  ;;  %v1172_v15 = vrot.slane %v1170_v0, 3  ;;  %v886_v17 = vsel %vm8778_vm5, %v881_v37, %v885_v3 }
  0x72   : > { %v887_v37 = vrot.slane %v620_v32, 3 }
  0x73   : > { %v5804_v28 = vor.u32 %v1172_v15, %v1169_v10  ;;  %v5868_v15 = vld [vmem:[%s5461_s22 + $0x68] sm:$0xf] }
  0x75   : > { %1067 = vrot.lane.b32.xlu1 %v1036_v23, %s5364_s26  ;;  %1262 = vrot.lane.b32.xlu0 %v1156_v12, %s5367_s29  ;;  %v433_v12 = vld [vmem:[%s5461_s22 + $0x5c] sm:$0xf]  ;;  %v1174_v33 = vsel %vm1094_vm4, %v1164_v42, %v5804_v28 }
  0x76   : > { %v5857_v62 = vcombine.low %v5766_v49, %v433_v12 }
  0x79   : > { %1331 = vrot.lane.b32.xlu1 %v1298_v54, %s5366_s28  ;;  %683 = vrot.lane.b32.xlu0 %v595_v34, %s5365_s27  ;;  %v1301_v54 = vrot.slane %v5779_v60, 3  ;;  %v606_v34 = vor.u32 %v604_v29, %v602_v30  ;;  %v888_v29 = vrot.slane %v616_v25, 4 }
  0x7b   : > { %v1302_v36 = vsel %vm8780_vm0, %v1299_v53, %v1301_v54  ;;  %v611_v39 = vsel %vm535_vm3, %v606_v34, %v610_v27 }
  0x7d   : > { %751 = vrot.lane.b32.xlu1 %v720_v24, %s5363_s25  ;;  %829 = vrot.lane.b32.xlu0 %v796_v38, %s5362_s24  ;;  %v723_v24 = vrot.slane %v5762_v45, 1 }
  0x81   : > { %945 = vrot.lane.b32.xlu1 %v882_v41, %s5368_s16  ;;  %996 = vrot.lane.b32.xlu0 %v5662_v31, %s5361_s23  ;;  %v1300_v31 = vsel %vm8780_vm0, %v1297_v26, %v1299_v53  ;;  %v5845_v53 = vor.u32 %v888_v29, %v887_v37 }
  0x85   : > { %1069 = vrot.lane.b32.xlu1 %v1038_v52, %s5364_s26  ;;  %1264 = vrot.lane.b32.xlu0 %v1165_v50, %s5367_s29  ;;  %v724_v52 = vsel %vm705_vm1, %v721_v57, %v723_v24  ;;  %v800_v50 = vsel %vm8780_vm0, %v797_v9, %v799_v40  ;;  %v890_v57 = vsel %vm8778_vm5, %v885_v3, %v5845_v53 }
  0x89   : > { %1333 = vrot.lane.b32.xlu1 %v1300_v31, %s5366_s28  ;;  %685 = vrot.lane.b32.xlu0 %v603_v51, %s5365_s27 }
  0x8a   : > { %v5793_v1 = vpop.permute.xlu0 %984 }
  0x8d   : > { %753 = vrot.lane.b32.xlu1 %v722_v2, %s5363_s25  ;;  %831 = vrot.lane.b32.xlu0 %v798_v4, %s5362_s24  ;;  %v435_v2 = vld [vmem:[%s5461_s22 + $0x64] sm:$0xf] }
  0x8f   : > { %v818_v23 = vpop.permute.xlu1 %817  ;;  %v740_v26 = vpop.permute.xlu0 %739 }
  0x91   : > { %947 = vrot.lane.b32.xlu1 %v886_v17, %s5368_s16  ;;  %998 = vrot.lane.b32.xlu0 %v5703_v59, %s5361_s23  ;;  %v5824_v59 = vcombine.low %v433_v12, %v5808_v8  ;;  %v614_v17 = vor.u32 %v612_v55, %v610_v27 }
  0x93   : > { %v1058_v5 = vpop.permute.xlu1 %1057  ;;  %v672_v35 = vpop.permute.xlu0 %671  ;;  %v1176_v41 = vshrl.u32 %v5824_v59, 16  ;;  %v1179_v43 = vshll.u32 %v5824_v59, 16  ;;  %v1041_v61 = vrot.slane %v5824_v59, 2  ;;  %v1303_v3 = vrot.slane %v5824_v59, 3 }
  0x94   : > { %v1357_v48 = vsel %vm1355_vm8, %v5484_v13, %v672_v35  ;;  %v725_v35 = vrot.slane %v5802_v22, 1 }
  0x95   : > { %1071 = vrot.lane.b32.xlu1 %v1040_v16, %s5364_s26  ;;  %1266 = vrot.lane.b32.xlu0 %v1174_v33, %s5367_s29  ;;  %v1178_v56 = vrot.slane %v1176_v41, 2  ;;  %v1181_v30 = vrot.slane %v1179_v43, 3  ;;  %v1392_v31 = vsel %vm1390_vm9, %v1357_v48, %v740_v26  ;;  %v628_v16 = vshrl.u32 %v5857_v62, 16 }
  0x96   : > { %v1427_v63 = vsel %vm1425_vm10, %v1392_v31, %v818_v23  ;;  %v618_v23 = vrot.slane %v616_v25, 1  ;;  %v5892_v25 = vcombine.low %v435_v2, %v5868_v15  ;;  %v801_v41 = vrot.slane %v5857_v62, 3 }
  0x97   : > { %v1322_v38 = vpop.permute.xlu1 %1321  ;;  %v1253_v42 = vpop.permute.xlu0 %1252  ;;  %v5862_v0 = vor.u32 %v1181_v30, %v1178_v56  ;;  %v891_v37 = vrot.slane %v628_v16, 3 }
  0x98   : > { %v1185_v43 = vshrl.u32 %v5892_v25, 16  ;;  %v802_v31 = vsel %vm8780_vm0, %v799_v40, %v801_v41 }
  0x99   : > { %1335 = vrot.lane.b32.xlu1 %v1302_v36, %s5366_s28  ;;  %687 = vrot.lane.b32.xlu0 %v611_v39, %s5365_s27  ;;  %v1183_v55 = vsel %vm1094_vm4, %v5804_v28, %v5862_v0  ;;  %v1304_v28 = vsel %vm8780_vm0, %v1301_v54, %v1303_v3  ;;  %v619_v36 = vsel %vm535_vm3, %v614_v17, %v618_v23  ;;  %v1188_v54 = vshll.u32 %v5892_v25, 16  ;;  %v437_v17 = vld [vmem:[%s5461_s22 + $0x6c] sm:$0xf] }
  0x9b   : > { %v742_v47 = vpop.permute.xlu1 %741  ;;  %v674_v13 = vpop.permute.xlu0 %673 }
  0x9c   : > { %v1359_v51 = vsel %vm1355_vm8, %v5480_v11, %v674_v13  ;;  %v1042_v11 = vsel %vm1023_vm2, %v1039_v21, %v1041_v61  ;;  %v1187_v13 = vrot.slane %v1185_v43, 2 }
  0x9d   : > { %755 = vrot.lane.b32.xlu1 %v724_v52, %s5363_s25  ;;  %833 = vrot.lane.b32.xlu0 %v800_v50, %s5362_s24  ;;  %v1394_v12 = vsel %vm1390_vm9, %v1359_v51, %v742_v47  ;;  %v5371_v52 = vmov 0   ;;  %v726_v47 = vsel %vm705_vm1, %v723_v24, %v725_v35 }
  0x9e   : > { %5238 = vset.pattern.permute.xlu0 %v5371_v52  ;;  %5239 = vset.pattern.permute.xlu1 %v5371_v52 }
  0x9f   : > { %v934_v9 = vpop.permute.xlu1 %933  ;;  %v820_v10 = vpop.permute.xlu0 %819 }
  0xa0   : > { %v1462_v4 = vsel %vm1460_vm11, %v1427_v63, %v934_v9  ;;  %v1429_v33 = vsel %vm1425_vm10, %v1394_v12, %v820_v10  ;;  %v1043_v63 = vrot.slane %v5892_v25, 2 }
  0xa1   : > { %v1497_v49 = vsel %vm8776_vm12, %v1462_v4, %v5793_v1  ;;  %949 = vrot.lane.b32.xlu1 %v890_v57, %s5368_s16  ;;  %1000 = vrot.lane.b32.xlu0 %v5741_v58, %s5361_s23  ;;  %v624_v1 = vshll.u32 %v5857_v62, 16  ;;  %v1190_v57 = vrot.slane %v1188_v54, 3  ;;  %v5945_v4 = vcombine.low %v5808_v8, %v435_v2 }
  0xa2   : > { %v1532_v26 = vsel %vm8770_vm13, %v1497_v49, %v1058_v5  ;;  %v1044_v8 = vsel %vm1023_vm2, %v1041_v61, %v1043_v63  ;;  %v1305_v2 = vrot.slane %v5892_v25, 3 }
  0xa3   : > { %v936_v34 = vpop.permute.xlu1 %935  ;;  %v1567_v21 = vsel %vm8769_vm14, %v1532_v26, %v1253_v42  ;;  %v987_v27 = vpop.permute.xlu0 %986  ;;  %v892_v29 = vrot.slane %v624_v1, 4  ;;  %v5952_v26 = vld [vmem:[%s5461_s22 + $0x70] sm:$0xf]  ;;  %v632_v12 = vshll.u32 %v5945_v4, 16 }
  0xa4   : > { %v1464_v5 = vsel %vm1460_vm11, %v1429_v33, %v936_v34  ;;  %v1602_v58 = vsel %vm8768_vm15, %v1567_v21, %v1322_v38  ;;  %v636_v33 = vshrl.u32 %v5945_v4, 16 }
  0xa5   : > { %1073 = vrot.lane.b32.xlu1 %v1042_v11, %s5364_s26  ;;  %5029 = vmatmul.mubr.msk.bf16.vlgmr.msra.gmra.mxu0 %vm8767_vm6, %v1602_v58  ;;  %v1499_v38 = vsel %vm8776_vm12, %v1464_v5, %v987_v27  ;;  %v5924_v50 = vor.u32 %v892_v29, %v891_v37  ;;  %v727_v5 = vrot.slane %v5857_v62, 1  ;;  %v896_v58 = vrot.slane %v632_v12, 4 }
  0xa6   : > { %1268 = vrot.lane.b32.xlu0 %v1183_v55, %s5367_s29  ;;  %5032 = vmatprep.mubr.msk.bf16.mxu0 %vm8765_vm7, %v8771_v7  ;;  %v895_v27 = vrot.slane %v636_v33, 3 }
  0xa7   : > { %v1060_v39 = vpop.permute.xlu1 %1059  ;;  %v1255_v48 = vpop.permute.xlu0 %1254  ;;  %v894_v40 = vsel %vm8778_vm5, %v5845_v53, %v5924_v50  ;;  %v622_v53 = vor.u32 %v620_v32, %v618_v23  ;;  %v5974_v23 = vcombine.low %v437_v17, %v5952_v26 }
  0xa8   : > { %v1534_v42 = vsel %vm8770_vm13, %v1499_v38, %v1060_v39  ;;  %v6000_v54 = vor.u32 %v896_v58, %v895_v27 }
  0xa9   : > { %1337 = vrot.lane.b32.xlu1 %v1304_v28, %s5366_s28  ;;  %v1569_v56 = vsel %vm8769_vm14, %v1534_v42, %v1255_v48  ;;  %v1194_v29 = vshrl.u32 %v5974_v23, 16  ;;  %v1197_v38 = vshll.u32 %v5974_v23, 16 }
  0xaa   : > { %689 = vrot.lane.b32.xlu0 %v619_v36, %s5365_s27 }
  0xab   : > { %v1324_v30 = vpop.permute.xlu1 %1323  ;;  %v676_v9 = vpop.permute.xlu0 %675 }
  0xac   : > { %v1604_v51 = vsel %vm8768_vm15, %v1569_v56, %v1324_v30  ;;  %v1361_v24 = vsel %vm1355_vm8, %v5471_v6, %v676_v9  ;;  %v5947_v6 = vor.u32 %v1190_v57, %v1187_v13  ;;  %v1199_v56 = vrot.slane %v1197_v38, 3 }
  0xad   : > { %757 = vrot.lane.b32.xlu1 %v726_v47, %s5363_s25  ;;  %5033 = vmatmul.mubr.msk.bf16.gmra.mxu0 %vm8767_vm6, %v1604_v51  ;;  %v1196_v47 = vrot.slane %v1194_v29, 2  ;;  %v1045_v13 = vrot.slane %v5974_v23, 2  ;;  %v6021_v57 = vcombine.low %v5868_v15, %v437_v17 }
  0xae   : > { %835 = vrot.lane.b32.xlu0 %v802_v31, %s5362_s24  ;;  %5036 = vmatprep.mubr.msk.bf16.mxu0 %vm8765_vm7, %v8771_v7  ;;  %v1192_v32 = vsel %vm1094_vm4, %v5862_v0, %v5947_v6  ;;  %v1306_v0 = vsel %vm8780_vm0, %v1303_v3, %v1305_v2  ;;  %v728_v3 = vsel %vm705_vm1, %v725_v35, %v727_v5 }
  0xaf   : > { %v744_v10 = vpop.permute.xlu1 %743  ;;  %v822_v11 = vpop.permute.xlu0 %821  ;;  %v1046_v15 = vsel %vm1023_vm2, %v1043_v63, %v1045_v13  ;;  %v640_v17 = vshll.u32 %v6021_v57, 16  ;;  %v805_v27 = vrot.slane %v6021_v57, 3 }
  0xb0   : > { %v1396_v49 = vsel %vm1390_vm9, %v1361_v24, %v744_v10  ;;  %v6028_v10 = vld [vmem:[%s5461_s22 + $0x78] sm:$0xf] }
  0xb1   : > { %951 = vrot.lane.b32.xlu1 %v894_v40, %s5368_s16  ;;  %v1431_v34 = vsel %vm1425_vm10, %v1396_v49, %v822_v11  ;;  %v439_v40 = vld [vmem:[%s5461_s22 + $0x74] sm:$0xf]  ;;  %v634_v49 = vrot.slane %v632_v12, 1  ;;  %v1307_v11 = vrot.slane %v5974_v23, 3 }
  0xb2   : > { %1002 = vrot.lane.b32.xlu0 %v5779_v60, %s5361_s23  ;;  %v626_v60 = vrot.slane %v624_v1, 1  ;;  %v803_v1 = vrot.slane %v5945_v4, 3 }
  0xb3   : > { %v938_v21 = vpop.permute.xlu1 %937  ;;  %v989_v55 = vpop.permute.xlu0 %988 }
  0xb4   : > { %v1466_v61 = vsel %vm1460_vm11, %v1431_v34, %v938_v21  ;;  %v627_v37 = vsel %vm535_vm3, %v622_v53, %v626_v60  ;;  %v804_v52 = vsel %vm8780_vm0, %v801_v41, %v803_v1  ;;  %v898_v41 = vsel %vm8778_vm5, %v5924_v50, %v6000_v54 }
  0xb5   : > { %1075 = vrot.lane.b32.xlu1 %v1044_v8, %s5364_s26  ;;  %v1501_v28 = vsel %vm8776_vm12, %v1466_v61, %v989_v55  ;;  %v630_v50 = vor.u32 %v628_v16, %v626_v60  ;;  %v644_v53 = vshrl.u32 %v6021_v57, 16  ;;  %v900_v61 = vrot.slane %v640_v17, 4 }
  0xb6   : > { %1270 = vrot.lane.b32.xlu0 %v1192_v32, %s5367_s29  ;;  %v1308_v32 = vsel %vm8780_vm0, %v1305_v2, %v1307_v11 }
  0xb7   : > { %v1062_v36 = vpop.permute.xlu1 %1061  ;;  %v1257_v43 = vpop.permute.xlu0 %1256  ;;  %v635_v63 = vsel %vm535_vm3, %v630_v50, %v634_v49  ;;  %v899_v60 = vrot.slane %v644_v53, 3 }
  0xb8   : > { %v1536_v39 = vsel %vm8770_vm13, %v1501_v28, %v1062_v36 }
  0xb9   : > { %1339 = vrot.lane.b32.xlu1 %v1306_v0, %s5366_s28  ;;  %v1571_v42 = vsel %vm8769_vm14, %v1536_v39, %v1257_v43  ;;  %v6074_v29 = vor.u32 %v900_v61, %v899_v60  ;;  %v806_v43 = vsel %vm8780_vm0, %v803_v1, %v805_v27 }
  0xba   : > { %691 = vrot.lane.b32.xlu0 %v627_v37, %s5365_s27 }
  0xbb   : > { %v1326_v48 = vpop.permute.xlu1 %1325  ;;  %v678_v31 = vpop.permute.xlu0 %677  ;;  %v902_v1 = vsel %vm8778_vm5, %v6000_v54, %v6074_v29  ;;  %v638_v54 = vor.u32 %v636_v33, %v634_v49 }
  0xbc   : > { %v1606_v30 = vsel %vm8768_vm15, %v1571_v42, %v1326_v48  ;;  %v1363_v35 = vsel %vm1355_vm8, %v5486_v14, %v678_v31  ;;  %v6023_v14 = vor.u32 %v1199_v56, %v1196_v47  ;;  %v6095_v56 = vcombine.low %v5952_v26, %v439_v40 }
  0xbd   : > { %759 = vrot.lane.b32.xlu1 %v728_v3, %s5363_s25  ;;  %5037 = vmatmul.mubr.msk.bf16.gmra.mxu0 %vm8767_vm6, %v1606_v30 }
  0xbe   : > { %837 = vrot.lane.b32.xlu0 %v804_v52, %s5362_s24  ;;  %5040 = vmatprep.mubr.msk.bf16.mxu0 %vm8765_vm7, %v8771_v7  ;;  %v1201_v16 = vsel %vm1094_vm4, %v5947_v6, %v6023_v14  ;;  %v729_v6 = vrot.slane %v5945_v4, 1  ;;  %v652_v50 = vshrl.u32 %v6095_v56, 16 }
  0xbf   : > { %v746_v51 = vpop.permute.xlu1 %745  ;;  %v824_v24 = vpop.permute.xlu0 %823 }
  0xc0   : > { %v1398_v9 = vsel %vm1390_vm9, %v1363_v35, %v746_v51  ;;  %v730_v2 = vsel %vm705_vm1, %v727_v5, %v729_v6  ;;  %v6102_v51 = vld [vmem:[%s5461_s22 + $0x80] sm:$0xf] }
  0xc1   : > { %953 = vrot.lane.b32.xlu1 %v898_v41, %s5368_s16  ;;  %v1433_v8 = vsel %vm1425_vm10, %v1398_v9, %v824_v24  ;;  %v441_v41 = vld [vmem:[%s5461_s22 + $0x7c] sm:$0xf]  ;;  %v642_v9 = vrot.slane %v640_v17, 1 }
  0xc2   : > { %1004 = vrot.lane.b32.xlu0 %v5824_v59, %s5361_s23  ;;  %v6048_v59 = vcombine.low %v439_v40, %v6028_v10  ;;  %v648_v40 = vshll.u32 %v6095_v56, 16 }
  0xc3   : > { %v940_v34 = vpop.permute.xlu1 %939  ;;  %v991_v21 = vpop.permute.xlu0 %990 }
  0xc4   : > { %v1468_v12 = vsel %vm1460_vm11, %v1433_v8, %v940_v34  ;;  %v1203_v58 = vshrl.u32 %v6048_v59, 16  ;;  %v1206_v28 = vshll.u32 %v6048_v59, 16  ;;  %v1047_v47 = vrot.slane %v6048_v59, 2 }
  0xc5   : > { %1077 = vrot.lane.b32.xlu1 %v1046_v15, %s5364_s26  ;;  %v1503_v55 = vsel %vm8776_vm12, %v1468_v12, %v991_v21  ;;  %v1309_v24 = vrot.slane %v6048_v59, 3  ;;  %v904_v12 = vrot.slane %v648_v40, 4 }
  0xc6   : > { %1272 = vrot.lane.b32.xlu0 %v1201_v16, %s5367_s29  ;;  %v1205_v3 = vrot.slane %v1203_v58, 2  ;;  %v1208_v42 = vrot.slane %v1206_v28, 3  ;;  %v1048_v26 = vsel %vm1023_vm2, %v1045_v13, %v1047_v47  ;;  %v731_v13 = vrot.slane %v6021_v57, 1 }
  0xc7   : > { %v1064_v0 = vpop.permute.xlu1 %1063  ;;  %v1259_v37 = vpop.permute.xlu0 %1258  ;;  %v1310_v34 = vsel %vm8780_vm0, %v1307_v11, %v1309_v24  ;;  %v903_v16 = vrot.slane %v652_v50, 3 }
  0xc8   : > { %v1538_v36 = vsel %vm8770_vm13, %v1503_v55, %v1064_v0  ;;  %v732_v11 = vsel %vm705_vm1, %v729_v6, %v731_v13 }
  0xc9   : > { %1341 = vrot.lane.b32.xlu1 %v1308_v32, %s5366_s28  ;;  %v1573_v38 = vsel %vm8769_vm14, %v1538_v36, %v1259_v37  ;;  %v807_v32 = vrot.slane %v6095_v56, 3  ;;  %v6148_v58 = vor.u32 %v904_v12, %v903_v16 }
  0xca   : > { %693 = vrot.lane.b32.xlu0 %v635_v63, %s5365_s27 }
  0xcb   : > { %v1328_v39 = vpop.permute.xlu1 %1327  ;;  %v680_v52 = vpop.permute.xlu0 %679  ;;  %v808_v37 = vsel %vm8780_vm0, %v805_v27, %v807_v32  ;;  %v906_v27 = vsel %vm8778_vm5, %v6074_v29, %v6148_v58 }
  0xcc   : > { %v1608_v48 = vsel %vm8768_vm15, %v1573_v38, %v1328_v39  ;;  %v1365_v5 = vsel %vm1355_vm8, %v5553_v20, %v680_v52  ;;  %v6097_v20 = vor.u32 %v1208_v42, %v1205_v3  ;;  %v6169_v42 = vcombine.low %v6028_v10, %v441_v41 }
  0xcd   : > { %761 = vrot.lane.b32.xlu1 %v730_v2, %s5363_s25  ;;  %5041 = vmatmul.mubr.msk.bf16.gmra.mxu0 %vm8767_vm6, %v1608_v48 }
  0xce   : > { %839 = vrot.lane.b32.xlu0 %v806_v43, %s5362_s24  ;;  %5044 = vmatprep.mubr.msk.bf16.mxu0 %vm8765_vm7, %v8771_v7  ;;  %v1210_v33 = vsel %vm1094_vm4, %v6023_v14, %v6097_v20  ;;  %v643_v14 = vsel %vm535_vm3, %v638_v54, %v642_v9  ;;  %v660_v54 = vshrl.u32 %v6169_v42, 16 }
  0xcf   : > { %v748_v30 = vpop.permute.xlu1 %747  ;;  %v826_v35 = vpop.permute.xlu0 %825 }
  0xd0   : > { %v1400_v31 = vsel %vm1390_vm9, %v1365_v5, %v748_v30  ;;  %v6176_v30 = vld [vmem:[%s5461_s22 + $0x88] sm:$0xf] }
  0xd1   : > { %955 = vrot.lane.b32.xlu1 %v902_v1, %s5368_s16  ;;  %v1435_v15 = vsel %vm1425_vm10, %v1400_v31, %v826_v35  ;;  %v443_v1 = vld [vmem:[%s5461_s22 + $0x84] sm:$0xf]  ;;  %v646_v31 = vor.u32 %v644_v53, %v642_v9  ;;  %v650_v35 = vrot.slane %v648_v40, 1 }
  0xd2   : > { %1006 = vrot.lane.b32.xlu0 %v5892_v25, %s5361_s23  ;;  %v6122_v25 = vcombine.low %v441_v41, %v6102_v51  ;;  %v656_v41 = vshll.u32 %v6169_v42, 16 }
  0xd3   : > { %v942_v8 = vpop.permute.xlu1 %941  ;;  %v993_v17 = vpop.permute.xlu0 %992  ;;  %v651_v40 = vsel %vm535_vm3, %v646_v31, %v650_v35 }
  0xd4   : > { %v1470_v49 = vsel %vm1460_vm11, %v1435_v15, %v942_v8  ;;  %v1212_v60 = vshrl.u32 %v6122_v25, 16  ;;  %v1215_v61 = vshll.u32 %v6122_v25, 16  ;;  %v1049_v3 = vrot.slane %v6122_v25, 2 }
  0xd5   : > { %1079 = vrot.lane.b32.xlu1 %v1048_v26, %s5364_s26  ;;  %v1505_v21 = vsel %vm8776_vm12, %v1470_v49, %v993_v17  ;;  %v1311_v29 = vrot.slane %v6122_v25, 3  ;;  %v908_v49 = vrot.slane %v656_v41, 4 }
  0xd6   : > { %1274 = vrot.lane.b32.xlu0 %v1210_v33, %s5367_s29  ;;  %v1214_v2 = vrot.slane %v1212_v60, 2  ;;  %v1217_v38 = vrot.slane %v1215_v61, 3  ;;  %v1050_v10 = vsel %vm1023_vm2, %v1047_v47, %v1049_v3  ;;  %v907_v33 = vrot.slane %v660_v54, 3 }
  0xd7   : > { %v1066_v63 = vpop.permute.xlu1 %1065  ;;  %v1261_v0 = vpop.permute.xlu0 %1260  ;;  %v1312_v47 = vsel %vm8780_vm0, %v1309_v24, %v1311_v29 }
  0xd8   : > { %v1540_v55 = vsel %vm8770_vm13, %v1505_v21, %v1066_v63  ;;  %v6222_v60 = vor.u32 %v908_v49, %v907_v33 }
  0xd9   : > { %1343 = vrot.lane.b32.xlu1 %v1310_v34, %s5366_s28  ;;  %v1575_v28 = vsel %vm8769_vm14, %v1540_v55, %v1261_v0 }
  0xda   : > { %695 = vrot.lane.b32.xlu0 %v643_v14, %s5365_s27  ;;  %v809_v14 = vrot.slane %v6169_v42, 3 }
  0xdb   : > { %v1330_v36 = vpop.permute.xlu1 %1329  ;;  %v682_v43 = vpop.permute.xlu0 %681 }
  0xdc   : > { %v1610_v39 = vsel %vm8768_vm15, %v1575_v28, %v1330_v36  ;;  %v1367_v6 = vsel %vm1355_vm8, %v5595_v44, %v682_v43  ;;  %v6171_v44 = vor.u32 %v1217_v38, %v1214_v2  ;;  %v810_v0 = vsel %vm8780_vm0, %v807_v32, %v809_v14 }
  0xdd   : > { %763 = vrot.lane.b32.xlu1 %v732_v11, %s5363_s25  ;;  %5045 = vmatmul.mubr.msk.bf16.gmra.mxu0 %vm8767_vm6, %v1610_v39  ;;  %v910_v32 = vsel %vm8778_vm5, %v6148_v58, %v6222_v60  ;;  %v6243_v38 = vcombine.low %v6102_v51, %v443_v1 }
  0xde   : > { %841 = vrot.lane.b32.xlu0 %v808_v37, %s5362_s24  ;;  %5048 = vmatprep.mubr.msk.bf16.mxu0 %vm8765_vm7, %v8771_v7  ;;  %v1219_v53 = vsel %vm1094_vm4, %v6097_v20, %v6171_v44  ;;  %v733_v20 = vrot.slane %v6095_v56, 1 }
  0xdf   : > { %v750_v48 = vpop.permute.xlu1 %749  ;;  %v828_v5 = vpop.permute.xlu0 %827  ;;  %v668_v31 = vshrl.u32 %v6243_v38, 16 }
  0xe0   : > { %v1402_v52 = vsel %vm1390_vm9, %v1367_v6, %v750_v48  ;;  %v734_v63 = vsel %vm705_vm1, %v731_v13, %v733_v20  ;;  %v6250_v48 = vld [vmem:[%s5461_s22 + $0x90] sm:$0xf] }
  0xe1   : > { %957 = vrot.lane.b32.xlu1 %v906_v27, %s5368_s16  ;;  %v1437_v26 = vsel %vm1425_vm10, %v1402_v52, %v828_v5  ;;  %v445_v27 = vld [vmem:[%s5461_s22 + $0x8c] sm:$0xf]  ;;  %v654_v52 = vor.u32 %v652_v50, %v650_v35  ;;  %v658_v5 = vrot.slane %v656_v41, 1  ;;  %v911_v41 = vrot.slane %v668_v31, 3 }
  0xe2   : > { %1008 = vrot.lane.b32.xlu0 %v5974_v23, %s5361_s23  ;;  %v6196_v23 = vcombine.low %v443_v1, %v6176_v30  ;;  %v664_v1 = vshll.u32 %v6243_v38, 16 }
  0xe3   : > { %v944_v15 = vpop.permute.xlu1 %943  ;;  %v995_v8 = vpop.permute.xlu0 %994  ;;  %v659_v35 = vsel %vm535_vm3, %v654_v52, %v658_v5  ;;  %v6340_v52 = vld [vmem:[%s5461_s22 + $0x94] sm:$0xff]  }
  0xe4   : > { %v1472_v9 = vsel %vm1460_vm11, %v1437_v26, %v944_v15  ;;  %v1221_v16 = vshrl.u32 %v6196_v23, 16  ;;  %v1224_v12 = vshll.u32 %v6196_v23, 16  ;;  %v1051_v2 = vrot.slane %v6196_v23, 2 }
  0xe5   : > { %1081 = vrot.lane.b32.xlu1 %v1050_v10, %s5364_s26  ;;  %v1507_v17 = vsel %vm8776_vm12, %v1472_v9, %v995_v8  ;;  %v1313_v51 = vrot.slane %v6196_v23, 3  ;;  %v6270_v15 = vcombine.low %v445_v27, %v6250_v48  ;;  %v912_v9 = vrot.slane %v664_v1, 4 }
  0xe6   : > { %1276 = vrot.lane.b32.xlu0 %v1219_v53, %s5367_s29  ;;  %v1223_v11 = vrot.slane %v1221_v16, 2  ;;  %v1226_v28 = vrot.slane %v1224_v12, 3  ;;  %v1052_v58 = vsel %vm1023_vm2, %v1049_v3, %v1051_v2 }
  0xe7   : > { %v1068_v34 = vpop.permute.xlu1 %1067  ;;  %v1263_v21 = vpop.permute.xlu0 %1262  ;;  %v1314_v50 = vsel %vm8780_vm0, %v1311_v29, %v1313_v51  ;;  %v1230_v33 = vshrl.u32 %v6270_v15, 16  ;;  %v1233_v49 = vshll.u32 %v6270_v15, 16  ;;  %v6296_v16 = vor.u32 %v912_v9, %v911_v41 }
  0xe8   : > { %v1542_v24 = vsel %vm8770_vm13, %v1507_v17, %v1068_v34 }
  0xe9   : > { %1345 = vrot.lane.b32.xlu1 %v1312_v47, %s5366_s28  ;;  %v1577_v61 = vsel %vm8769_vm14, %v1542_v24, %v1263_v21 }
  0xea   : > { %697 = vrot.lane.b32.xlu0 %v651_v40, %s5365_s27  ;;  %v811_v40 = vrot.slane %v6243_v38, 3 }
  0xeb   : > { %v1332_v55 = vpop.permute.xlu1 %1331  ;;  %v684_v37 = vpop.permute.xlu0 %683 }
  0xec   : > { %v1612_v36 = vsel %vm8768_vm15, %v1577_v61, %v1332_v55  ;;  %v1369_v13 = vsel %vm1355_vm8, %v5638_v18, %v684_v37  ;;  %v6245_v18 = vor.u32 %v1226_v28, %v1223_v11  ;;  %v812_v21 = vsel %vm8780_vm0, %v809_v14, %v811_v40 }
  0xed   : > { %765 = vrot.lane.b32.xlu1 %v734_v63, %s5363_s25  ;;  %5049 = vmatmul.mubr.msk.bf16.gmra.mxu0 %vm8767_vm6, %v1612_v36  ;;  %v1232_v63 = vrot.slane %v1230_v33, 2  ;;  %v1235_v61 = vrot.slane %v1233_v49, 3  ;;  %v914_v14 = vsel %vm8778_vm5, %v6222_v60, %v6296_v16  ;;  %v6317_v28 = vcombine.low %v6176_v30, %v445_v27 }
  0xee   : > { %843 = vrot.lane.b32.xlu0 %v810_v0, %s5362_s24  ;;  %5052 = vmatprep.mubr.msk.bf16.mxu0 %vm8765_vm7, %v8771_v7  ;;  %v1228_v3 = vsel %vm1094_vm4, %v6171_v44, %v6245_v18  ;;  %v735_v44 = vrot.slane %v6169_v42, 1  ;;  %v662_v30 = vor.u32 %v660_v54, %v658_v5 }
  0xef   : > { %v752_v39 = vpop.permute.xlu1 %751  ;;  %v830_v6 = vpop.permute.xlu0 %829  ;;  %v6319_v36 = vor.u32 %v1235_v61, %v1232_v63 }
  0xf0   : > { %v1404_v43 = vsel %vm1390_vm9, %v1369_v13, %v752_v39  ;;  %v736_v34 = vsel %vm705_vm1, %v733_v20, %v735_v44  ;;  %v1053_v20 = vrot.slane %v6270_v15, 2  ;;  %v666_v39 = vrot.slane %v664_v1, 1 }
  0xf1   : > { %959 = vrot.lane.b32.xlu1 %v910_v32, %s5368_s16  ;;  %v1439_v10 = vsel %vm1425_vm10, %v1404_v43, %v830_v6  ;;  %v1315_v32 = vrot.slane %v6270_v15, 3  ;;  %v916_v43 = vshrl.u32 %v6317_v28, 16  ;;  %v919_v6 = vshll.u32 %v6317_v28, 16 }
  0xf2   : > { %1010 = vrot.lane.b32.xlu0 %v6048_v59, %s5361_s23  ;;  %v1054_v60 = vsel %vm1023_vm2, %v1051_v2, %v1053_v20  ;;  %v1237_v2 = vsel %vm1094_vm4, %v6245_v18, %v6319_v36  ;;  %v667_v5 = vsel %vm535_vm3, %v662_v30, %v666_v39  ;;  %v737_v1 = vrot.slane %v6243_v38, 1 }
  0xf3   : > { %v946_v26 = vpop.permute.xlu1 %945  ;;  %v997_v53 = vpop.permute.xlu0 %996  ;;  %v1316_v54 = vsel %vm8780_vm0, %v1313_v51, %v1315_v32  ;;  %v918_v18 = vrot.slane %v916_v43, 3 }
  0xf4   : > { %v1474_v59 = vsel %vm1460_vm11, %v1439_v10, %v946_v26  ;;  %v921_v26 = vrot.slane %v919_v6, 4  ;;  %v738_v9 = vsel %vm705_vm1, %v735_v44, %v737_v1 }
  0xf5   : > { %1083 = vrot.lane.b32.xlu1 %v1052_v58, %s5364_s26  ;;  %v1509_v8 = vsel %vm8776_vm12, %v1474_v59, %v997_v53  ;;  %v813_v53 = vrot.slane %v6317_v28, 3 }
  0xf6   : > { %1278 = vrot.lane.b32.xlu0 %v1228_v3, %s5367_s29 }
  0xf7   : > { %v1070_v47 = vpop.permute.xlu1 %1069  ;;  %v1265_v17 = vpop.permute.xlu0 %1264  ;;  %v814_v49 = vsel %vm8780_vm0, %v811_v40, %v813_v53  ;;  %v4891_v40 = vcombine.low %v6250_v48, %v6250_v48 }
  0xf8   : > { %v1544_v29 = vsel %vm8770_vm13, %v1509_v8, %v1070_v47  ;;  %v922_v8 = vor.u32 %v921_v26, %v918_v18 }
  0xf9   : > { %1347 = vrot.lane.b32.xlu1 %v1314_v50, %s5366_s28  ;;  %v1579_v12 = vsel %vm8769_vm14, %v1544_v29, %v1265_v17  ;;  %v1239_v50 = vshrl.u32 %v6340_v52, 16 }
  0xfa   : > { %699 = vrot.lane.b32.xlu0 %v659_v35, %s5365_s27  ;;  %v1242_v35 = vshll.u32 %v6340_v52, 16  ;;  %v923_v44 = vsel %vm8778_vm5, %v6296_v16, %v922_v8 }
  0xfb   : > { %v1334_v24 = vpop.permute.xlu1 %1333  ;;  %v686_v0 = vpop.permute.xlu0 %685  ;;  %v1241_v29 = vrot.slane %v1239_v50, 2 }
  0xfc   : > { %v1614_v55 = vsel %vm8768_vm15, %v1579_v12, %v1334_v24  ;;  %v1371_v11 = vsel %vm1355_vm8, %v5686_v46, %v686_v0  ;;  %v1244_v17 = vrot.slane %v1242_v35, 3  ;;  %v1317_v0 = vrot.slane %v6340_v52, 3 }
  0xfd   : > { %767 = vrot.lane.b32.xlu1 %v736_v34, %s5363_s25  ;;  %5053 = vmatmul.mubr.msk.bf16.gmra.mxu0 %vm8767_vm6, %v1614_v55 }
  0xfe   : > { %845 = vrot.lane.b32.xlu0 %v812_v21, %s5362_s24  ;;  %5056 = vmatprep.mubr.msk.bf16.mxu0 %vm8765_vm7, %v8771_v7  ;;  %v1055_v21 = vrot.slane %v6340_v52, 2  ;;  %v1245_v61 = vor.u32 %v1244_v17, %v1241_v29  ;;  %v2049_v29 = vld [vmem:[%s6429_s21 + $0x8] sm:$0xff] }
  0xff   : > { %v754_v46 = vpop.permute.xlu1 %753  ;;  %v832_v13 = vpop.permute.xlu0 %831 }
 0x100   : > { %v1406_v37 = vsel %vm1390_vm9, %v1371_v11, %v754_v46  ;;  %v1056_v16 = vsel %vm1023_vm2, %v1053_v20, %v1055_v21  ;;  %v925_v11 = vshrl.u32 %v4891_v40, 16  ;;  %v1246_v46 = vsel %vm1094_vm4, %v6319_v36, %v1245_v61 }
 0x101   : > { %961 = vrot.lane.b32.xlu1 %v914_v14, %s5368_s16  ;;  %v1441_v27 = vsel %vm1425_vm10, %v1406_v37, %v832_v13  ;;  %v928_v14 = vshll.u32 %v4891_v40, 16  ;;  %v670_v20 = vor.u32 %v668_v31, %v666_v39  ;;  %v815_v36 = vrot.slane %v4891_v40, 3  ;;  %v2050_v40 = vld [vmem:[%s6429_s21 + $0x10] sm:$0xff] }
 0x102   : > { %1012 = vrot.lane.b32.xlu0 %v6122_v25, %s5361_s23 }
 0x103   : > { %v948_v58 = vpop.permute.xlu1 %947  ;;  %v999_v25 = vpop.permute.xlu0 %998  ;;  %v930_v30 = vrot.slane %v928_v14, 4  ;;  %v816_v31 = vsel %vm8780_vm0, %v813_v53, %v815_v36 }
 0x104   : > { %v1476_v10 = vsel %vm1460_vm11, %v1441_v27, %v948_v58  ;;  %v5280_v27 = vld [vmem:[%s5461_s22 + $0x9c] ss:$0 sps:$4 sm:$0x11]  }
 0x105   : > { %1085 = vrot.lane.b32.xlu1 %v1054_v60, %s5364_s26  ;;  %v1511_v3 = vsel %vm8776_vm12, %v1476_v10, %v999_v25  ;;  %v927_v60 = vrot.slane %v925_v11, 3  ;;  %v1248_v39 = vshll.u32 %v5280_v27, 16  ;;  %v2055_v11 = vld [vmem:[%s6429_s21 + $0x38] sm:$0xff] }
 0x106   : > { %1280 = vrot.lane.b32.xlu0 %v1237_v2, %s5367_s29 }
 0x107   : > { %v1072_v59 = vpop.permute.xlu1 %1071  ;;  %v1267_v51 = vpop.permute.xlu0 %1266  ;;  %v931_v52 = vor.u32 %v930_v30, %v927_v60  ;;  %v2056_v60 = vld [vmem:[%s6429_s21 + $0x40] sm:$0xff] }
 0x108   : > { %v1546_v41 = vsel %vm8770_vm13, %v1511_v3, %v1072_v59  ;;  %v1250_v3 = vrot.slane %v1248_v39, 3  ;;  %v2060_v39 = vld [vmem:[%s6429_s21 + $0x60] sm:$0xff] }
 0x109   : > { %1349 = vrot.lane.b32.xlu1 %v1316_v54, %s5366_s28  ;;  %v1581_v47 = vsel %vm8769_vm14, %v1546_v41, %v1267_v51  ;;  %v932_v18 = vsel %vm8778_vm5, %v922_v8, %v931_v52 }
 0x10a   : > { %701 = vrot.lane.b32.xlu0 %v667_v5, %s5365_s27  ;;  %v1251_v35 = vsel %vm1094_vm4, %v1245_v61, %v1250_v3  ;;  %v2053_v61 = vld [vmem:[%s6429_s21 + $0x28] sm:$0xff] }
 0x10b   : > { %v1336_v33 = vpop.permute.xlu1 %1335  ;;  %v688_v12 = vpop.permute.xlu0 %687 }
 0x10c   : > { %v1616_v34 = vsel %vm8768_vm15, %v1581_v47, %v1336_v33  ;;  %v1373_v24 = vsel %vm1355_vm8, %v5724_v19, %v688_v12  ;;  %v2048_v47 = vld [vmem:[%s6429_s21] sm:$0xff]  ;;  %v2051_v12 = vld [vmem:[%s6429_s21 + $0x18] sm:$0xff] }
 0x10d   : > { %769 = vrot.lane.b32.xlu1 %v738_v9, %s5363_s25  ;;  %5057 = vmatmul.mubr.msk.bf16.gmra.mxu0 %vm8767_vm6, %v1616_v34 }
 0x10e   : > { %847 = vrot.lane.b32.xlu0 %v814_v49, %s5362_s24  ;;  %5060 = vmatprep.mubr.msk.bf16.mxu0 %vm8765_vm7, %v8771_v7 }
 0x10f   : > { %v756_v63 = vpop.permute.xlu1 %755  ;;  %v834_v55 = vpop.permute.xlu0 %833 }
 0x110   : > { %v1408_v19 = vsel %vm1390_vm9, %v1373_v24, %v756_v63 }
 0x111   : > { %963 = vrot.lane.b32.xlu1 %v923_v44, %s5368_s16  ;;  %v1443_v48 = vsel %vm1425_vm10, %v1408_v19, %v834_v55 }
 0x112   : > { %1014 = vrot.lane.b32.xlu0 %v6196_v23, %s5361_s23  ;;  %v1318_v23 = vsel %vm8780_vm0, %v1315_v32, %v1317_v0 }
 0x113   : > { %v950_v28 = vpop.permute.xlu1 %949  ;;  %v1001_v13 = vpop.permute.xlu0 %1000 }
 0x114   : > { %v1478_v37 = vsel %vm1460_vm11, %v1443_v48, %v950_v28  ;;  %v2054_v28 = vld [vmem:[%s6429_s21 + $0x30] sm:$0xff] }
 0x115   : > { %1087 = vrot.lane.b32.xlu1 %v1056_v16, %s5364_s26  ;;  %v1513_v43 = vsel %vm8776_vm12, %v1478_v37, %v1001_v13  ;;  %v2052_v16 = vld [vmem:[%s6429_s21 + $0x20] sm:$0xff]  ;;  %v2057_v13 = vld [vmem:[%s6429_s21 + $0x48] sm:$0xff] }
 0x116   : > { %1282 = vrot.lane.b32.xlu0 %v1246_v46, %s5367_s29 }
 0x117   : > { %v1074_v6 = vpop.permute.xlu1 %1073 }
 0x118   : > { %v1548_v58 = vsel %vm8770_vm13, %v1513_v43, %v1074_v6  ;;  %v1269_v2 = vpop.permute.xlu0 %1268  ;;  %v2059_v6 = vld [vmem:[%s6429_s21 + $0x58] sm:$0xff] }
 0x119   : > { %1351 = vrot.lane.b32.xlu1 %v1318_v23, %s5366_s28  ;;  %v1583_v32 = vsel %vm8769_vm14, %v1548_v58, %v1269_v2  ;;  %v2058_v2 = vld [vmem:[%s6429_s21 + $0x50] sm:$0xff] }
 0x11a   : > { %703 = vrot.lane.b32.xlu0 %v670_v20, %s5365_s27 }
 0x11b   : > { %v1338_v10 = vpop.permute.xlu1 %1337 }
 0x11c   : > { %v1618_v25 = vsel %vm8768_vm15, %v1583_v32, %v1338_v10  ;;  %v690_v54 = vpop.permute.xlu0 %689  ;;  %v2061_v32 = vld [vmem:[%s6429_s21 + $0x68] sm:$0xff] }
 0x11d   : > { %v1375_v5 = vsel %vm1355_vm8, %v5762_v45, %v690_v54  ;;  %771 = vrot.lane.b32.xlu1 %v737_v1, %s5363_s25  ;;  %5061 = vmatmul.mubr.msk.bf16.gmra.mxu0 %vm8767_vm6, %v1618_v25  ;;  %v1319_v45 = vrot.slane %v5280_v27, 3  ;;  %v2063_v54 = vld [vmem:[%s6429_s21 + $0x78] sm:$0xff] }
 0x11e   : > { %849 = vrot.lane.b32.xlu0 %v816_v31, %s5362_s24  ;;  %5064 = vmatprep.mubr.msk.bf16.mxu0 %vm8765_vm7, %v8771_v7 }
 0x11f   : > { %v758_v26 = vpop.permute.xlu1 %757 }
 0x120   : > { %v1410_v59 = vsel %vm1390_vm9, %v1375_v5, %v758_v26  ;;  %v836_v53 = vpop.permute.xlu0 %835  ;;  %v2062_v26 = vld [vmem:[%s6429_s21 + $0x70] sm:$0xff] }
 0x121   : > { %965 = vrot.lane.b32.xlu1 %v932_v18, %s5368_s16  ;;  %v1445_v1 = vsel %vm1425_vm10, %v1410_v59, %v836_v53  ;;  %v2065_v53 = vld [vmem:[%s6429_s21 + $0x88] sm:$0xff] }
 0x122   : > { %1016 = vrot.lane.b32.xlu0 %v6270_v15, %s5361_s23  ;;  %v1320_v15 = vsel %vm8780_vm0, %v1317_v0, %v1319_v45 }
 0x123   : > { %v952_v50 = vpop.permute.xlu1 %951 }
 0x124   : > { %v1480_v41 = vsel %vm1460_vm11, %v1445_v1, %v952_v50  ;;  %v1003_v51 = vpop.permute.xlu0 %1002  ;;  %v2064_v50 = vld [vmem:[%s6429_s21 + $0x80] sm:$0xff] }
 0x125   : > { %1089 = vrot.lane.b32.xlu1 %v1055_v21, %s5364_s26  ;;  %v1515_v9 = vsel %vm8776_vm12, %v1480_v41, %v1003_v51  ;;  %v2067_v51 = vld [vmem:[%s6429_s21 + $0x98] sm:$0xff] }
 0x126   : > { %1284 = vrot.lane.b32.xlu0 %v1251_v35, %s5367_s29 }
 0x127   : > { %v1076_v8 = vpop.permute.xlu1 %1075 }
 0x128   : > { %v1550_v33 = vsel %vm8770_vm13, %v1515_v9, %v1076_v8  ;;  %v1271_v49 = vpop.permute.xlu0 %1270 }
 0x129   : > { %1353 = vrot.lane.b32.xlu1 %v1320_v15, %s5366_s28  ;;  %v1585_v17 = vsel %vm8769_vm14, %v1550_v33, %v1271_v49  ;;  %v2069_v49 = vld [vmem:[%s6429_s21 + $0xa8] sm:$0xff] }
 0x12a   : > { %2084 = vperm.xlu0 %5238, %v2048_v47   ;;  %v2066_v47 = vld [vmem:[%s6429_s21 + $0x90] sm:$0xff] }
 0x12b   : > { %v1340_v34 = vpop.permute.xlu1 %1339 }
 0x12c   : > { %v1620_v24 = vsel %vm8768_vm15, %v1585_v17, %v1340_v34  ;;  %v692_v44 = vpop.permute.xlu0 %691  ;;  %v2068_v34 = vld [vmem:[%s6429_s21 + $0xa0] sm:$0xff] }
 0x12d   : > { %v1377_v21 = vsel %vm1355_vm8, %v5802_v22, %v692_v44  ;;  %2089 = vperm.xlu1 %5239, %v2049_v29   ;;  %5065 = vmatmul.mubr.msk.bf16.gmra.mxu0 %vm8767_vm6, %v1620_v24  ;;  %v2071_v24 = vld [vmem:[%s6429_s21 + $0xb8] sm:$0xff] }
 0x12e   : > { %2099 = vperm.xlu0 %5238, %v2051_v12   ;;  %5068 = vmatprep.mubr.msk.bf16.mxu0 %vm8765_vm7, %v8771_v7 }
 0x12f   : > { %v760_v63 = vpop.permute.xlu1 %759 }
 0x130   : > { %v1412_v19 = vsel %vm1390_vm9, %v1377_v21, %v760_v63  ;;  %v838_v55 = vpop.permute.xlu0 %837 }
 0x131   : > { %2094 = vperm.xlu1 %5239, %v2050_v40   ;;  %v1447_v22 = vsel %vm1425_vm10, %v1412_v19, %v838_v55  ;;  %v2070_v40 = vld [vmem:[%s6429_s21 + $0xb0] sm:$0xff]  ;;  %v2073_v19 = vld [vmem:[%s6429_s21 + $0xc8] sm:$0xff] }
 0x132   : > { %2109 = vperm.xlu0 %5238, %v2053_v61  }
 0x133   : > { %v954_v0 = vpop.permute.xlu1 %953 }
 0x134   : > { %v1482_v14 = vsel %vm1460_vm11, %v1447_v22, %v954_v0  ;;  %v1005_v48 = vpop.permute.xlu0 %1004  ;;  %v2072_v22 = vld [vmem:[%s6429_s21 + $0xc0] sm:$0xff] }
 0x135   : > { %2104 = vperm.xlu1 %5239, %v2052_v16   ;;  %v1517_v46 = vsel %vm8776_vm12, %v1482_v14, %v1005_v48  ;;  %v2075_v14 = vld [vmem:[%s6429_s21 + $0xd8] sm:$0xff] }
 0x136   : > { %2119 = vperm.xlu0 %5238, %v2055_v11  }
 0x137   : > { %v1078_v37 = vpop.permute.xlu1 %1077 }
 0x138   : > { %v1552_v23 = vsel %vm8770_vm13, %v1517_v46, %v1078_v37  ;;  %v1273_v20 = vpop.permute.xlu0 %1272  ;;  %v2074_v37 = vld [vmem:[%s6429_s21 + $0xd0] sm:$0xff] }
 0x139   : > { %2114 = vperm.xlu1 %5239, %v2054_v28   ;;  %v1587_v30 = vsel %vm8769_vm14, %v1552_v23, %v1273_v20  ;;  %v2077_v23 = vld [vmem:[%s6429_s21 + $0xe8] sm:$0xff] }
 0x13a   : > { %2129 = vperm.xlu0 %5238, %v2057_v13  }
 0x13b   : > { %v1342_v43 = vpop.permute.xlu1 %1341 }
 0x13c   : > { %v1622_v36 = vsel %vm8768_vm15, %v1587_v30, %v1342_v43  ;;  %v694_v27 = vpop.permute.xlu0 %693  ;;  %v2076_v30 = vld [vmem:[%s6429_s21 + $0xe0] sm:$0xff] }
 0x13d   : > { %v1379_v58 = vsel %vm1355_vm8, %v5857_v62, %v694_v27  ;;  %2124 = vperm.xlu1 %5239, %v2056_v60   ;;  %5069 = vmatmul.mubr.msk.bf16.gmra.mxu0 %vm8767_vm6, %v1622_v36 }
 0x13e   : > { %2139 = vperm.xlu0 %5238, %v2059_v6   ;;  %5072 = vmatprep.mubr.msk.bf16.mxu0 %vm8765_vm7, %v8771_v7  ;;  %v2078_v6 = vld [vmem:[%s6429_s21 + $0xf0] sm:$0xff] }
 0x13f   : > { %v762_v52 = vpop.permute.xlu1 %761 }
 0x140   : > { %v1414_v10 = vsel %vm1390_vm9, %v1379_v58, %v762_v52  ;;  %v840_v31 = vpop.permute.xlu0 %839 }
 0x141   : > { %2134 = vperm.xlu1 %5239, %v2058_v2   ;;  %v1449_v62 = vsel %vm1425_vm10, %v1414_v10, %v840_v31  ;;  %v2079_v2 = vld [vmem:[%s6429_s21 + $0xf8] sm:$0xff]  ;;  %v2080_v31 = vld [vmem:[%s6429_s21 + $0x100] sm:$0xff] }
 0x142   : > { %2149 = vperm.xlu0 %5238, %v2061_v32  }
 0x143   : > { %v956_v25 = vpop.permute.xlu1 %955 }
 0x144   : > { %v1484_v5 = vsel %vm1460_vm11, %v1449_v62, %v956_v25  ;;  %v1007_v18 = vpop.permute.xlu0 %1006 }
 0x145   : > { %2144 = vperm.xlu1 %5239, %v2060_v39   ;;  %v1519_v3 = vsel %vm8776_vm12, %v1484_v5, %v1007_v18 }
 0x146   : > { %2159 = vperm.xlu0 %5238, %v2063_v54  }
 0x147   : > { %v1080_v59 = vpop.permute.xlu1 %1079 }
 0x148   : > { %v1554_v45 = vsel %vm8770_vm13, %v1519_v3, %v1080_v59  ;;  %v1275_v1 = vpop.permute.xlu0 %1274 }
 0x149   : > { %2154 = vperm.xlu1 %5239, %v2062_v26   ;;  %v1589_v35 = vsel %vm8769_vm14, %v1554_v45, %v1275_v1 }
 0x14a   : > { %2169 = vperm.xlu0 %5238, %v2065_v53  }
 0x14b   : > { %v1344_v41 = vpop.permute.xlu1 %1343 }
 0x14c   : > { %v1624_v15 = vsel %vm8768_vm15, %v1589_v35, %v1344_v41  ;;  %v696_v9 = vpop.permute.xlu0 %695 }
 0x14d   : > { %v1381_v8 = vsel %vm1355_vm8, %v5945_v4, %v696_v9  ;;  %2164 = vperm.xlu1 %5239, %v2064_v50   ;;  %5073 = vmatmul.mubr.msk.bf16.gmra.mxu0 %vm8767_vm6, %v1624_v15 }
 0x14e   : > { %2179 = vperm.xlu0 %5238, %v2067_v51   ;;  %5076 = vmatprep.mubr.msk.bf16.mxu0 %vm8765_vm7, %v8771_v7 }
 0x14f   : > { %v764_v33 = vpop.permute.xlu1 %763 }
 0x150   : > { %v1416_v29 = vsel %vm1390_vm9, %v1381_v8, %v764_v33  ;;  %v842_v17 = vpop.permute.xlu0 %841 }
 0x151   : > { %2174 = vperm.xlu1 %5239, %v2066_v47   ;;  %v1451_v4 = vsel %vm1425_vm10, %v1416_v29, %v842_v17 }
 0x152   : > { %2189 = vperm.xlu0 %5238, %v2069_v49  }
 0x153   : > { %v958_v12 = vpop.permute.xlu1 %957 }
 0x154   : > { %v1486_v44 = vsel %vm1460_vm11, %v1451_v4, %v958_v12  ;;  %v1009_v21 = vpop.permute.xlu0 %1008 }
 0x155   : > { %2184 = vperm.xlu1 %5239, %v2068_v34   ;;  %v1521_v63 = vsel %vm8776_vm12, %v1486_v44, %v1009_v21 }
 0x156   : > { %2199 = vperm.xlu0 %5238, %v2071_v24  }
 0x157   : > { %v1082_v61 = vpop.permute.xlu1 %1081 }
 0x158   : > { %v1556_v55 = vsel %vm8770_vm13, %v1521_v63, %v1082_v61  ;;  %v1277_v16 = vpop.permute.xlu0 %1276 }
 0x159   : > { %2194 = vperm.xlu1 %5239, %v2070_v40   ;;  %v1591_v0 = vsel %vm8769_vm14, %v1556_v55, %v1277_v16 }
 0x15a   : > { %2209 = vperm.xlu0 %5238, %v2073_v19  }
 0x15b   : > { %v1346_v11 = vpop.permute.xlu1 %1345 }
 0x15c   : > { %v1626_v48 = vsel %vm8768_vm15, %v1591_v0, %v1346_v11  ;;  %v698_v28 = vpop.permute.xlu0 %697 }
 0x15d   : > { %v1383_v46 = vsel %vm1355_vm8, %v6021_v57, %v698_v28  ;;  %2204 = vperm.xlu1 %5239, %v2072_v22   ;;  %5077 = vmatmul.mubr.msk.bf16.gmra.mxu0 %vm8767_vm6, %v1626_v48 }
 0x15e   : > { %2219 = vperm.xlu0 %5238, %v2075_v14   ;;  %5080 = vmatprep.mubr.msk.bf16.mxu0 %vm8765_vm7, %v8771_v7 }
 0x15f   : > { %v766_v13 = vpop.permute.xlu1 %765 }
 0x160   : > { %v1418_v20 = vsel %vm1390_vm9, %v1383_v46, %v766_v13  ;;  %v844_v60 = vpop.permute.xlu0 %843 }
 0x161   : > { %2214 = vperm.xlu1 %5239, %v2074_v37   ;;  %v1453_v57 = vsel %vm1425_vm10, %v1418_v20, %v844_v60 }
 0x162   : > { %2229 = vperm.xlu0 %5238, %v2077_v23  }
 0x163   : > { %v960_v43 = vpop.permute.xlu1 %959 }
 0x164   : > { %v1488_v36 = vsel %vm1460_vm11, %v1453_v57, %v960_v43  ;;  %v1011_v27 = vpop.permute.xlu0 %1010 }
 0x165   : > { %2224 = vperm.xlu1 %5239, %v2076_v30   ;;  %v6514_v58 = vpop.f32.mrf.mxu0  ;;  %v1523_v52 = vsel %vm8776_vm12, %v1488_v36, %v1011_v27 }
 0x166   : > { %2234 = vperm.xlu0 %5238, %v2078_v6  }
 0x167   : > { %v1084_v32 = vpop.permute.xlu1 %1083  ;;  %v5030_v10 = vpop.f32.mrf.mxu0 }
 0x168   : > { %v1558_v39 = vsel %vm8770_vm13, %v1523_v52, %v1084_v32  ;;  %v1279_v62 = vpop.permute.xlu0 %1278 }
 0x169   : > { %2239 = vperm.xlu1 %5239, %v2079_v2   ;;  %v6520_v25 = vpop.f32.mrf.mxu0  ;;  %v1593_v54 = vsel %vm8769_vm14, %v1558_v39, %v1279_v62  ;;  %v6564_v39 = vld [vmem:[%s8760_s6] ss:$0 sm:$0xff] }
 0x16a   : > { %2244 = vperm.xlu0 %5238, %v2080_v31  }
 0x16b   : > { %v1348_v5 = vpop.permute.xlu1 %1347  ;;  %v5031_v18 = vpop.f32.mrf.mxu0 }
 0x16c   : > { %v1628_v26 = vsel %vm8768_vm15, %v1593_v54, %v1348_v5  ;;  %v700_v3 = vpop.permute.xlu0 %699  ;;  %v1868_v5 = vmul.f32 %v6564_v39, %v6514_v58 }
 0x16d   : > { %v1385_v59 = vsel %vm1355_vm8, %v6095_v56, %v700_v3  ;;  %v6526_v53 = vpop.f32.mrf.mxu0  ;;  %5081 = vmatmul.mubr.msk.bf16.gmra.mxu0 %vm8767_vm6, %v1628_v26  ;;  %v6573_v3 = vld [vmem:[%s8760_s6 + $0x1] ss:$0 sm:$0xff] }
 0x16e   : > { %5084 = vmatprep.mubr.msk.bf16.mxu0 %vm8765_vm7, %v8771_v7 }
 0x16f   : > { %v768_v45 = vpop.permute.xlu1 %767  ;;  %v5034_v1 = vpop.f32.mrf.mxu0 }
 0x170   : > { %v1420_v50 = vsel %vm1390_vm9, %v1385_v59, %v768_v45  ;;  %v846_v35 = vpop.permute.xlu0 %845  ;;  %v1869_v59 = vmul.f32 %v6564_v39, %v6520_v25 }
 0x171   : > { %v6532_v41 = vpop.f32.mrf.mxu0  ;;  %v1455_v51 = vsel %vm1425_vm10, %v1420_v50, %v846_v35  ;;  %v1907_v50 = vadd.f32 %v6573_v3, %v1868_v5  ;;  %v6585_v35 = vld [vmem:[%s8760_s6 + $0x2] ss:$0 sm:$0xff] }
 0x172   : > { %v1871_v25 = vmul.f32 %v6564_v39, %v6532_v41 }
 0x173   : > { %v962_v15 = vpop.permute.xlu1 %961  ;;  %v5035_v9 = vpop.f32.mrf.mxu0  ;;  %vm1941_vm2 = vcmp.gt.f32.partialorder %v1907_v50, 0.0 }
 0x174   : > { %v1490_v56 = vsel %vm1460_vm11, %v1455_v51, %v962_v15  ;;  %v1013_v8 = vpop.permute.xlu0 %1012  ;;  %v1908_v51 = vadd.f32 %v6573_v3, %v1869_v59  ;;  %v1870_v15 = vmul.f32 %v6564_v39, %v6526_v53 }
 0x175   : > { %v1525_v47 = vsel %vm8776_vm12, %v1490_v56, %v1013_v8  ;;  %v1980_v8 = vmul.f32 %v6585_v35, %v1907_v50 }
 0x176   : > { %vm1942_vm4 = vcmp.gt.f32.partialorder %v1908_v51, 0.0 }
 0x177   : > { %v1086_v33 = vpop.permute.xlu1 %1085 }
 0x178   : > { %v1560_v49 = vsel %vm8770_vm13, %v1525_v47, %v1086_v33  ;;  %v1281_v29 = vpop.permute.xlu0 %1280 }
 0x179   : > { %v1595_v17 = vsel %vm8769_vm14, %v1560_v49, %v1281_v29  ;;  %v1981_v49 = vmul.f32 %v6585_v35, %v1908_v51  ;;  %v1909_v29 = vadd.f32 %v6573_v3, %v1870_v15 }
 0x17b   : > { %v1350_v34 = vpop.permute.xlu1 %1349 }
 0x17c   : > { %v1630_v4 = vsel %vm8768_vm15, %v1595_v17, %v1350_v34  ;;  %v702_v12 = vpop.permute.xlu0 %701  ;;  %v1910_v17 = vadd.f32 %v6573_v3, %v1871_v25 }
 0x17d   : > { %v1387_v24 = vsel %vm1355_vm8, %v6169_v42, %v702_v12  ;;  %v1744_v44 = vpop.f32.mrf.mxu0  ;;  %5085 = vmatmul.mubr.msk.bf16.gmra.mxu0 %vm8767_vm6, %v1630_v4  ;;  %v2014_v12 = vsel %vm1941_vm2, %v1907_v50, %v1980_v8 }
 0x17e   : > { %5088 = vmatprep.mubr.msk.bf16.mxu0 %vm8765_vm7, %v8771_v7  ;;  %v1872_v56 = vmul.f32 %v6564_v39, %v1744_v44  ;;  %v1983_v44 = vmul.f32 %v6585_v35, %v1910_v17 }
 0x17f   : > { %v770_v21 = vpop.permute.xlu1 %769  ;;  %v5038_v40 = vpop.f32.mrf.mxu0 }
 0x180   : > { %v1422_v63 = vsel %vm1390_vm9, %v1387_v24, %v770_v21  ;;  %v848_v61 = vpop.permute.xlu0 %847  ;;  %v1911_v41 = vadd.f32 %v6573_v3, %v1872_v56  ;;  %v1982_v24 = vmul.f32 %v6585_v35, %v1909_v29 }
 0x181   : > { %v1747_v19 = vpop.f32.mrf.mxu0  ;;  %v1457_v55 = vsel %vm1425_vm10, %v1422_v63, %v848_v61  ;;  %v2015_v63 = vsel %vm1942_vm4, %v1908_v51, %v1981_v49 }
 0x182   : > { %v1873_v47 = vmul.f32 %v6564_v39, %v1747_v19  ;;  %vm1945_vm2 = vcmp.gt.f32.partialorder %v1911_v41, 0.0 }
 0x183   : > { %v964_v16 = vpop.permute.xlu1 %963  ;;  %v5039_v22 = vpop.f32.mrf.mxu0 }
 0x184   : > { %v1492_v0 = vsel %vm1460_vm11, %v1457_v55, %v964_v16  ;;  %v1015_v11 = vpop.permute.xlu0 %1014  ;;  %v1912_v34 = vadd.f32 %v6573_v3, %v1873_v47  ;;  %v1984_v16 = vmul.f32 %v6585_v35, %v1911_v41 }
 0x185   : > { %v1527_v42 = vsel %vm8776_vm12, %v1492_v0, %v1015_v11 }
 0x186   : > { %v1985_v22 = vmul.f32 %v6585_v35, %v1912_v34  ;;  %vm1946_vm4 = vcmp.gt.f32.partialorder %v1912_v34, 0.0 }
 0x187   : > { %v1088_v14 = vpop.permute.xlu1 %1087 }
 0x188   : > { %v1562_v48 = vsel %vm8770_vm13, %v1527_v42, %v1088_v14  ;;  %v1283_v28 = vpop.permute.xlu0 %1282 }
 0x189   : > { %v1597_v46 = vsel %vm8769_vm14, %v1562_v48, %v1283_v28 }
 0x18b   : > { %v1352_v37 = vpop.permute.xlu1 %1351 }
 0x18c   : > { %v1632_v13 = vsel %vm8768_vm15, %v1597_v46, %v1352_v37  ;;  %v704_v23 = vpop.permute.xlu0 %703 }
 0x18d   : > { %v1389_v20 = vsel %vm1355_vm8, %v6243_v38, %v704_v23  ;;  %v1752_v60 = vpop.f32.mrf.mxu0  ;;  %5089 = vmatmul.mubr.msk.bf16.gmra.mxu0 %vm8767_vm6, %v1632_v13 }
 0x18e   : > { %5092 = vmatprep.mubr.msk.bf16.mxu0 %vm8765_vm7, %v8771_v7  ;;  %v1874_v4 = vmul.f32 %v6564_v39, %v1752_v60  ;;  %vm1944_vm7 = vcmp.gt.f32.partialorder %v1910_v17, 0.0  ;;  %v2018_v60 = vsel %vm1945_vm2, %v1911_v41, %v1984_v16 }
 0x18f   : > { %v772_v30 = vpop.permute.xlu1 %771  ;;  %v5042_v57 = vpop.f32.mrf.mxu0  ;;  %v2017_v14 = vsel %vm1944_vm7, %v1910_v17, %v1983_v44  ;;  %vm8775_vm7 = vcmask 1043456  }
 0x190   : > { %v1424_v43 = vsel %vm1390_vm9, %v1389_v20, %v772_v30  ;;  %v850_v6 = vpop.permute.xlu0 %849  ;;  %v1913_v0 = vadd.f32 %v6573_v3, %v1874_v4 }
 0x191   : > { %v1755_v36 = vpop.f32.mrf.mxu0  ;;  %v1459_v27 = vsel %vm1425_vm10, %v1424_v43, %v850_v6  ;;  %v2019_v43 = vsel %vm1946_vm4, %v1912_v34, %v1985_v22  ;;  %vm8781_vm4 = vcmask 1041408  }
 0x192   : > { %v1875_v21 = vmul.f32 %v6564_v39, %v1755_v36  ;;  %v1986_v30 = vmul.f32 %v6585_v35, %v1913_v0 }
 0x193   : > { %v966_v2 = vpop.permute.xlu1 %965  ;;  %v5043_v52 = vpop.f32.mrf.mxu0 }
 0x194   : > { %v1494_v32 = vsel %vm1460_vm11, %v1459_v27, %v966_v2  ;;  %v1017_v10 = vpop.permute.xlu0 %1016  ;;  %v1914_v42 = vadd.f32 %v6573_v3, %v1875_v21 }
 0x195   : > { %v1529_v38 = vsel %vm8776_vm12, %v1494_v32, %v1017_v10 }
 0x196   : > { %v1987_v36 = vmul.f32 %v6585_v35, %v1914_v42 }
 0x197   : > { %v1090_v31 = vpop.permute.xlu1 %1089 }
 0x198   : > { %v1564_v62 = vsel %vm8770_vm13, %v1529_v38, %v1090_v31  ;;  %v1285_v54 = vpop.permute.xlu0 %1284 }
 0x199   : > { %v1599_v18 = vsel %vm8769_vm14, %v1564_v62, %v1285_v54 }
 0x19b   : > { %v1354_v26 = vpop.permute.xlu1 %1353 }
 0x19c   : > { %v1634_v45 = vsel %vm8768_vm15, %v1599_v18, %v1354_v26  ;;  %vm1947_vm15 = vcmp.gt.f32.partialorder %v1913_v0, 0.0 }
 0x19d   : > { %v6578_v1 = vpop.f32.mrf.mxu0  ;;  %5093 = vmatmul.mubr.msk.bf16.gmra.mxu0 %vm8767_vm6, %v1634_v45  ;;  %vm1943_vm6 = vcmp.gt.f32.partialorder %v1909_v29, 0.0  ;;  %v2020_v51 = vsel %vm1947_vm15, %v1913_v0, %v1986_v30 }
 0x19e   : > { %v2016_v28 = vsel %vm1943_vm6, %v1909_v29, %v1982_v24  ;;  %vm1948_vm6 = vcmp.gt.f32.partialorder %v1914_v42, 0.0  ;;  %v1876_v25 = vmul.f32 %v6564_v39, %v6578_v1 }
 0x19f   : > { %v5046_v58 = vpop.f32.mrf.mxu0  ;;  %v2021_v50 = vsel %vm1948_vm6, %v1914_v42, %v1987_v36  ;;  %vm8779_vm6 = vcmask 1040384  }
 0x1a0   : > { %v1915_v34 = vadd.f32 %v6573_v3, %v1876_v25 }
 0x1a1   : > { %v6592_v9 = vpop.f32.mrf.mxu0 }
 0x1a2   : > { %v1988_v42 = vmul.f32 %v6585_v35, %v1915_v34  ;;  %vm1949_vm15 = vcmp.gt.f32.partialorder %v1915_v34, 0.0 }
 0x1a3   : > { %v5047_v33 = vpop.f32.mrf.mxu0 }
 0x1a4   : > { %v1877_v33 = vmul.f32 %v6564_v39, %v6592_v9 }
 0x1a5   : > { %v2085_v53 = vpop.permute.xlu0 %2084 }
 0x1a6   : > { %v2252_v61 = vmul.f32 %v2085_v53, %v2014_v12  ;;  %v1916_v44 = vadd.f32 %v6573_v3, %v1877_v33 }
 0x1a8   : > { %v2090_v40 = vpop.permute.xlu1 %2089  ;;  %vm1950_vm2 = vcmp.gt.f32.partialorder %v1916_v44, 0.0 }
 0x1a9   : > { %v2253_v19 = vmul.f32 %v2090_v40, %v2015_v63  ;;  %v2100_v55 = vpop.permute.xlu0 %2099 }
 0x1aa   : > { %v2255_v46 = vmul.f32 %v2100_v55, %v2017_v14 }
 0x1ab   : > { %v6609_v11 = vpack.c.bf16 %v2253_v19, %v2252_v61 }
 0x1ac   : > { %v2095_v48 = vpop.permute.xlu1 %2094 }
 0x1ad   : > { %v2254_v37 = vmul.f32 %v2095_v48, %v2016_v28  ;;  %v6612_v13 = vpop.f32.mrf.mxu0  ;;  %v2110_v23 = vpop.permute.xlu0 %2109  ;;  %v2306_v20 = vshll.u32 %v6609_v11, 16  ;;  %v2456_v2 = vrot.slane %v6609_v11, 1  ;;  %v2304_v5 = vshrl.u32 %v6609_v11, 16 }
 0x1ae   : > { %v2257_v32 = vmul.f32 %v2110_v23, %v2019_v43  ;;  %v1989_v48 = vmul.f32 %v6585_v35, %v1916_v44 }
 0x1af   : > { %v6616_v57 = vpack.c.bf16 %v2255_v46, %v2254_v37  ;;  %v5050_v6 = vpop.f32.mrf.mxu0  ;;  %v2308_v52 = vrot.slane %v2306_v20, 1 }
 0x1b0   : > { %v2105_v27 = vpop.permute.xlu1 %2104 }
 0x1b1   : > { %v2256_v10 = vmul.f32 %v2105_v27, %v2018_v60  ;;  %v6620_v38 = vpop.f32.mrf.mxu0  ;;  %v2457_v31 = vrot.slane %v6616_v57, 1  ;;  %v2311_v62 = vshll.u32 %v6616_v57, 16  ;;  %v2120_v54 = vpop.permute.xlu0 %2119  ;;  %v2309_v15 = vor.u32 %v2308_v52, %v2304_v5 }
 0x1b2   : > { %v2259_v56 = vmul.f32 %v2120_v54, %v2021_v50  ;;  %v2315_v29 = vshrl.u32 %v6616_v57, 16  ;;  %v2513_v4 = vrot.slane %v6616_v57, 3  ;;  %v2668_v16 = vrot.slane %v6616_v57, 4 }
 0x1b3   : > { %v6625_v18 = vpack.c.bf16 %v2257_v32, %v2256_v10  ;;  %v5051_v26 = vpop.f32.mrf.mxu0  ;;  %v2458_v59 = vsel %vm705_vm1, %v2456_v2, %v2457_v31  ;;  %v2313_v45 = vrot.slane %v2311_v62, 1  ;;  %v2571_v0 = vrot.slane %v2311_v62, 4 }
 0x1b4   : > { %v2115_v58 = vpop.permute.xlu1 %2114  ;;  %2483 = vrot.lane.b32.xlu1 %v2458_v59, %s5363_s25  ;;  %v2570_v22 = vrot.slane %v2315_v29, 3  ;;  %v2022_v27 = vsel %vm1949_vm15, %v1915_v34, %v1988_v42  ;;  %v2023_v52 = vsel %vm1950_vm2, %v1916_v44, %v1989_v48  ;;  %v5281_v44 = vld [vmem:[%s8758_s4 + $0x10] ss:$0 sps:$4 sm:$0x33]   ;;  %vm8782_vm2 = vmmov %vm8781_vm4 }
 0x1b5   : > { %v2258_v8 = vmul.f32 %v2115_v58, %v2020_v51  ;;  %v2459_v47 = vrot.slane %v6625_v18, 1  ;;  %v2314_v49 = vsel %vm535_vm3, %v2309_v15, %v2313_v45  ;;  %v2514_v41 = vrot.slane %v6625_v18, 3  ;;  %v2130_v36 = vpop.permute.xlu0 %2129  ;;  %5180 = vmatprep.subr.msk.bf16.mxu1 %vm8782_vm2, %v5281_v44  ;;  %vm8783_vm14 = vmmov %vm8782_vm2 }
 0x1b6   : > { %v6644_v1 = vshll.u32 %v6625_v18, 16  ;;  %v6649_v9 = vshrl.u32 %v6625_v18, 16  ;;  %v2317_v12 = vor.u32 %v2315_v29, %v2313_v45  ;;  %v2669_v21 = vrot.slane %v6625_v18, 4 }
 0x1b7   : > { %v6637_v17 = vpack.c.bf16 %v2259_v56, %v2258_v8  ;;  %v2460_v53 = vsel %vm705_vm1, %v2457_v31, %v2459_v47  ;;  %v2515_v61 = vsel %vm8780_vm0, %v2513_v4, %v2514_v41  ;;  %v2572_v6 = vor.u32 %v2571_v0, %v2570_v22 }
 0x1b8   : > { %2414 = vrot.lane.b32.xlu1 %v2314_v49, %s5365_s27  ;;  %2485 = vrot.lane.b32.xlu0 %v2460_v53, %s5363_s25  ;;  %v2321_v24 = vrot.slane %v6644_v1, 1  ;;  %v2573_v40 = vrot.slane %v6649_v9, 3  ;;  %v2574_v63 = vrot.slane %v6644_v1, 4  ;;  %v2670_v28 = vsel %vm8775_vm7, %v2668_v16, %v2669_v21  ;;  %v2125_v37 = vpop.permute.xlu1 %2124 }
 0x1b9   : > { %v2516_v55 = vrot.slane %v6637_v17, 3  ;;  %v2671_v60 = vrot.slane %v6637_v17, 4  ;;  %v6674_v30 = vshll.u32 %v6637_v17, 16  ;;  %v6677_v43 = vshrl.u32 %v6637_v17, 16 }
 0x1ba   : > { %v2322_v19 = vsel %vm535_vm3, %v2317_v12, %v2321_v24  ;;  %v2575_v46 = vor.u32 %v2574_v63, %v2573_v40  ;;  %v2260_v32 = vmul.f32 %v2125_v37, %v2022_v27  ;;  %v2728_v31 = vrot.slane %v6637_v17, 6 }
 0x1bb   : > { %v2517_v20 = vsel %vm8780_vm0, %v2514_v41, %v2516_v55  ;;  %v2672_v54 = vsel %vm8775_vm7, %v2669_v21, %v2671_v60  ;;  %v2329_v5 = vrot.slane %v6674_v30, 1  ;;  %v2577_v26 = vrot.slane %v6677_v43, 3 }
 0x1bc   : > { %2542 = vrot.lane.b32.xlu1 %v2515_v61, %s5362_s24  ;;  %2416 = vrot.lane.b32.xlu0 %v2322_v19, %s5365_s27  ;;  %v2576_v10 = vsel %vm8778_vm5, %v2572_v6, %v2575_v46  ;;  %v2578_v59 = vrot.slane %v6674_v30, 4  ;;  %v1878_v45 = vmul.f32 %v6564_v39, %v6612_v13  ;;  %v2261_v50 = vmul.f32 %v2130_v36, %v2023_v52  ;;  %v2135_v42 = vpop.permute.xlu1 %2134 }
 0x1bd   : > { %v6665_v14 = vpop.f32.mrf.mxu0  ;;  %v1879_v58 = vmul.f32 %v6564_v39, %v6620_v38  ;;  %v2727_v51 = vrot.slane %v6625_v18, 6  ;;  %v2325_v15 = vor.u32 %v6649_v9, %v2321_v24  ;;  %v2879_v8 = vrot.slane %v6637_v17, 7 }
 0x1be   : > { %v6698_v25 = vpack.c.bf16 %v2261_v50, %v2260_v32  ;;  %v6705_v33 = vor.u32 %v2578_v59, %v2577_v26  ;;  %v1917_v49 = vadd.f32 %v6573_v3, %v1878_v45  ;;  %v2878_v29 = vrot.slane %v6625_v18, 7 }
 0x1bf   : > { %v5054_v23 = vpop.f32.mrf.mxu0  ;;  %v2729_v56 = vsel %vm8781_vm4, %v2727_v51, %v2728_v31  ;;  %v2330_v13 = vsel %vm535_vm3, %v2325_v15, %v2329_v5  ;;  %v1918_v38 = vadd.f32 %v6573_v3, %v1879_v58  ;;  %v2461_v53 = vrot.slane %v6637_v17, 1 }
 0x1c0   : > { %2697 = vrot.lane.b32.xlu1 %v2670_v28, %s5361_s23  ;;  %2544 = vrot.lane.b32.xlu0 %v2517_v20, %s5362_s24  ;;  %v2730_v41 = vrot.slane %v6698_v25, 6  ;;  %v2880_v34 = vsel %vm8779_vm6, %v2878_v29, %v2879_v8  ;;  %v2580_v4 = vsel %vm8778_vm5, %v2575_v46, %v6705_v33  ;;  %v2788_v12 = vrot.slane %v6677_v43, 6  ;;  %v2140_v23 = vpop.permute.xlu0 %2139 }
 0x1c1   : > { %v1779_v2 = vpop.f32.mrf.mxu0  ;;  %v2789_v24 = vrot.slane %v6674_v30, 7  ;;  %v1990_v21 = vmul.f32 %v6585_v35, %v1917_v49  ;;  %vm1951_vm15 = vcmp.gt.f32.partialorder %v1917_v49, 0.0  ;;  %v1991_v40 = vmul.f32 %v6585_v35, %v1918_v38 }
 0x1c2   : > { %v1881_v63 = vmul.f32 %v6564_v39, %v1779_v2  ;;  %v2785_v19 = vrot.slane %v6649_v9, 6  ;;  %v2786_v16 = vrot.slane %v6644_v1, 7  ;;  %vm1952_vm4 = vcmp.gt.f32.partialorder %v1918_v38, 0.0 }
 0x1c3   : > { %v5055_v62 = vpop.f32.mrf.mxu0  ;;  %v2462_v22 = vsel %vm705_vm1, %v2459_v47, %v2461_v53  ;;  %v2463_v0 = vrot.slane %v6698_v25, 1  ;;  %v2731_v28 = vsel %vm8783_vm14, %v2728_v31, %v2730_v41  ;;  %v2790_v46 = vor.u32 %v2789_v24, %v2788_v12 }
 0x1c4   : > { %2639 = vrot.lane.b32.xlu1 %v2576_v10, %s5368_s16  ;;  %2699 = vrot.lane.b32.xlu0 %v2672_v54, %s5361_s23  ;;  %v6740_v9 = vshll.u32 %v6698_v25, 16  ;;  %v6743_v1 = vshrl.u32 %v6698_v25, 16  ;;  %v2024_v37 = vsel %vm1951_vm15, %v1917_v49, %v1990_v21  ;;  %vm8777_vm2 = vsmask.f32 1280 }
 0x1c5   : > { %v2025_v47 = vsel %vm1952_vm4, %v1918_v38, %v1991_v40  ;;  %v1880_v20 = vmul.f32 %v6564_v39, %v6665_v14  ;;  %v1920_v6 = vadd.f32 %v6573_v3, %v1881_v63  ;;  %v2787_v27 = vor.u32 %v2786_v16, %v2785_v19  ;;  %v5283_v40 = vld [vmem:[%s8758_s4] sm:$0xff]  }
 0x1c6   : > { %v2262_v2 = vmul.f32 %v2135_v42, %v2024_v37  ;;  %v2464_v52 = vsel %vm705_vm1, %v2461_v53, %v2463_v0  ;;  %v2881_v32 = vrot.slane %v6698_v25, 7  ;;  %v2337_v62 = vrot.slane %v6740_v9, 1 }
 0x1c7   : > { %v2791_v31 = vsel %vm8777_vm2, %v2787_v27, %v2790_v46  ;;  %v2792_v54 = vrot.slane %v6743_v1, 6  ;;  %v2793_v14 = vrot.slane %v6740_v9, 7  ;;  %v2263_v26 = vmul.f32 %v2140_v23, %v2025_v47 }
 0x1c8   : > { %2756 = vrot.lane.b32.xlu1 %v2729_v56, %s5364_s26  ;;  %2418 = vrot.lane.b32.xlu0 %v2330_v13, %s5365_s27  ;;  %v1919_v59 = vadd.f32 %v6573_v3, %v1880_v20  ;;  %v1993_v45 = vmul.f32 %v6585_v35, %v1920_v6  ;;  %v2333_v50 = vor.u32 %v6677_v43, %v2329_v5  ;;  %vm1954_vm14 = vcmp.gt.f32.partialorder %v1920_v6, 0.0 }
 0x1c9   : > { %v6766_v58 = vpack.c.bf16 %v2263_v26, %v2262_v2  ;;  %v2518_v51 = vrot.slane %v6698_v25, 3  ;;  %v2882_v15 = vsel %vm8779_vm6, %v2879_v8, %v2881_v32  ;;  %v6775_v13 = vor.u32 %v2793_v14, %v2792_v54  ;;  %v5282_v8 = vld [vmem:[%s8758_s4 + $0x8] sm:$0xff]  }
 0x1ca   : > { %v2338_v56 = vsel %vm535_vm3, %v2333_v50, %v2337_v62  ;;  %v1992_v30 = vmul.f32 %v6585_v35, %v1919_v59  ;;  %vm1953_vm15 = vcmp.gt.f32.partialorder %v1919_v59, 0.0  ;;  %v2027_v43 = vsel %vm1954_vm14, %v1920_v6, %v1993_v45 }
 0x1cb   : > { %v2673_v5 = vrot.slane %v6698_v25, 4  ;;  %v2519_v49 = vsel %vm8780_vm0, %v2516_v55, %v2518_v51  ;;  %v2520_v38 = vrot.slane %v6766_v58, 3  ;;  %v2581_v29 = vrot.slane %v6743_v1, 3  ;;  %v2150_v55 = vpop.permute.xlu0 %2149 }
 0x1cc   : > { %2907 = vrot.lane.b32.xlu1 %v2880_v34, %s5366_s28  ;;  %2641 = vrot.lane.b32.xlu0 %v2580_v4, %s5368_s16  ;;  %vm8784_vm4 = vcmask 1041408   ;;  %v2795_v34 = vsel %vm8777_vm2, %v2790_v46, %v6775_v13  ;;  %v2582_v4 = vrot.slane %v6740_v9, 4  ;;  %v6794_v12 = vshll.u32 %v6766_v58, 16 }
 0x1cd   : > { %v6727_v61 = vpop.f32.mrf.mxu0  ;;  %v3208_v53 = vsel %vm8784_vm4, %v5281_v44, 0  ;;  %v6797_v24 = vshrl.u32 %v6766_v58, 16  ;;  %v2026_v21 = vsel %vm1953_vm15, %v1919_v59, %v1992_v30  ;;  %v2265_v63 = vmul.f32 %v2150_v55, %v2027_v43  ;;  %vm8785_vm14 = vmmov %vm8784_vm4 }
 0x1ce   : > { %5097 = vmatpush3.bf16.msra.mxu1 %v3208_v53  ;;  %v2674_v19 = vsel %vm8775_vm7, %v2671_v60, %v2673_v5  ;;  %v2675_v16 = vrot.slane %v6766_v58, 4  ;;  %v2586_v37 = vrot.slane %v6794_v12, 4  ;;  %v1882_v6 = vmul.f32 %v6564_v39, %v6727_v61 }
 0x1cf   : > { %v5058_v48 = vpop.f32.mrf.mxu0  ;;  %5098 = vmatprep.subr.bf16.mxu1 %v5282_v8  ;;  %v2585_v46 = vrot.slane %v6797_v24, 3  ;;  %v2732_v27 = vrot.slane %v6766_v58, 6  ;;  %v2883_v61 = vrot.slane %v6766_v58, 7  ;;  %v2796_v26 = vrot.slane %v6797_v24, 6 }
 0x1d0   : > { %2487 = vrot.lane.b32.xlu1 %v2462_v22, %s5363_s25  ;;  %2758 = vrot.lane.b32.xlu0 %v2731_v28, %s5364_s26  ;;  %v2145_v22 = vpop.permute.xlu1 %2144  ;;  %v2521_v48 = vsel %vm8780_vm0, %v2518_v51, %v2520_v38  ;;  %v2583_v28 = vor.u32 %v2582_v4, %v2581_v29  ;;  %v1921_v54 = vadd.f32 %v6573_v3, %v1882_v6  ;;  %v2797_v45 = vrot.slane %v6794_v12, 7 }
 0x1d1   : > { %v1787_v36 = vpop.f32.mrf.mxu0  ;;  %v2264_v47 = vmul.f32 %v2145_v22, %v2026_v21 }
 0x1d2   : > { %5099 = vmatpush3.bf16.msra.mxu1 %v5282_v8  ;;  %v1883_v23 = vmul.f32 %v6564_v39, %v1787_v36  ;;  %v2676_v36 = vsel %vm8775_vm7, %v2673_v5, %v2675_v16  ;;  %v2798_v5 = vor.u32 %v2797_v45, %v2796_v26 }
 0x1d3   : > { %v5059_v10 = vpop.f32.mrf.mxu0  ;;  %5100 = vmatprep.subr.bf16.mxu1 %v5283_v40  ;;  %v6817_v20 = vpack.c.bf16 %v2265_v63, %v2264_v47 }
 0x1d4   : > { %2849 = vrot.lane.b32.xlu1 %v2791_v31, %s5367_s29  ;;  %2489 = vrot.lane.b32.xlu0 %v2464_v52, %s5363_s25  ;;  %v2584_v52 = vsel %vm8778_vm5, %v6705_v33, %v2583_v28  ;;  %v6827_v10 = vor.u32 %v2586_v37, %v2585_v46  ;;  %v1922_v31 = vadd.f32 %v6573_v3, %v1883_v23  ;;  %v2081_v46 = vld [vmem:[%s6429_s21 + $0x108] sm:$0xf]  ;;  %v2345_v37 = vrot.slane %v6794_v12, 1 }
 0x1d5   : > { %v2733_v33 = vsel %vm8785_vm14, %v2730_v41, %v2732_v27  ;;  %v2734_v14 = vrot.slane %v6817_v20, 6  ;;  %v6844_v50 = vshll.u32 %v6817_v20, 16  ;;  %v6847_v51 = vshrl.u32 %v6817_v20, 16 }
 0x1d6   : > { %5101 = vmatpush3.bf16.msra.mxu1 %v5283_v40  ;;  %v2588_v59 = vsel %vm8778_vm5, %v2583_v28, %v6827_v10  ;;  %vm1956_vm15 = vcmp.gt.f32.partialorder %v1922_v31, 0.0  ;;  %v1994_v41 = vmul.f32 %v6585_v35, %v1921_v54  ;;  %v2885_v43 = vrot.slane %v6817_v20, 7 }
 0x1d7   : > { %5130 = vmatprep.subr.bf16.mxu1 %v8771_v7  ;;  %v2735_v30 = vsel %vm8784_vm4, %v2732_v27, %v2734_v14  ;;  %vm1955_vm14 = vcmp.gt.f32.partialorder %v1921_v54, 0.0  ;;  %v2800_v8 = vrot.slane %v6847_v51, 6  ;;  %v2799_v63 = vsel %vm8777_vm2, %v6775_v13, %v2798_v5 }
 0x1d8   : > { %2909 = vrot.lane.b32.xlu1 %v2882_v15, %s5366_s28  ;;  %2420 = vrot.lane.b32.xlu0 %v2338_v56, %s5365_s27  ;;  %v1995_v15 = vmul.f32 %v6585_v35, %v1922_v31  ;;  %v2884_v56 = vsel %vm8779_vm6, %v2881_v32, %v2883_v61  ;;  %v2028_v4 = vsel %vm1955_vm14, %v1921_v54, %v1994_v41  ;;  %v2353_v6 = vrot.slane %v6844_v50, 1 }
 0x1d9   : > { %v2349_v12 = vor.u32 %v6797_v24, %v2345_v37  ;;  %v2467_v54 = vrot.slane %v6817_v20, 1  ;;  %v2589_v41 = vrot.slane %v6847_v51, 3 }
 0x1da   : > { %v2029_v29 = vsel %vm1956_vm15, %v1922_v31, %v1995_v15 }
 0x1dc   : > { %2546 = vrot.lane.b32.xlu1 %v2519_v49, %s5362_s24  ;;  %2851 = vrot.lane.b32.xlu0 %v2795_v34, %s5367_s29  ;;  %v2801_v49 = vrot.slane %v6844_v50, 7  ;;  %v2160_v34 = vpop.permute.xlu0 %2159 }
 0x1dd   : > { %v1792_v44 = vpop.f32.mrf.mxu0  ;;  %v2267_v21 = vmul.f32 %v2160_v34, %v2029_v29 }
 0x1de   : > { %v1884_v55 = vmul.f32 %v6564_v39, %v1792_v44  ;;  %v6873_v22 = vor.u32 %v2801_v49, %v2800_v8 }
 0x1df   : > { %v5062_v42 = vpop.f32.mrf.mxu0 }
 0x1e0   : > { %2701 = vrot.lane.b32.xlu1 %v2674_v19, %s5361_s23  ;;  %2548 = vrot.lane.b32.xlu0 %v2521_v48, %s5362_s24  ;;  %v2886_v19 = vsel %vm8779_vm6, %v2883_v61, %v2885_v43  ;;  %v2155_v42 = vpop.permute.xlu1 %2154  ;;  %v1923_v13 = vadd.f32 %v6573_v3, %v1884_v55 }
 0x1e1   : > { %v1795_v60 = vpop.f32.mrf.mxu0  ;;  %v2266_v28 = vmul.f32 %v2155_v42, %v2028_v4 }
 0x1e2   : > { %v1885_v53 = vmul.f32 %v6564_v39, %v1795_v60  ;;  %v2803_v60 = vsel %vm8777_vm2, %v2798_v5, %v6873_v22  ;;  %v1996_v31 = vmul.f32 %v6585_v35, %v1923_v13  ;;  %vm1957_vm4 = vcmp.gt.f32.partialorder %v1923_v13, 0.0 }
 0x1e3   : > { %v5063_v2 = vpop.f32.mrf.mxu0  ;;  %v6881_v47 = vpack.c.bf16 %v2267_v21, %v2266_v28  ;;  %v2677_v28 = vrot.slane %v6817_v20, 4 }
 0x1e4   : > { %2643 = vrot.lane.b32.xlu1 %v2584_v52, %s5368_s16  ;;  %2703 = vrot.lane.b32.xlu0 %v2676_v36, %s5361_s23  ;;  %v1924_v48 = vadd.f32 %v6573_v3, %v1885_v53  ;;  %v2341_v2 = vor.u32 %v6743_v1, %v2337_v62  ;;  %v2465_v52 = vrot.slane %v6766_v58, 1  ;;  %v2170_v36 = vpop.permute.xlu0 %2169  ;;  %v2165_v62 = vpop.permute.xlu1 %2164  ;;  %v2030_v45 = vsel %vm1957_vm4, %v1923_v13, %v1996_v31 }
 0x1e5   : > { %v6900_v9 = vshll.u32 %v6881_v47, 16  ;;  %v6903_v1 = vshrl.u32 %v6881_v47, 16  ;;  %v2524_v5 = vrot.slane %v6881_v47, 3 }
 0x1e6   : > { %v1997_v27 = vmul.f32 %v6585_v35, %v1924_v48  ;;  %vm1958_vm15 = vcmp.gt.f32.partialorder %v1924_v48, 0.0  ;;  %v2346_v61 = vsel %vm535_vm3, %v2341_v2, %v2345_v37  ;;  %v2466_v26 = vsel %vm705_vm1, %v2463_v0, %v2465_v52 }
 0x1e7   : > { %v2468_v15 = vsel %vm705_vm1, %v2465_v52, %v2467_v54  ;;  %v2593_v8 = vrot.slane %v6903_v1, 3  ;;  %v2594_v49 = vrot.slane %v6900_v9, 4  ;;  %v2268_v0 = vmul.f32 %v2165_v62, %v2030_v45 }
 0x1e8   : > { %2760 = vrot.lane.b32.xlu1 %v2733_v33, %s5364_s26  ;;  %2645 = vrot.lane.b32.xlu0 %v2588_v59, %s5368_s16  ;;  %v2354_v33 = vsel %vm535_vm3, %v2349_v12, %v2353_v6  ;;  %v2031_v24 = vsel %vm1958_vm15, %v1924_v48, %v1997_v27  ;;  %v2522_v59 = vrot.slane %v6817_v20, 3  ;;  %v2180_v29 = vpop.permute.xlu0 %2179  ;;  %v6921_v34 = vpop.permute.xlu1 %2174  ;;  %v2679_v37 = vrot.slane %v6881_v47, 4 }
 0x1e9   : > { %v2804_v31 = vrot.slane %v6903_v1, 6  ;;  %vm8786_vm15 = vcmask 1041408  }
 0x1ea   : > { %v2523_v4 = vsel %vm8780_vm0, %v2520_v38, %v2522_v59  ;;  %v2680_v52 = vsel %vm8775_vm7, %v2677_v28, %v2679_v37  ;;  %vm8787_vm13 = vmmov %vm8786_vm15 }
 0x1ec   : > { %2911 = vrot.lane.b32.xlu1 %v2884_v56, %s5366_s28  ;;  %2762 = vrot.lane.b32.xlu0 %v2735_v30, %s5364_s26  ;;  %v2590_v56 = vrot.slane %v6844_v50, 4  ;;  %v2269_v30 = vmul.f32 %v2170_v36, %v2031_v24  ;;  %v6937_v38 = vpop.permute.xlu0 %2189  ;;  %v6952_v2 = vpop.permute.xlu1 %2184  ;;  %v2736_v36 = vrot.slane %v6881_v47, 6 }
 0x1ed   : > { %v6865_v32 = vpop.f32.mrf.mxu0 }
 0x1ee   : > { %v6926_v55 = vpack.c.bf16 %v2269_v30, %v2268_v0 }
 0x1ef   : > { %v5066_v40 = vpop.f32.mrf.mxu0 }
 0x1f0   : > { %2853 = vrot.lane.b32.xlu1 %v2799_v63, %s5367_s29  ;;  %2913 = vrot.lane.b32.xlu0 %v2886_v19, %s5366_s28  ;;  %v2525_v40 = vsel %vm8780_vm0, %v2522_v59, %v2524_v5  ;;  %v2591_v63 = vor.u32 %v2590_v56, %v2589_v41  ;;  %v6931_v19 = vor.u32 %v2594_v49, %v2593_v8  ;;  %v6950_v27 = vshrl.u32 %v6926_v55, 16  ;;  %v6975_v59 = vpop.permute.xlu1 %2194 }
 0x1f1   : > { %v1803_v44 = vpop.f32.mrf.mxu0 }
 0x1f2   : > { %v1887_v42 = vmul.f32 %v6564_v39, %v1803_v44  ;;  %v2596_v44 = vsel %vm8778_vm5, %v2591_v63, %v6931_v19  ;;  %v2808_v62 = vrot.slane %v6950_v27, 6 }
 0x1f3   : > { %v5067_v23 = vpop.f32.mrf.mxu0 }
 0x1f4   : > { %2249 = vperm.xlu1 %5239, %v2081_v46   ;;  %2855 = vrot.lane.b32.xlu0 %v2803_v60, %s5367_s29  ;;  %v1886_v46 = vmul.f32 %v6564_v39, %v6865_v32  ;;  %v2592_v23 = vsel %vm8778_vm5, %v6827_v10, %v2591_v63  ;;  %v6947_v60 = vshll.u32 %v6926_v55, 16  ;;  %v1926_v12 = vadd.f32 %v6573_v3, %v1887_v42 }
 0x1f5   : > { %v2678_v10 = vsel %vm8775_vm7, %v2675_v16, %v2677_v28 }
 0x1f6   : > { %v1925_v32 = vadd.f32 %v6573_v3, %v1886_v46  ;;  %v2809_v24 = vrot.slane %v6947_v60, 7  ;;  %v1999_v16 = vmul.f32 %v6585_v35, %v1926_v12  ;;  %vm1960_vm14 = vcmp.gt.f32.partialorder %v1926_v12, 0.0 }
 0x1f7   : > { %v2889_v46 = vrot.slane %v6926_v55, 7 }
 0x1f8   : > { %2422 = vrot.lane.b32.xlu1 %v2346_v61, %s5365_s27  ;;  %2424 = vrot.lane.b32.xlu0 %v2354_v33, %s5365_s27  ;;  %v2738_v61 = vrot.slane %v6926_v55, 6  ;;  %v2805_v33 = vrot.slane %v6900_v9, 7  ;;  %v1998_v45 = vmul.f32 %v6585_v35, %v1925_v32  ;;  %vm1959_vm4 = vcmp.gt.f32.partialorder %v1925_v32, 0.0 }
 0x1f9   : > { %v6984_v30 = vor.u32 %v2809_v24, %v2808_v62  ;;  %v2033_v8 = vsel %vm1960_vm14, %v1926_v12, %v1999_v16 }
 0x1fa   : > { %v2739_v41 = vsel %vm8787_vm13, %v2736_v36, %v2738_v61  ;;  %v2806_v56 = vor.u32 %v2805_v33, %v2804_v31  ;;  %v2271_v63 = vmul.f32 %v2180_v29, %v2033_v8  ;;  %v2469_v33 = vrot.slane %v6881_v47, 1 }
 0x1fc   : > { %2491 = vrot.lane.b32.xlu1 %v2466_v26, %s5363_s25  ;;  %2493 = vrot.lane.b32.xlu0 %v2468_v15, %s5363_s25  ;;  %v6970_v26 = vpop.permute.xlu0 %2199  ;;  %v2737_v15 = vsel %vm8786_vm15, %v2734_v14, %v2736_v36  ;;  %v2032_v14 = vsel %vm1959_vm4, %v1925_v32, %v1998_v45  ;;  %v2807_v28 = vsel %vm8777_vm2, %v6873_v22, %v2806_v56  ;;  %v2369_v36 = vrot.slane %v6947_v60, 1 }
 0x1fd   : > { %v1808_v53 = vpop.f32.mrf.mxu0  ;;  %v2471_v45 = vrot.slane %v6926_v55, 1  ;;  %vm8788_vm4 = vcmask 1041408  }
 0x1ff   : > { %v5070_v21 = vpop.f32.mrf.mxu0 }
 0x200   : > { %2550 = vrot.lane.b32.xlu1 %v2523_v4, %s5362_s24  ;;  %2552 = vrot.lane.b32.xlu0 %v2525_v40, %s5362_s24  ;;  %v6991_v4 = vpop.permute.xlu0 %2209  ;;  %v1888_v21 = vmul.f32 %v6564_v39, %v1808_v53  ;;  %v2887_v40 = vrot.slane %v6881_v47, 7  ;;  %v2270_v53 = vmul.f32 %v6921_v34, %v2032_v14  ;;  %v2597_v14 = vrot.slane %v6950_v27, 3 }
 0x201   : > { %v1811_v48 = vpop.f32.mrf.mxu0 }
 0x202   : > { %v1889_v49 = vmul.f32 %v6564_v39, %v1811_v48  ;;  %v2811_v48 = vsel %vm8777_vm2, %v2806_v56, %v6984_v30  ;;  %v1927_v22 = vadd.f32 %v6573_v3, %v1888_v21  ;;  %v7008_v12 = vpack.c.bf16 %v2271_v63, %v2270_v53 }
 0x203   : > { %v5071_v13 = vpop.f32.mrf.mxu0  ;;  %v2888_v32 = vsel %vm8779_vm6, %v2885_v43, %v2887_v40  ;;  %v2598_v21 = vrot.slane %v6947_v60, 4 }
 0x204   : > { %2647 = vrot.lane.b32.xlu1 %v2592_v23, %s5368_s16  ;;  %2649 = vrot.lane.b32.xlu0 %v2596_v44, %s5368_s16  ;;  %v7000_v13 = vpop.permute.xlu1 %2204  ;;  %v1928_v23 = vadd.f32 %v6573_v3, %v1889_v49  ;;  %v2361_v44 = vrot.slane %v6900_v9, 1  ;;  %v7017_v31 = vpop.permute.xlu0 %2219  ;;  %v2357_v9 = vor.u32 %v6847_v51, %v2353_v6  ;;  %v2000_v24 = vmul.f32 %v6585_v35, %v1927_v22 }
 0x205   : > { %vm1961_vm14 = vcmp.gt.f32.partialorder %v1927_v22, 0.0  ;;  %v7036_v51 = vshll.u32 %v7008_v12, 16  ;;  %v7039_v6 = vshrl.u32 %v7008_v12, 16  ;;  %v2472_v49 = vsel %vm705_vm1, %v2469_v33, %v2471_v45 }
 0x206   : > { %v2001_v34 = vmul.f32 %v6585_v35, %v1928_v23  ;;  %vm1962_vm13 = vcmp.gt.f32.partialorder %v1928_v23, 0.0  ;;  %v2365_v43 = vor.u32 %v6903_v1, %v2361_v44  ;;  %v2362_v16 = vsel %vm535_vm3, %v2357_v9, %v2361_v44 }
 0x207   : > { %v2034_v8 = vsel %vm1961_vm14, %v1927_v22, %v2000_v24  ;;  %v2528_v63 = vrot.slane %v7008_v12, 3  ;;  %vm8789_vm14 = vmmov %vm8788_vm4 }
 0x208   : > { %2705 = vrot.lane.b32.xlu1 %v2678_v10, %s5361_s23  ;;  %2707 = vrot.lane.b32.xlu0 %v2680_v52, %s5361_s23  ;;  %v2890_v52 = vsel %vm8779_vm6, %v2887_v40, %v2889_v46  ;;  %v7027_v62 = vpop.permute.xlu1 %2214  ;;  %v2370_v50 = vsel %vm535_vm3, %v2365_v43, %v2369_v36  ;;  %v2035_v1 = vsel %vm1962_vm13, %v1928_v23, %v2001_v34  ;;  %v7047_v56 = vpop.permute.xlu0 %2229 }
 0x209   : > { %v2273_v40 = vmul.f32 %v6937_v38, %v2035_v1 }
 0x20c   : > { %2764 = vrot.lane.b32.xlu1 %v2737_v15, %s5364_s26  ;;  %2766 = vrot.lane.b32.xlu0 %v2739_v41, %s5364_s26  ;;  %v2470_v15 = vsel %vm705_vm1, %v2467_v54, %v2469_v33  ;;  %v2526_v41 = vrot.slane %v6926_v55, 3  ;;  %v2602_v54 = vrot.slane %v7036_v51, 4  ;;  %v2683_v33 = vrot.slane %v7008_v12, 4 }
 0x20d   : > { %v6989_v0 = vpop.f32.mrf.mxu0 }
 0x20e   : > { %v2527_v53 = vsel %vm8780_vm0, %v2524_v5, %v2526_v41  ;;  %v2529_v22 = vsel %vm8780_vm0, %v2526_v41, %v2528_v63  ;;  %v2681_v5 = vrot.slane %v6926_v55, 4  ;;  %v1890_v43 = vmul.f32 %v6564_v39, %v6989_v0 }
 0x20f   : > { %v5074_v42 = vpop.f32.mrf.mxu0 }
 0x210   : > { %2857 = vrot.lane.b32.xlu1 %v2807_v28, %s5367_s29  ;;  %2859 = vrot.lane.b32.xlu0 %v2811_v48, %s5367_s29  ;;  %v2601_v42 = vrot.slane %v7039_v6, 3  ;;  %v7058_v28 = vpop.permute.xlu1 %2224  ;;  %v2272_v48 = vmul.f32 %v6952_v2, %v2034_v8  ;;  %v2682_v0 = vsel %vm8775_vm7, %v2679_v37, %v2681_v5  ;;  %v1929_v41 = vadd.f32 %v6573_v3, %v1890_v43 }
 0x211   : > { %v1819_v29 = vpop.f32.mrf.mxu0 }
 0x212   : > { %v7066_v38 = vpack.c.bf16 %v2273_v40, %v2272_v48  ;;  %v1891_v34 = vmul.f32 %v6564_v39, %v1819_v29  ;;  %vm1963_vm13 = vcmp.gt.f32.partialorder %v1929_v41, 0.0 }
 0x213   : > { %v5075_v10 = vpop.f32.mrf.mxu0 }
 0x214   : > { %2915 = vrot.lane.b32.xlu1 %v2888_v32, %s5366_s28  ;;  %2917 = vrot.lane.b32.xlu0 %v2890_v52, %s5366_s28  ;;  %v2599_v10 = vor.u32 %v2598_v21, %v2597_v14  ;;  %v7071_v32 = vor.u32 %v2602_v54, %v2601_v42  ;;  %v7073_v52 = vpop.permute.xlu0 %2234  ;;  %v7079_v9 = vpop.permute.xlu1 %2239  ;;  %v7092_v1 = vshrl.u32 %v7066_v38, 16  ;;  %v2740_v14 = vrot.slane %v7008_v12, 6 }
 0x215   : > { %v2812_v21 = vrot.slane %v7039_v6, 6  ;;  %v2742_v40 = vrot.slane %v7066_v38, 6  ;;  %v2813_v42 = vrot.slane %v7036_v51, 7 }
 0x216   : > { %v2604_v29 = vsel %vm8778_vm5, %v2599_v10, %v7071_v32  ;;  %v2816_v37 = vrot.slane %v7092_v1, 6 }
 0x218   : > { %2426 = vrot.lane.b32.xlu1 %v2362_v16, %s5365_s27  ;;  %2428 = vrot.lane.b32.xlu0 %v2370_v50, %s5365_s27  ;;  %v2600_v16 = vsel %vm8778_vm5, %v6931_v19, %v2599_v10  ;;  %v7089_v50 = vshll.u32 %v7066_v38, 16  ;;  %v7100_v19 = vpop.permute.xlu0 %2244  ;;  %v2741_v10 = vsel %vm8788_vm4, %v2738_v61, %v2740_v14 }
 0x21a   : > { %v2817_v54 = vrot.slane %v7089_v50, 7 }
 0x21c   : > { %2495 = vrot.lane.b32.xlu1 %v2470_v15, %s5363_s25  ;;  %2497 = vrot.lane.b32.xlu0 %v2472_v49, %s5363_s25  ;;  %v1930_v15 = vadd.f32 %v6573_v3, %v1891_v34  ;;  %v2684_v49 = vsel %vm8775_vm7, %v2681_v5, %v2683_v33  ;;  %v2743_v34 = vsel %vm8789_vm14, %v2740_v14, %v2742_v40  ;;  %v2891_v14 = vrot.slane %v7008_v12, 7 }
 0x21d   : > { %v1824_v23 = vpop.f32.mrf.mxu0  ;;  %v2814_v5 = vor.u32 %v2813_v42, %v2812_v21  ;;  %v7128_v43 = vor.u32 %v2817_v54, %v2816_v37  ;;  %v2893_v37 = vrot.slane %v7066_v38, 7  ;;  %vm8791_vm14 = vcmask 228352  }
 0x21e   : > { %v2003_v48 = vmul.f32 %v6585_v35, %v1930_v15  ;;  %vm1964_vm15 = vcmp.gt.f32.partialorder %v1930_v15, 0.0  ;;  %v1892_v61 = vmul.f32 %v6564_v39, %v1824_v23 }
 0x21f   : > { %v5078_v44 = vpop.f32.mrf.mxu0  ;;  %v2819_v42 = vsel %vm8777_vm2, %v2814_v5, %v7128_v43 }
 0x220   : > { %2554 = vrot.lane.b32.xlu1 %v2527_v53, %s5362_s24  ;;  %2556 = vrot.lane.b32.xlu0 %v2529_v22, %s5362_s24  ;;  %v2002_v53 = vmul.f32 %v6585_v35, %v1929_v41 }
 0x221   : > { %v1827_v2 = vpop.f32.mrf.mxu0 }
 0x223   : > { %v5079_v24 = vpop.f32.mrf.mxu0 }
 0x224   : > { %2651 = vrot.lane.b32.xlu1 %v2600_v16, %s5368_s16  ;;  %2653 = vrot.lane.b32.xlu0 %v2604_v29, %s5368_s16  ;;  %v2037_v24 = vsel %vm1964_vm15, %v1930_v15, %v2003_v48  ;;  %v1893_v16 = vmul.f32 %v6564_v39, %v1827_v2  ;;  %v2036_v29 = vsel %vm1963_vm13, %v1929_v41, %v2002_v53  ;;  %vm8790_vm13 = vcmask 195584  }
 0x225   : > { %v2275_v21 = vmul.f32 %v6970_v26, %v2037_v24  ;;  %v2815_v2 = vsel %vm8777_vm2, %v6984_v30, %v2814_v5  ;;  %v2274_v39 = vmul.f32 %v6975_v59, %v2036_v29  ;;  %v2377_v26 = vrot.slane %v7036_v51, 1  ;;  %v7155_v30 = vld [vmem:[%s8760_s6 + $0x1] ss:$0 sm:$0xff]  ;;  %v7174_v5 = vld [vmem:[%s8760_s6 + $0x2] ss:$0 sm:$0xff] }
 0x226   : > { %v7103_v8 = vpop.permute.xlu1 %2483  ;;  %v1932_v41 = vadd.f32 %v6573_v3, %v1893_v16  ;;  %v1931_v54 = vadd.f32 %v7155_v30, %v1892_v61  ;;  %v2892_v59 = vsel %vm8779_vm6, %v2889_v46, %v2891_v14  ;;  %v2894_v51 = vsel %vm8779_vm6, %v2891_v14, %v2893_v37 }
 0x227   : > { %v7162_v3 = vpack.c.bf16 %v2275_v21, %v2274_v39  ;;  %v2373_v46 = vor.u32 %v6950_v27, %v2369_v36  ;;  %v2381_v16 = vor.u32 %v7039_v6, %v2377_v26  ;;  %v2473_v29 = vrot.slane %v7008_v12, 1 }
 0x228   : > { %2709 = vrot.lane.b32.xlu1 %v2682_v0, %s5361_s23  ;;  %2711 = vrot.lane.b32.xlu0 %v2684_v49, %s5361_s23  ;;  %v2005_v24 = vmul.f32 %v7174_v5, %v1932_v41  ;;  %vm1966_vm15 = vcmp.gt.f32.partialorder %v1932_v41, 0.0  ;;  %v2004_v61 = vmul.f32 %v7174_v5, %v1931_v54  ;;  %vm1965_vm4 = vcmp.gt.f32.partialorder %v1931_v54, 0.0 }
 0x229   : > { %v7193_v27 = vshll.u32 %v7162_v3, 16  ;;  %v7196_v36 = vshrl.u32 %v7162_v3, 16  ;;  %v2530_v39 = vrot.slane %v7066_v38, 3 }
 0x22a   : > { %v7118_v44 = vpop.permute.xlu1 %2414  ;;  %v7120_v22 = vpop.permute.xlu0 %2485  ;;  %v2039_v6 = vsel %vm1966_vm15, %v1932_v41, %v2005_v24  ;;  %v2605_v41 = vrot.slane %v7092_v1, 3  ;;  %v2606_v24 = vrot.slane %v7089_v50, 4  ;;  %vm8792_vm15 = vcmask 261120  }
 0x22c   : > { %2768 = vrot.lane.b32.xlu1 %v2741_v10, %s5364_s26  ;;  %2770 = vrot.lane.b32.xlu0 %v2743_v34, %s5364_s26  ;;  %v2385_v34 = vrot.slane %v7089_v50, 1 }
 0x22d   : > { %v7133_v35 = vpop.f32.mrf.mxu0 }
 0x22e   : > { %v7136_v0 = vpop.permute.xlu1 %2542  ;;  %v7138_v49 = vpop.permute.xlu0 %2416  ;;  %v2386_v60 = vsel %vm535_vm3, %v2381_v16, %v2385_v34  ;;  %v2532_v16 = vrot.slane %v7162_v3, 3 }
 0x22f   : > { %v5082_v15 = vpop.f32.mrf.mxu0 }
 0x230   : > { %2861 = vrot.lane.b32.xlu1 %v2815_v2, %s5367_s29  ;;  %2863 = vrot.lane.b32.xlu0 %v2819_v42, %s5367_s29  ;;  %v2378_v15 = vsel %vm535_vm3, %v2373_v46, %v2377_v26  ;;  %v8773_v2 = vrot.slane %v7066_v38, 1  ;;  %v2474_v42 = vsel %vm705_vm1, %v2471_v45, %v2473_v29  ;;  %v2038_v26 = vsel %vm1965_vm4, %v1931_v54, %v2004_v61 }
 0x231   : > { %v1835_v23 = vpop.f32.mrf.mxu0  ;;  %v2277_v46 = vmul.f32 %v6991_v4, %v2039_v6  ;;  %v2609_v45 = vrot.slane %v7196_v36, 3  ;;  %v2276_v54 = vmul.f32 %v7000_v13, %v2038_v26  ;;  %v2531_v6 = vsel %vm8780_vm0, %v2528_v63, %v2530_v39 }
 0x232   : > { %v7158_v48 = vpop.permute.xlu1 %2697  ;;  %v7160_v53 = vpop.permute.xlu0 %2544  ;;  %v2607_v13 = vor.u32 %v2606_v24, %v2605_v41  ;;  %v8774_v41 = vrot.slane %v7162_v3, 4 }
 0x233   : > { %v5083_v10 = vpop.f32.mrf.mxu0  ;;  %v7226_v7 = vpack.c.bf16 %v2277_v46, %v2276_v54 }
 0x234   : > { %2919 = vrot.lane.b32.xlu1 %v2892_v59, %s5366_s28  ;;  %2921 = vrot.lane.b32.xlu0 %v2894_v51, %s5366_s28  ;;  %v2476_v51 = vsel %vm705_vm1, %v2473_v29, %v8773_v2  ;;  %v2936_v29 = vsel %vm1355_vm8, %v6609_v11, %v7118_v44  ;;  %v7238_v44 = vld [vmem:[%s8760_s6] ss:$0 sm:$0xff] }
 0x235   : > { %v2964_v11 = vsel %vm1390_vm9, %v2936_v29, %v7103_v8  ;;  %v1895_v63 = vmul.f32 %v7238_v44, %v1835_v23  ;;  %v1894_v8 = vmul.f32 %v7238_v44, %v7133_v35  ;;  %v7260_v29 = vshrl.u32 %v7226_v7, 16 }
 0x236   : > { %v2640_v14 = vpop.permute.xlu1 %2639  ;;  %v7185_v21 = vpop.permute.xlu0 %2699 }
 0x237   : > { %v1934_v35 = vadd.f32 %v7155_v30, %v1895_v63 }
 0x238   : > { %2430 = vrot.lane.b32.xlu1 %v2378_v15, %s5365_s27  ;;  %2432 = vrot.lane.b32.xlu0 %v2386_v60, %s5365_s27  ;;  %v2610_v15 = vrot.slane %v7193_v27, 4 }
 0x239   : > { %vm1968_vm4 = vcmp.gt.f32.partialorder %v1934_v35, 0.0 }
 0x23a   : > { %v2757_v10 = vpop.permute.xlu1 %2756  ;;  %v7204_v59 = vpop.permute.xlu0 %2418  ;;  %v7231_v26 = vor.u32 %v2610_v15, %v2609_v45  ;;  %v2608_v15 = vsel %vm8778_vm5, %v7071_v32, %v2607_v13  ;;  %v2938_v32 = vsel %vm1355_vm8, %v6616_v57, %v7138_v49  ;;  %v2821_v57 = vrot.slane %v7193_v27, 7 }
 0x23c   : > { %2499 = vrot.lane.b32.xlu1 %v2474_v42, %s5363_s25  ;;  %2501 = vrot.lane.b32.xlu0 %v2476_v51, %s5363_s25  ;;  %v2533_v42 = vsel %vm8780_vm0, %v2530_v39, %v2532_v16  ;;  %v2992_v39 = vsel %vm1425_vm10, %v2964_v11, %v7136_v0  ;;  %v2612_v54 = vsel %vm8778_vm5, %v2607_v13, %v7231_v26  ;;  %v7257_v0 = vshll.u32 %v7226_v7, 16 }
 0x23d   : > { %v7221_v61 = vpop.f32.mrf.mxu0  ;;  %v3020_v24 = vsel %vm1460_vm11, %v2992_v39, %v2640_v14  ;;  %v2744_v13 = vrot.slane %v7162_v3, 6  ;;  %v1933_v11 = vadd.f32 %v7155_v30, %v1894_v8 }
 0x23e   : > { %v2908_v60 = vpop.permute.xlu1 %2907  ;;  %v2642_v4 = vpop.permute.xlu0 %2641 }
 0x23f   : > { %v5086_v2 = vpop.f32.mrf.mxu0 }
 0x240   : > { %2558 = vrot.lane.b32.xlu1 %v2531_v6, %s5362_s24  ;;  %2560 = vrot.lane.b32.xlu0 %v2533_v42, %s5362_s24  ;;  %v2685_v2 = vrot.slane %v7066_v38, 4  ;;  %v3048_v6 = vsel %vm8776_vm12, %v3020_v24, %v7158_v48  ;;  %v2746_v48 = vrot.slane %v7226_v7, 6  ;;  %v2824_v24 = vrot.slane %v7260_v29, 6 }
 0x241   : > { %v1843_v51 = vpop.f32.mrf.mxu0  ;;  %v3076_v63 = vsel %vm8790_vm13, %v3048_v6, %v2757_v10  ;;  %v2966_v10 = vsel %vm1390_vm9, %v2938_v32, %v7120_v22  ;;  %vm8793_vm13 = vcmask 293888   ;;  %v2006_v6 = vmul.f32 %v7174_v5, %v1933_v11 }
 0x242   : > { %v7250_v46 = vpop.permute.xlu1 %2487  ;;  %v2759_v23 = vpop.permute.xlu0 %2758  ;;  %v2686_v14 = vsel %vm8775_vm7, %v2683_v33, %v2685_v2  ;;  %v2688_v42 = vsel %vm8775_vm7, %v2685_v2, %v8774_v41  ;;  %v2820_v33 = vrot.slane %v7196_v36, 6  ;;  %v2825_v2 = vrot.slane %v7257_v0, 7 }
 0x243   : > { %v5087_v45 = vpop.f32.mrf.mxu0  ;;  %vm8794_vm7 = vcmask 1041408  }
 0x244   : > { %2655 = vrot.lane.b32.xlu1 %v2608_v15, %s5368_s16  ;;  %2657 = vrot.lane.b32.xlu0 %v2612_v54, %s5368_s16  ;;  %v2007_v15 = vmul.f32 %v7174_v5, %v1934_v35  ;;  %v2994_v54 = vsel %vm1425_vm10, %v2966_v10, %v7160_v53  ;;  %v2822_v22 = vor.u32 %v2821_v57, %v2820_v33 }
 0x245   : > { %v7306_v53 = vor.u32 %v2825_v2, %v2824_v24 }
 0x246   : > { %v2850_v39 = vpop.permute.xlu1 %2849  ;;  %v7279_v45 = vpop.permute.xlu0 %2489  ;;  %v2041_v32 = vsel %vm1968_vm4, %v1934_v35, %v2007_v15  ;;  %vm8797_vm4 = vcmask 228352  }
 0x247   : > { %v3104_v49 = vsel %vm8791_vm14, %v3076_v63, %v2850_v39  ;;  %v3022_v63 = vsel %vm1460_vm11, %v2994_v54, %v2642_v4  ;;  %vm1967_vm14 = vcmp.gt.f32.partialorder %v1933_v11, 0.0  ;;  %v2279_v2 = vmul.f32 %v7017_v31, %v2041_v32 }
 0x248   : > { %2713 = vrot.lane.b32.xlu1 %v2686_v14, %s5361_s23  ;;  %2715 = vrot.lane.b32.xlu0 %v2688_v42, %s5361_s23  ;;  %v3132_v8 = vsel %vm8792_vm15, %v3104_v49, %v2908_v60  ;;  %v2745_v14 = vsel %vm8794_vm7, %v2742_v40, %v2744_v13  ;;  %vm8795_vm15 = vmmov %vm8794_vm7  ;;  %v1897_v42 = vmul.f32 %v7238_v44, %v1843_v51  ;;  %v2895_v40 = vrot.slane %v7162_v3, 7 }
 0x249   : > { %5102 = vmatprep.mubr.msk.bf16.mxu1 %vm8793_vm13, %v3132_v8  ;;  %v2747_v60 = vsel %vm8795_vm15, %v2744_v13, %v2746_v48  ;;  %v3050_v4 = vsel %vm8776_vm12, %v3022_v63, %v7185_v21  ;;  %v2040_v57 = vsel %vm1967_vm14, %v1933_v11, %v2006_v6  ;;  %v1896_v13 = vmul.f32 %v7238_v44, %v7221_v61 }
 0x24a   : > { %v2910_v39 = vpop.permute.xlu1 %2909  ;;  %v7298_v41 = vpop.permute.xlu0 %2420  ;;  %vm8796_vm7 = vcmask 195584   ;;  %v2823_v51 = vsel %vm8777_vm2, %v7128_v43, %v2822_v22  ;;  %v2827_v10 = vsel %vm8777_vm2, %v2822_v22, %v7306_v53  ;;  %v2897_v11 = vrot.slane %v7226_v7, 7 }
 0x24b   : > { %v3078_v49 = vsel %vm8796_vm7, %v3050_v4, %v2759_v23  ;;  %v1936_v8 = vadd.f32 %v7155_v30, %v1897_v42  ;;  %vm8798_vm13 = vcmask 261120   ;;  %v2278_v43 = vmul.f32 %v7027_v62, %v2040_v57 }
 0x24c   : > { %2772 = vrot.lane.b32.xlu1 %v2745_v14, %s5364_s26  ;;  %2774 = vrot.lane.b32.xlu0 %v2747_v60, %s5364_s26  ;;  %vm8799_vm14 = vcmask 293888   ;;  %v2393_v31 = vrot.slane %v7193_v27, 1  ;;  %v1935_v54 = vadd.f32 %v7155_v30, %v1896_v13  ;;  %v2896_v60 = vsel %vm8779_vm6, %v2893_v37, %v2895_v40 }
 0x24d   : > { %v7313_v33 = vpop.f32.mrf.mxu0  ;;  %v7334_v22 = vpack.c.bf16 %v2279_v2, %v2278_v43  ;;  %v2898_v62 = vsel %vm8779_vm6, %v2895_v40, %v2897_v11  ;;  %v2009_v32 = vmul.f32 %v7174_v5, %v1936_v8  ;;  %v2389_v27 = vor.u32 %v7092_v1, %v2385_v34 }
 0x24e   : > { %v2547_v35 = vpop.permute.xlu1 %2546  ;;  %v2852_v24 = vpop.permute.xlu0 %2851  ;;  %vm1970_vm15 = vcmp.gt.f32.partialorder %v1936_v8, 0.0  ;;  %v2397_v42 = vor.u32 %v7196_v36, %v2393_v31  ;;  %v2477_v37 = vrot.slane %v7162_v3, 1  ;;  %v2479_v4 = vrot.slane %v7226_v7, 1 }
 0x24f   : > { %v3106_v15 = vsel %vm8797_vm4, %v3078_v49, %v2852_v24  ;;  %v5090_v21 = vpop.f32.mrf.mxu0  ;;  %v2008_v40 = vmul.f32 %v7174_v5, %v1935_v54  ;;  %v2394_v49 = vsel %vm535_vm3, %v2389_v27, %v2393_v31  ;;  %vm1969_vm7 = vcmp.gt.f32.partialorder %v1935_v54, 0.0 }
 0x250   : > { %2865 = vrot.lane.b32.xlu1 %v2823_v51, %s5367_s29  ;;  %2867 = vrot.lane.b32.xlu0 %v2827_v10, %s5367_s29  ;;  %v3134_v61 = vsel %vm8798_vm13, %v3106_v15, %v2910_v39  ;;  %v2401_v39 = vrot.slane %v7257_v0, 1  ;;  %v7360_v1 = vshll.u32 %v7334_v22, 16  ;;  %v7363_v34 = vshrl.u32 %v7334_v22, 16 }
 0x251   : > { %v1851_v23 = vpop.f32.mrf.mxu0  ;;  %5103 = vmatmul.mubr.msk.bf16.vlgmr.msra.gmra.mxu1 %vm8799_vm14, %v3134_v61  ;;  %v2043_v36 = vsel %vm1970_vm15, %v1936_v8, %v2009_v32  ;;  %v8800_v24 = vrot.slane %v7066_v38, 1  ;;  %v2480_v2 = vsel %vm705_vm1, %v2477_v37, %v2479_v4  ;;  %v2534_v15 = vrot.slane %v7226_v7, 3 }
 0x252   : > { %v2702_v6 = vpop.permute.xlu1 %2701  ;;  %v2549_v63 = vpop.permute.xlu0 %2548  ;;  %v2402_v50 = vsel %vm535_vm3, %v2397_v42, %v2401_v39  ;;  %v2940_v21 = vsel %vm1355_vm8, %v6625_v18, %v7204_v59  ;;  %v2042_v10 = vsel %vm1969_vm7, %v1935_v54, %v2008_v40  ;;  %v2613_v43 = vrot.slane %v7260_v29, 3 }
 0x253   : > { %v5091_v14 = vpop.f32.mrf.mxu0  ;;  %v2478_v51 = vsel %vm705_vm1, %v8800_v24, %v2477_v37  ;;  %v2614_v31 = vrot.slane %v7257_v0, 4  ;;  %v2618_v32 = vrot.slane %v7360_v1, 4  ;;  %v2968_v27 = vsel %vm1390_vm9, %v2940_v21, %v7250_v46 }
 0x254   : > { %2923 = vrot.lane.b32.xlu1 %v2896_v60, %s5366_s28  ;;  %2925 = vrot.lane.b32.xlu0 %v2898_v62, %s5366_s28  ;;  %v2281_v14 = vmul.f32 %v7047_v56, %v2043_v36  ;;  %v2536_v60 = vrot.slane %v7334_v22, 3  ;;  %v2617_v62 = vrot.slane %v7363_v34, 3  ;;  %v2280_v18 = vmul.f32 %v7058_v28, %v2042_v10 }
 0x255   : > { %v2942_v59 = vsel %vm1355_vm8, %v6637_v17, %v7298_v41  ;;  %v2996_v56 = vsel %vm1425_vm10, %v2968_v27, %v2547_v35  ;;  %v2535_v28 = vsel %vm8780_vm0, %v2532_v16, %v2534_v15  ;;  %v1899_v35 = vmul.f32 %v7238_v44, %v1851_v23 }
 0x256   : > { %v2644_v57 = vpop.permute.xlu1 %2643  ;;  %v7353_v13 = vpop.permute.xlu0 %2703  ;;  %v7395_v46 = vpack.c.bf16 %v2281_v14, %v2280_v18  ;;  %v2537_v17 = vsel %vm8780_vm0, %v2534_v15, %v2536_v60  ;;  %v7403_v41 = vor.u32 %v2618_v32, %v2617_v62  ;;  %v1898_v15 = vmul.f32 %v7238_v44, %v7313_v33 }
 0x257   : > { %v3024_v42 = vsel %vm1460_vm11, %v2996_v56, %v2644_v57  ;;  %v2970_v57 = vsel %vm1390_vm9, %v2942_v59, %v7279_v45  ;;  %vm8801_vm4 = vcmask 195584   ;;  %vm8802_vm13 = vcmask 228352  }
 0x258   : > { %2434 = vrot.lane.b32.xlu1 %v2394_v49, %s5365_s27  ;;  %2436 = vrot.lane.b32.xlu0 %v2402_v50, %s5365_s27  ;;  %v2615_v49 = vor.u32 %v2614_v31, %v2613_v43  ;;  %v2998_v36 = vsel %vm1425_vm10, %v2970_v57, %v2549_v63  ;;  %v3052_v24 = vsel %vm8776_vm12, %v3024_v42, %v2702_v6  ;;  %v2622_v14 = vshrl.u32 %v7395_v46, 16 }
 0x259   : > { %v2625_v62 = vshll.u32 %v7395_v46, 16  ;;  %v1938_v33 = vadd.f32 %v7155_v30, %v1899_v35  ;;  %vm8803_vm14 = vcmask 261120   ;;  %vm8804_vm15 = vcmask 293888  }
 0x25a   : > { %v2761_v8 = vpop.permute.xlu1 %2760  ;;  %v2646_v61 = vpop.permute.xlu0 %2645  ;;  %v2616_v43 = vsel %vm8778_vm5, %v7231_v26, %v2615_v49  ;;  %v2620_v31 = vsel %vm8778_vm5, %v2615_v49, %v7403_v41  ;;  %vm8806_vm7 = vcmask 1043456   ;;  %v2748_v18 = vrot.slane %v7334_v22, 6 }
 0x25b   : > { %v3080_v23 = vsel %vm8801_vm4, %v3052_v24, %v2761_v8  ;;  %v3026_v45 = vsel %vm1460_vm11, %v2998_v36, %v2646_v61  ;;  %v8805_v61 = vrot.slane %v7162_v3, 4  ;;  %vm8807_vm4 = vmmov %vm8806_vm7  ;;  %v1937_v59 = vadd.f32 %v7155_v30, %v1898_v15 }
 0x25c   : > { %2503 = vrot.lane.b32.xlu1 %v2478_v51, %s5363_s25  ;;  %2505 = vrot.lane.b32.xlu0 %v2480_v2, %s5363_s25  ;;  %v2689_v51 = vrot.slane %v7226_v7, 4  ;;  %v2691_v2 = vrot.slane %v7334_v22, 4  ;;  %v3054_v26 = vsel %vm8776_vm12, %v3026_v45, %v7353_v13  ;;  %v2829_v13 = vrot.slane %v7360_v1, 7 }
 0x25d   : > { %v7392_v54 = vpop.f32.mrf.mxu0  ;;  %v2011_v35 = vmul.f32 %v7174_v5, %v1938_v33  ;;  %v2010_v57 = vmul.f32 %v7174_v5, %v1937_v59 }
 0x25e   : > { %v2912_v37 = vpop.permute.xlu1 %2911  ;;  %v2763_v40 = vpop.permute.xlu0 %2762  ;;  %v2690_v32 = vsel %vm8806_vm7, %v8805_v61, %v2689_v51  ;;  %v2692_v27 = vsel %vm8807_vm4, %v2689_v51, %v2691_v2  ;;  %vm1972_vm7 = vcmp.gt.f32.partialorder %v1938_v33, 0.0  ;;  %vm8811_vm4 = vcmask 293888  }
 0x25f   : > { %v5094_v50 = vpop.f32.mrf.mxu0  ;;  %v2045_v45 = vsel %vm1972_vm7, %v1938_v33, %v2011_v35  ;;  %v2409_v61 = vrot.slane %v7360_v1, 1  ;;  %v2481_v1 = vrot.slane %v7334_v22, 1  ;;  %vm8814_vm7 = vcmask 1043456  }
 0x260   : > { %2562 = vrot.lane.b32.xlu1 %v2535_v28, %s5362_s24  ;;  %2564 = vrot.lane.b32.xlu0 %v2537_v17, %s5362_s24  ;;  %v2750_v50 = vrot.slane %v7395_v46, 6  ;;  %v2832_v28 = vrot.slane %v2622_v14, 6  ;;  %v2833_v17 = vrot.slane %v2625_v62, 7 }
 0x261   : > { %v1859_v16 = vpop.f32.mrf.mxu0 }
 0x262   : > { %v2854_v21 = vpop.permute.xlu1 %2853  ;;  %v2914_v10 = vpop.permute.xlu0 %2913 }
 0x263   : > { %v3108_v63 = vsel %vm8802_vm13, %v3080_v23, %v2854_v21  ;;  %v5095_v6 = vpop.f32.mrf.mxu0  ;;  %vm8808_vm13 = vcmask 195584   ;;  %v7463_v23 = vor.u32 %v2833_v17, %v2832_v28  ;;  %v2624_v28 = vrot.slane %v2622_v14, 3 }
 0x264   : > { %2659 = vrot.lane.b32.xlu1 %v2616_v43, %s5368_s16  ;;  %2661 = vrot.lane.b32.xlu0 %v2620_v31, %s5368_s16  ;;  %v3136_v8 = vsel %vm8803_vm14, %v3108_v63, %v2912_v37  ;;  %v3082_v56 = vsel %vm8808_vm13, %v3054_v26, %v2763_v40  ;;  %v2828_v37 = vrot.slane %v7363_v34, 6  ;;  %vm8809_vm14 = vcmask 228352  }
 0x265   : > { %5106 = vmatprep.mubr.msk.bf16.mxu1 %vm8804_vm15, %v3136_v8  ;;  %vm8810_vm15 = vcmask 261120   ;;  %vm8812_vm13 = vcmask 1041408   ;;  %v1901_v43 = vmul.f32 %v7238_v44, %v1859_v16  ;;  %v2899_v63 = vrot.slane %v7334_v22, 7 }
 0x266   : > { %v2856_v42 = vpop.permute.xlu0 %2855  ;;  %v2749_v24 = vsel %vm8812_vm13, %v2746_v48, %v2748_v18  ;;  %vm8813_vm12 = vmmov %vm8812_vm13  ;;  %v2830_v15 = vor.u32 %v2829_v13, %v2828_v37  ;;  %v2283_v6 = vmul.f32 %v7079_v9, %v2045_v45  ;;  %v2901_v26 = vrot.slane %v7395_v46, 7 }
 0x267   : > { %v3110_v49 = vsel %vm8809_vm14, %v3082_v56, %v2856_v42  ;;  %vm1971_vm14 = vcmp.gt.f32.partialorder %v1937_v59, 0.0  ;;  %v2751_v51 = vsel %vm8813_vm12, %v2748_v18, %v2750_v50  ;;  %v1940_v16 = vadd.f32 %v7155_v30, %v1901_v43 }
 0x268   : > { %2717 = vrot.lane.b32.xlu1 %v2690_v32, %s5361_s23  ;;  %2719 = vrot.lane.b32.xlu0 %v2692_v27, %s5361_s23  ;;  %v3138_v40 = vsel %vm8810_vm15, %v3110_v49, %v2914_v10  ;;  %v2044_v21 = vsel %vm1971_vm14, %v1937_v59, %v2010_v57  ;;  %v1900_v10 = vmul.f32 %v7238_v44, %v7392_v54  ;;  %v2627_v17 = vrot.slane %v2625_v62, 4  ;;  %vm8816_vm14 = vmmov %vm8812_vm13 }
 0x269   : > { %5107 = vmatmul.mubr.msk.bf16.gmra.mxu1 %vm8811_vm4, %v3138_v40  ;;  %v2831_v33 = vsel %vm8777_vm2, %v7306_v53, %v2830_v15  ;;  %v2835_v8 = vsel %vm8777_vm2, %v2830_v15, %v7463_v23  ;;  %v2282_v44 = vmul.f32 %v7073_v52, %v2044_v21  ;;  %v2900_v27 = vsel %vm8779_vm6, %v2897_v11, %v2899_v63  ;;  %vm8815_vm4 = vmmov %vm8814_vm7 }
 0x26a   : > { %v7455_v36 = vpop.permute.xlu0 %2424  ;;  %v1939_v54 = vadd.f32 %v7155_v30, %v1900_v10  ;;  %v2902_v52 = vsel %vm8779_vm6, %v2899_v63, %v2901_v26  ;;  %v2405_v30 = vor.u32 %v7260_v29, %v2401_v39  ;;  %v2013_v59 = vmul.f32 %v7174_v5, %v1940_v16 }
 0x26b   : > { %v7487_v53 = vpack.c.bf16 %v2283_v6, %v2282_v44  ;;  %v2413_v42 = vor.u32 %v7363_v34, %v2409_v61  ;;  %vm1974_vm15 = vcmp.gt.f32.partialorder %v1940_v16, 0.0  ;;  %v2538_v29 = vrot.slane %v7395_v46, 3 }
 0x26c   : > { %2776 = vrot.lane.b32.xlu1 %v2749_v24, %s5364_s26  ;;  %2778 = vrot.lane.b32.xlu0 %v2751_v51, %s5364_s26  ;;  %v2012_v18 = vmul.f32 %v7174_v5, %v1939_v54  ;;  %v2410_v11 = vsel %vm535_vm3, %v2405_v30, %v2409_v61  ;;  %vm1973_vm12 = vcmp.gt.f32.partialorder %v1939_v54, 0.0  ;;  %v2482_v5 = vsel %vm705_vm1, %v2479_v4, %v2481_v1 }
 0x26d   : > { %v2631_v13 = vshrl.u32 %v7487_v53, 16  ;;  %v2634_v0 = vshll.u32 %v7487_v53, 16  ;;  %v2047_v49 = vsel %vm1974_vm15, %v1940_v16, %v2013_v59  ;;  %v2540_v57 = vrot.slane %v7487_v53, 3 }
 0x26e   : > { %v7470_v48 = vpop.permute.xlu0 %2493  ;;  %v2046_v39 = vsel %vm1973_vm12, %v1939_v54, %v2012_v18  ;;  %v2628_v45 = vor.u32 %v2627_v17, %v2624_v28  ;;  %v2539_v62 = vsel %vm8780_vm0, %v2536_v60, %v2538_v29  ;;  %v2693_v6 = vrot.slane %v7395_v46, 4  ;;  %v3595_v46 = vld [vmem:[%s7594_s20 + $0x18] sm:$0xff] }
 0x26f   : > { %v2250_v31 = vpop.permute.xlu1 %2249  ;;  %v2633_v24 = vrot.slane %v2631_v13, 3  ;;  %v2636_v51 = vrot.slane %v2634_v0, 4  ;;  %v2284_v4 = vmul.f32 %v7100_v19, %v2046_v39  ;;  %v2541_v10 = vsel %vm8780_vm0, %v2538_v29, %v2540_v57 }
 0x270   : > { %2869 = vrot.lane.b32.xlu1 %v2831_v33, %s5367_s29  ;;  %2871 = vrot.lane.b32.xlu0 %v2835_v8, %s5367_s29  ;;  %v2285_v35 = vmul.f32 %v2250_v31, %v2047_v49  ;;  %v2629_v19 = vsel %vm8778_vm5, %v7403_v41, %v2628_v45  ;;  %v2695_v8 = vrot.slane %v7487_v53, 4  ;;  %v2694_v41 = vsel %vm8814_vm7, %v2691_v2, %v2693_v6 }
 0x271   : > { %v2637_v43 = vor.u32 %v2636_v51, %v2633_v24  ;;  %v2752_v16 = vrot.slane %v7487_v53, 6  ;;  %v2836_v61 = vrot.slane %v2631_v13, 6  ;;  %v2946_v2 = vsel %vm1355_vm8, %v6766_v58, %v7455_v36 }
 0x272   : > { %v7484_v9 = vpop.permute.xlu0 %2552  ;;  %v7525_v21 = vpack.c.bf16 %v2285_v35, %v2284_v4  ;;  %v2696_v30 = vsel %vm8815_vm4, %v2693_v6, %v2695_v8  ;;  %v2974_v29 = vsel %vm1390_vm9, %v2946_v2, %v7470_v48  ;;  %vm8817_vm12 = vcmask 162816   ;;  %v3596_v6 = vld [vmem:[%s7594_s20 + $0x20] sm:$0xff] }
 0x273   : > { %v7489_v32 = vpop.permute.xlu1 %2422  ;;  %v2638_v33 = vsel %vm8778_vm5, %v2628_v45, %v2637_v43  ;;  %v3002_v58 = vsel %vm1425_vm10, %v2974_v29, %v7484_v9  ;;  %vm8818_vm15 = vmmov %vm8817_vm12  ;;  %vm8819_vm7 = vcmask 195584   ;;  %v2903_v9 = vrot.slane %v7487_v53, 7 }
 0x274   : > { %2927 = vrot.lane.b32.xlu1 %v2900_v27, %s5366_s28  ;;  %2929 = vrot.lane.b32.xlu0 %v2902_v52, %s5366_s28  ;;  %v2841_v60 = vshrl.u32 %v7525_v21, 16  ;;  %v2844_v44 = vshll.u32 %v7525_v21, 16  ;;  %v2837_v27 = vrot.slane %v2634_v0, 7  ;;  %v2753_v0 = vsel %vm8812_vm13, %v2750_v50, %v2752_v16  ;;  %vm8820_vm4 = vmmov %vm8819_vm7 }
 0x275   : > { %vm8821_vm13 = vcmask 228352   ;;  %v2905_v51 = vrot.slane %v7525_v21, 7  ;;  %v2904_v45 = vsel %vm8779_vm6, %v2901_v26, %v2903_v9 }
 0x276   : > { %v7505_v56 = vpop.permute.xlu0 %2649  ;;  %v2843_v18 = vrot.slane %v2841_v60, 6  ;;  %v2846_v59 = vrot.slane %v2844_v44, 7  ;;  %v3598_v60 = vld [vmem:[%s7594_s20 + $0x30] sm:$0xff]  ;;  %v3599_v44 = vld [vmem:[%s7594_s20 + $0x38] sm:$0xff] }
 0x277   : > { %v2492_v37 = vpop.permute.xlu1 %2491  ;;  %v3030_v50 = vsel %vm1460_vm11, %v3002_v58, %v7505_v56 }
 0x278   : > { %2438 = vrot.lane.b32.xlu1 %v2410_v11, %s5365_s27  ;;  %2440 = vrot.lane.b32.xlu0 %v2413_v42, %s5365_s27  ;;  %v2944_v11 = vsel %vm1355_vm8, %v6698_v25, %v7489_v32  ;;  %v2847_v49 = vor.u32 %v2846_v59, %v2843_v18  ;;  %v3603_v18 = vld [vmem:[%s7594_s20 + $0x58] sm:$0xff] }
 0x279   : > { %v2972_v42 = vsel %vm1390_vm9, %v2944_v11, %v2492_v37 }
 0x27a   : > { %v2708_v34 = vpop.permute.xlu0 %2707 }
 0x27b   : > { %v2551_v40 = vpop.permute.xlu1 %2550  ;;  %v3058_v37 = vsel %vm8818_vm15, %v3030_v50, %v2708_v34 }
 0x27c   : > { %2507 = vrot.lane.b32.xlu1 %v2482_v5, %s5363_s25  ;;  %2509 = vrot.lane.b32.xlu0 %v2481_v1, %s5363_s25  ;;  %v2754_v1 = vrot.slane %v7525_v21, 6  ;;  %v2838_v5 = vor.u32 %v2837_v27, %v2836_v61  ;;  %v3000_v39 = vsel %vm1425_vm10, %v2972_v42, %v2551_v40  ;;  %v2906_v21 = vsel %vm8779_vm6, %v2903_v9, %v2905_v51  ;;  %v3601_v61 = vld [vmem:[%s7594_s20 + $0x48] sm:$0xff]  ;;  %v3607_v9 = vld [vmem:[%s7594_s20 + $0x78] sm:$0xff] }
 0x27d   : > { %vm8845_vm6 = vcmask 293888  }
 0x27e   : > { %v2767_v15 = vpop.permute.xlu0 %2766  ;;  %v2755_v32 = vsel %vm8816_vm14, %v2752_v16, %v2754_v1  ;;  %v2839_v35 = vsel %vm8777_vm2, %v7463_v23, %v2838_v5  ;;  %v2848_v56 = vsel %vm8777_vm2, %v2838_v5, %v2847_v49  ;;  %vm8822_vm14 = vmmov %vm8821_vm13  ;;  %v3600_v16 = vld [vmem:[%s7594_s20 + $0x40] sm:$0xff]  ;;  %v3602_v1 = vld [vmem:[%s7594_s20 + $0x50] sm:$0xff]  ;;  %vm8833_vm2 = vcmask 261120  }
 0x27f   : > { %v2648_v14 = vpop.permute.xlu1 %2647  ;;  %v3086_v40 = vsel %vm8820_vm4, %v3058_v37, %v2767_v15  ;;  %vm8846_vm0 = vmmov %vm8845_vm6 }
 0x280   : > { %2566 = vrot.lane.b32.xlu1 %v2539_v62, %s5362_s24  ;;  %2568 = vrot.lane.b32.xlu0 %v2541_v10, %s5362_s24  ;;  %v3028_v36 = vsel %vm1460_vm11, %v3000_v39, %v2648_v14  ;;  %v3592_v14 = vld [vmem:[%s7594_s20] sm:$0xff]  ;;  %v3593_v62 = vld [vmem:[%s7594_s20 + $0x8] sm:$0xff] }
 0x282   : > { %v2860_v63 = vpop.permute.xlu0 %2859 }
 0x283   : > { %v2706_v31 = vpop.permute.xlu1 %2705  ;;  %v3114_v34 = vsel %vm8822_vm14, %v3086_v40, %v2860_v63  ;;  %v3594_v63 = vld [vmem:[%s7594_s20 + $0x10] sm:$0xff] }
 0x284   : > { %2663 = vrot.lane.b32.xlu1 %v2629_v19, %s5368_s16  ;;  %2665 = vrot.lane.b32.xlu0 %v2638_v33, %s5368_s16  ;;  %v3056_v48 = vsel %vm8817_vm12, %v3028_v36, %v2706_v31  ;;  %vm8823_vm12 = vcmask 261120   ;;  %v3597_v31 = vld [vmem:[%s7594_s20 + $0x28] sm:$0xff] }
 0x285   : > { %vm8824_vm15 = vmmov %vm8823_vm12 }
 0x286   : > { %v2918_v54 = vpop.permute.xlu0 %2917 }
 0x287   : > { %v2765_v52 = vpop.permute.xlu1 %2764  ;;  %v3142_v23 = vsel %vm8824_vm15, %v3114_v34, %v2918_v54 }
 0x288   : > { %2721 = vrot.lane.b32.xlu1 %v2694_v41, %s5361_s23  ;;  %2723 = vrot.lane.b32.xlu0 %v2696_v30, %s5361_s23  ;;  %v3084_v28 = vsel %vm8819_vm7, %v3056_v48, %v2765_v52  ;;  %vm8825_vm7 = vcmask 293888  }
 0x289   : > { %vm8826_vm4 = vmmov %vm8825_vm7 }
 0x28a   : > { %v7557_v13 = vpop.permute.xlu0 %2428 }
 0x28b   : > { %v2858_v25 = vpop.permute.xlu1 %2857  ;;  %v2950_v59 = vsel %vm1355_vm8, %v6881_v47, %v7557_v13  ;;  %v3604_v13 = vld [vmem:[%s7594_s20 + $0x60] sm:$0xff] }
 0x28c   : > { %2780 = vrot.lane.b32.xlu1 %v2753_v0, %s5364_s26  ;;  %2782 = vrot.lane.b32.xlu0 %v2755_v32, %s5364_s26  ;;  %v3112_v57 = vsel %vm8821_vm13, %v3084_v28, %v2858_v25  ;;  %vm8827_vm13 = vcmask 162816   ;;  %v3605_v25 = vld [vmem:[%s7594_s20 + $0x68] sm:$0xff] }
 0x28d   : > { %vm8828_vm14 = vmmov %vm8827_vm13 }
 0x28e   : > { %v2498_v17 = vpop.permute.xlu0 %2497 }
 0x28f   : > { %v2916_v24 = vpop.permute.xlu1 %2915  ;;  %v2978_v42 = vsel %vm1390_vm9, %v2950_v59, %v2498_v17 }
 0x290   : > { %v3140_v4 = vsel %vm8823_vm12, %v3112_v57, %v2916_v24  ;;  %2873 = vrot.lane.b32.xlu1 %v2839_v35, %s5367_s29  ;;  %2875 = vrot.lane.b32.xlu0 %v2848_v56, %s5367_s29  ;;  %vm8829_vm12 = vcmask 195584   ;;  %v3606_v35 = vld [vmem:[%s7594_s20 + $0x70] sm:$0xff]  ;;  %v3608_v24 = vld [vmem:[%s7594_s20 + $0x80] sm:$0xff] }
 0x291   : > { %5110 = vmatprep.mubr.msk.bf16.mxu1 %vm8825_vm7, %v3140_v4  ;;  %vm8830_vm15 = vmmov %vm8829_vm12  ;;  %vm8831_vm7 = vcmask 228352   ;;  %v3609_v56 = vld [vmem:[%s7594_s20 + $0x88] sm:$0xff]  ;;  %v3610_v4 = vld [vmem:[%s7594_s20 + $0x90] sm:$0xff] }
 0x292   : > { %5111 = vmatmul.mubr.msk.bf16.gmra.mxu1 %vm8826_vm4, %v3142_v23  ;;  %v2557_v53 = vpop.permute.xlu0 %2556  ;;  %vm8832_vm4 = vmmov %vm8831_vm7  ;;  %v3611_v23 = vld [vmem:[%s7594_s20 + $0x98] sm:$0xff] }
 0x293   : > { %v2427_v15 = vpop.permute.xlu1 %2426  ;;  %v3006_v29 = vsel %vm1425_vm10, %v2978_v42, %v2557_v53 }
 0x294   : > { %2931 = vrot.lane.b32.xlu1 %v2904_v45, %s5366_s28  ;;  %2933 = vrot.lane.b32.xlu0 %v2906_v21, %s5366_s28  ;;  %v2948_v30 = vsel %vm1355_vm8, %v6817_v20, %v2427_v15  ;;  %v3612_v45 = vld [vmem:[%s7594_s20 + $0xa0] sm:$0xff]  ;;  %v3613_v21 = vld [vmem:[%s7594_s20 + $0xa8] sm:$0xff] }
 0x296   : > { %v2654_v10 = vpop.permute.xlu0 %2653 }
 0x297   : > { %v2496_v43 = vpop.permute.xlu1 %2495  ;;  %v3034_v39 = vsel %vm1460_vm11, %v3006_v29, %v2654_v10  ;;  %v3614_v10 = vld [vmem:[%s7594_s20 + $0xb0] sm:$0xff] }
 0x298   : > { %3622 = vperm.xlu1 %5239, %v3592_v14   ;;  %3627 = vperm.xlu0 %5238, %v3593_v62   ;;  %v2976_v11 = vsel %vm1390_vm9, %v2948_v30, %v2496_v43  ;;  %v3615_v43 = vld [vmem:[%s7594_s20 + $0xb8] sm:$0xff] }
 0x29a   : > { %v2712_v19 = vpop.permute.xlu0 %2711 }
 0x29b   : > { %v2555_v26 = vpop.permute.xlu1 %2554  ;;  %v3062_v32 = vsel %vm8828_vm14, %v3034_v39, %v2712_v19  ;;  %vm8835_vm14 = vcmask 293888   ;;  %v3616_v19 = vld [vmem:[%s7594_s20 + $0xc0] sm:$0xff] }
 0x29c   : > { %3632 = vperm.xlu1 %5239, %v3594_v63   ;;  %3637 = vperm.xlu0 %5238, %v3595_v46   ;;  %v3004_v0 = vsel %vm1425_vm10, %v2976_v11, %v2555_v26  ;;  %v3617_v26 = vld [vmem:[%s7594_s20 + $0xc8] sm:$0xff] }
 0x29e   : > { %v2771_v33 = vpop.permute.xlu0 %2770 }
 0x29f   : > { %v2652_v8 = vpop.permute.xlu1 %2651  ;;  %v3090_v36 = vsel %vm8830_vm15, %v3062_v32, %v2771_v33 }
 0x2a0   : > { %3642 = vperm.xlu1 %5239, %v3596_v6   ;;  %3647 = vperm.xlu0 %5238, %v3597_v31   ;;  %v3032_v20 = vsel %vm1460_vm11, %v3004_v0, %v2652_v8  ;;  %v3618_v8 = vld [vmem:[%s7594_s20 + $0xd0] sm:$0xff] }
 0x2a2   : > { %v2864_v54 = vpop.permute.xlu0 %2863 }
 0x2a3   : > { %v2710_v41 = vpop.permute.xlu1 %2709  ;;  %v3118_v37 = vsel %vm8832_vm4, %v3090_v36, %v2864_v54 }
 0x2a4   : > { %3652 = vperm.xlu1 %5239, %v3598_v60   ;;  %3657 = vperm.xlu0 %5238, %v3599_v44   ;;  %v3060_v47 = vsel %vm8827_vm13, %v3032_v20, %v2710_v41  ;;  %vm8834_vm13 = vmmov %vm8833_vm2  ;;  %v3619_v60 = vld [vmem:[%s7594_s20 + $0xd8] sm:$0x3f] }
 0x2a6   : > { %v2922_v27 = vpop.permute.xlu0 %2921 }
 0x2a7   : > { %v2769_v52 = vpop.permute.xlu1 %2768  ;;  %v3146_v17 = vsel %vm8834_vm13, %v3118_v37, %v2922_v27  ;;  %vm8841_vm13 = vcmask 228352  }
 0x2a8   : > { %3662 = vperm.xlu1 %5239, %v3600_v16   ;;  %3667 = vperm.xlu0 %5238, %v3601_v61   ;;  %v3088_v49 = vsel %vm8829_vm12, %v3060_v47, %v2769_v52  ;;  %vm8836_vm12 = vmmov %vm8835_vm14 }
 0x2aa   : > { %v7620_v2 = vpop.permute.xlu0 %2432 }
 0x2ab   : > { %v2862_v5 = vpop.permute.xlu1 %2861  ;;  %v2954_v44 = vsel %vm1355_vm8, %v7008_v12, %v7620_v2 }
 0x2ac   : > { %3672 = vperm.xlu1 %5239, %v3602_v1   ;;  %3677 = vperm.xlu0 %5238, %v3603_v18   ;;  %v3116_v50 = vsel %vm8831_vm7, %v3088_v49, %v2862_v5  ;;  %vm8839_vm7 = vcmask 195584  }
 0x2ad   : > { %vm8840_vm4 = vmmov %vm8839_vm7 }
 0x2ae   : > { %v2502_v58 = vpop.permute.xlu0 %2501 }
 0x2af   : > { %v2920_v48 = vpop.permute.xlu1 %2919  ;;  %v2982_v16 = vsel %vm1390_vm9, %v2954_v44, %v2502_v58 }
 0x2b0   : > { %v3144_v28 = vsel %vm8833_vm2, %v3116_v50, %v2920_v48  ;;  %3682 = vperm.xlu1 %5239, %v3604_v13   ;;  %3687 = vperm.xlu0 %5238, %v3605_v25   ;;  %vm8837_vm2 = vcmask 162816  }
 0x2b1   : > { %5114 = vmatprep.mubr.msk.bf16.mxu1 %vm8835_vm14, %v3144_v28  ;;  %vm8838_vm15 = vmmov %vm8837_vm2 }
 0x2b2   : > { %5115 = vmatmul.mubr.msk.bf16.gmra.mxu1 %vm8836_vm12, %v3146_v17  ;;  %v2561_v40 = vpop.permute.xlu0 %2560  ;;  %vm8842_vm14 = vmmov %vm8841_vm13  ;;  %vm8843_vm12 = vcmask 261120  }
 0x2b3   : > { %v2431_v57 = vpop.permute.xlu1 %2430  ;;  %v3010_v52 = vsel %vm1425_vm10, %v2982_v16, %v2561_v40  ;;  %vm8844_vm5 = vmmov %vm8843_vm12 }
 0x2b4   : > { %3692 = vperm.xlu1 %5239, %v3606_v35   ;;  %3697 = vperm.xlu0 %5238, %v3607_v9   ;;  %v2952_v33 = vsel %vm1355_vm8, %v6926_v55, %v2431_v57 }
 0x2b6   : > { %v2658_v51 = vpop.permute.xlu0 %2657 }
 0x2b7   : > { %v2500_v34 = vpop.permute.xlu1 %2499  ;;  %v3038_v55 = vsel %vm1460_vm11, %v3010_v52, %v2658_v51 }
 0x2b8   : > { %3702 = vperm.xlu1 %5239, %v3608_v24   ;;  %3707 = vperm.xlu0 %5238, %v3609_v56   ;;  %v2980_v54 = vsel %vm1390_vm9, %v2952_v33, %v2500_v34 }
 0x2ba   : > { %v2716_v53 = vpop.permute.xlu0 %2715 }
 0x2bb   : > { %v2559_v15 = vpop.permute.xlu1 %2558  ;;  %v3066_v12 = vsel %vm8838_vm15, %v3038_v55, %v2716_v53  ;;  %vm8851_vm15 = vmmov %vm8841_vm13 }
 0x2bc   : > { %3712 = vperm.xlu1 %5239, %v3610_v4   ;;  %3717 = vperm.xlu0 %5238, %v3611_v23   ;;  %v3008_v61 = vsel %vm1425_vm10, %v2980_v54, %v2559_v15 }
 0x2be   : > { %v2775_v14 = vpop.permute.xlu0 %2774 }
 0x2bf   : > { %v2656_v62 = vpop.permute.xlu1 %2655  ;;  %v3094_v11 = vsel %vm8840_vm4, %v3066_v12, %v2775_v14 }
 0x2c0   : > { %3722 = vperm.xlu1 %5239, %v3612_v45   ;;  %3727 = vperm.xlu0 %5238, %v3613_v21   ;;  %v3036_v30 = vsel %vm1460_vm11, %v3008_v61, %v2656_v62 }
 0x2c2   : > { %v2868_v63 = vpop.permute.xlu0 %2867 }
 0x2c3   : > { %v2714_v46 = vpop.permute.xlu1 %2713  ;;  %v3122_v0 = vsel %vm8842_vm14, %v3094_v11, %v2868_v63  ;;  %vm8855_vm14 = vcmask 293888  }
 0x2c4   : > { %3732 = vperm.xlu1 %5239, %v3614_v10   ;;  %3737 = vperm.xlu0 %5238, %v3615_v43   ;;  %v3064_v1 = vsel %vm8837_vm2, %v3036_v30, %v2714_v46 }
 0x2c6   : > { %v2926_v6 = vpop.permute.xlu0 %2925 }
 0x2c7   : > { %v2773_v31 = vpop.permute.xlu1 %2772  ;;  %v3150_v29 = vsel %vm8844_vm5, %v3122_v0, %v2926_v6 }
 0x2c8   : > { %3742 = vperm.xlu1 %5239, %v3616_v19   ;;  %3747 = vperm.xlu0 %5238, %v3617_v26   ;;  %v3092_v18 = vsel %vm8839_vm7, %v3064_v1, %v2773_v31  ;;  %vm8852_vm7 = vmmov %vm8841_vm13 }
 0x2ca   : > { %v2437_v41 = vpop.permute.xlu0 %2436 }
 0x2cb   : > { %v2866_v27 = vpop.permute.xlu1 %2865  ;;  %v2958_v17 = vsel %vm1355_vm8, %v7162_v3, %v2437_v41 }
 0x2cc   : > { %3752 = vperm.xlu1 %5239, %v3618_v8   ;;  %3757 = vperm.xlu0 %5238, %v3619_v60   ;;  %v3120_v2 = vsel %vm8841_vm13, %v3092_v18, %v2866_v27 }
 0x2ce   : > { %v2506_v59 = vpop.permute.xlu0 %2505 }
 0x2cf   : > { %v2924_v42 = vpop.permute.xlu1 %2923  ;;  %v2986_v40 = vsel %vm1390_vm9, %v2958_v17, %v2506_v59  ;;  %v5292_v59 = vld [vmem:[%s5461_s22 + $0x14] sm:$0xf] }
 0x2d0   : > { %v3148_v5 = vsel %vm8843_vm12, %v3120_v2, %v2924_v42  ;;  %v3421_v11 = vunpack.c.l.bf16 %v5292_v59 }
 0x2d1   : > { %5118 = vmatprep.mubr.msk.bf16.mxu1 %vm8845_vm6, %v3148_v5  ;;  %vm8849_vm6 = vmmov %vm8840_vm4 }
 0x2d2   : > { %5119 = vmatmul.mubr.msk.bf16.gmra.mxu1 %vm8846_vm0, %v3150_v29  ;;  %v2565_v20 = vpop.permute.xlu0 %2564  ;;  %vm8847_vm0 = vmmov %vm8837_vm2 }
 0x2d3   : > { %v2435_v39 = vpop.permute.xlu1 %2434  ;;  %v3014_v56 = vsel %vm1425_vm10, %v2986_v40, %v2565_v20  ;;  %vm8848_vm5 = vmmov %vm8847_vm0 }
 0x2d4   : > { %v2956_v28 = vsel %vm1355_vm8, %v7066_v38, %v2435_v39  ;;  %vm8850_vm2 = vmmov %vm8840_vm4  ;;  %v7715_v39 = vld [vmem:[%s8761_s7] ss:$0 sm:$0xff] }
 0x2d5   : > { %vm8853_vm4 = vmmov %vm8843_vm12 }
 0x2d6   : > { %v2662_v47 = vpop.permute.xlu0 %2661  ;;  %vm8854_vm13 = vmmov %vm8853_vm4 }
 0x2d7   : > { %v2504_v13 = vpop.permute.xlu1 %2503  ;;  %v3042_v34 = vsel %vm1460_vm11, %v3014_v56, %v2662_v47  ;;  %vm8856_vm12 = vmmov %vm8855_vm14  ;;  %v5293_v47 = vld [vmem:[%s5461_s22 + $0x18] sm:$0xf]  ;;  %v8862_v56 = vmov 0.0  }
 0x2d8   : > { %v2984_v35 = vsel %vm1390_vm9, %v2956_v28, %v2504_v13  ;;  %v3422_v13 = vunpack.c.l.bf16 %v5293_v47 }
 0x2da   : > { %v2720_v25 = vpop.permute.xlu0 %2719 }
 0x2db   : > { %v2563_v32 = vpop.permute.xlu1 %2562  ;;  %v3070_v38 = vsel %vm8848_vm5, %v3042_v34, %v2720_v25  ;;  %vm8857_vm5 = vmmov %vm8847_vm0  ;;  %v5294_v25 = vld [vmem:[%s5461_s22 + $0x24] sm:$0xf] }
 0x2dc   : > { %v3012_v57 = vsel %vm1425_vm10, %v2984_v35, %v2563_v32  ;;  %v3425_v32 = vunpack.c.l.bf16 %v5294_v25  ;;  %v3479_v35 = vrot.slane %v3421_v11, 6 }
 0x2de   : > { %v2779_v49 = vpop.permute.xlu0 %2778 }
 0x2df   : > { %v2660_v58 = vpop.permute.xlu1 %2659  ;;  %v3098_v53 = vsel %vm8850_vm2, %v3070_v38, %v2779_v49 }
 0x2e0   : > { %v3040_v51 = vsel %vm1460_vm11, %v3012_v57, %v2660_v58  ;;  %v3480_v57 = vrot.slane %v3422_v13, 6 }
 0x2e2   : > { %v2872_v36 = vpop.permute.xlu0 %2871 }
 0x2e3   : > { %v2718_v50 = vpop.permute.xlu1 %2717  ;;  %v3126_v21 = vsel %vm8852_vm7, %v3098_v53, %v2872_v36 }
 0x2e4   : > { %v3068_v4 = vsel %vm8847_vm0, %v3040_v51, %v2718_v50 }
 0x2e6   : > { %v2930_v48 = vpop.permute.xlu0 %2929 }
 0x2e7   : > { %v2777_v37 = vpop.permute.xlu1 %2776  ;;  %v3154_v62 = vsel %vm8854_vm13, %v3126_v21, %v2930_v48  ;;  %vm8860_vm13 = vmmov %vm8853_vm4  ;;  %v7725_v48 = vld [vmem:[%s8761_s7 + $0x1] ss:$0 sm:$0xff] }
 0x2e8   : > { %v3096_v3 = vsel %vm8849_vm6, %v3068_v4, %v2777_v37  ;;  %vm8858_vm6 = vmmov %vm8850_vm2 }
 0x2ea   : > { %v2441_v9 = vpop.permute.xlu0 %2440 }
 0x2eb   : > { %v2870_v24 = vpop.permute.xlu1 %2869  ;;  %v2962_v54 = vsel %vm1355_vm8, %v7334_v22, %v2441_v9  ;;  %v5291_v22 = vld [vmem:[%s5461_s22 + $0x20] sm:$0xf] }
 0x2ec   : > { %v3124_v15 = vsel %vm8851_vm15, %v3096_v3, %v2870_v24  ;;  %v3424_v18 = vunpack.c.l.bf16 %v5291_v22  ;;  %vm8859_vm15 = vmmov %vm8852_vm7  ;;  %v7730_v24 = vrot.slane %v3425_v32, 6  ;;  %v5296_v22 = vld [vmem:[%s5461_s22 + $0x30] sm:$0xf] }
 0x2ee   : > { %v2510_v23 = vpop.permute.xlu0 %2509  ;;  %v3484_v28 = vrot.slane %v3424_v18, 6  ;;  %v3428_v18 = vunpack.c.l.bf16 %v5296_v22 }
 0x2ef   : > { %v2928_v45 = vpop.permute.xlu1 %2927  ;;  %v2990_v16 = vsel %vm1390_vm9, %v2962_v54, %v2510_v23 }
 0x2f0   : > { %v3152_v14 = vsel %vm8853_vm4, %v3124_v15, %v2928_v45  ;;  %v3492_v13 = vrot.slane %v3428_v18, 6 }
 0x2f1   : > { %5122 = vmatprep.mubr.msk.bf16.mxu1 %vm8855_vm14, %v3152_v14  ;;  %vm8861_vm14 = vmmov %vm8856_vm12 }
 0x2f2   : > { %5123 = vmatmul.mubr.msk.bf16.gmra.mxu1 %vm8856_vm12, %v3154_v62  ;;  %v2569_v10 = vpop.permute.xlu0 %2568 }
 0x2f3   : > { %v2439_v43 = vpop.permute.xlu1 %2438  ;;  %v3018_v52 = vsel %vm1425_vm10, %v2990_v16, %v2569_v10 }
 0x2f4   : > { %v2960_v44 = vsel %vm1355_vm8, %v7226_v7, %v2439_v43  ;;  %v5290_v7 = vld [vmem:[%s5461_s22 + $0x1c] sm:$0xf] }
 0x2f5   : > { %v3423_v12 = vunpack.c.l.bf16 %v5290_v7  ;;  %v5295_v7 = vld [vmem:[%s5461_s22 + $0x2c] sm:$0xf] }
 0x2f6   : > { %v2666_v63 = vpop.permute.xlu0 %2665 }
 0x2f7   : > { %v2508_v46 = vpop.permute.xlu1 %2507  ;;  %v3046_v55 = vsel %vm1460_vm11, %v3018_v52, %v2666_v63  ;;  %v3482_v37 = vrot.slane %v3423_v12, 6  ;;  %v3427_v12 = vunpack.c.l.bf16 %v5295_v7 }
 0x2f8   : > { %v2988_v41 = vsel %vm1390_vm9, %v2960_v44, %v2508_v46 }
 0x2f9   : > { %v3490_v47 = vrot.slane %v3427_v12, 6 }
 0x2fa   : > { %v2724_v26 = vpop.permute.xlu0 %2723 }
 0x2fb   : > { %v2567_v19 = vpop.permute.xlu1 %2566  ;;  %v3074_v2 = vsel %vm8857_vm5, %v3046_v55, %v2724_v26  ;;  %vm8864_vm5 = vcmask 1041408  }
 0x2fc   : > { %v3016_v61 = vsel %vm1425_vm10, %v2988_v41, %v2567_v19  ;;  %v3485_v3 = vsel %vm8864_vm5, %v3482_v37, %v3484_v28 }
 0x2fe   : > { %v2783_v31 = vpop.permute.xlu0 %2782 }
 0x2ff   : > { %v2664_v6 = vpop.permute.xlu1 %2663  ;;  %v3102_v5 = vsel %vm8850_vm2, %v3074_v2, %v2783_v31  ;;  %vm8866_vm2 = vmmov %vm8864_vm5  ;;  %v5297_v2 = vld [vmem:[%s5461_s22 + $0x28] sm:$0xf] }
 0x300   : > { %v3044_v30 = vsel %vm1460_vm11, %v3016_v61, %v2664_v6  ;;  %v3487_v21 = vsel %vm8866_vm2, %v3484_v28, %v7730_v24 }
 0x302   : > { %v2876_v60 = vpop.permute.xlu0 %2875 }
 0x303   : > { %v2722_v33 = vpop.permute.xlu1 %2721  ;;  %v3130_v49 = vsel %vm8852_vm7, %v3102_v5, %v2876_v60  ;;  %vm8868_vm7 = vmmov %vm8866_vm2 }
 0x304   : > { %v3072_v1 = vsel %vm8847_vm0, %v3044_v30, %v2722_v33  ;;  %vm8863_vm0 = vmmov 0  }
 0x306   : > { %v2934_v42 = vpop.permute.xlu0 %2933 }
 0x307   : > { %v2781_v8 = vpop.permute.xlu1 %2780  ;;  %v3158_v36 = vsel %vm8860_vm13, %v3130_v49, %v2934_v42  ;;  %v3426_v42 = vunpack.c.l.bf16 %v5297_v2  ;;  %vm8870_vm13 = vmmov %vm8866_vm2 }
 0x308   : > { %v3100_v0 = vsel %vm8858_vm6, %v3072_v1, %v2781_v8  ;;  %vm8865_vm6 = vmmov %vm8864_vm5 }
 0x309   : > { %v3481_v15 = vsel %vm8865_vm6, %v3479_v35, %v3480_v57  ;;  %v3488_v49 = vrot.slane %v3426_v42, 6  ;;  %vm8873_vm5 = vmmov %vm8866_vm2  ;;  %vm8874_vm6 = vcmask 1043456  }
 0x30b   : > { %v2874_v27 = vpop.permute.xlu1 %2873 }
 0x30c   : > { %v3128_v29 = vsel %vm8859_vm15, %v3100_v0, %v2874_v27  ;;  %vm8867_vm15 = vmmov %vm8866_vm2  ;;  %v5298_v0 = vld [vmem:[%s5461_s22 + $0x34] sm:$0xf] }
 0x30d   : > { %v3483_v63 = vsel %vm8867_vm15, %v3480_v57, %v3482_v37  ;;  %v3429_v5 = vunpack.c.l.bf16 %v5298_v0 }
 0x30f   : > { %v2932_v20 = vpop.permute.xlu1 %2931 }
 0x310   : > { %v3156_v58 = vsel %vm8853_vm4, %v3128_v29, %v2932_v20  ;;  %vm8869_vm4 = vmmov %vm8866_vm2 }
 0x311   : > { %v5104_v50 = vpop.f32.mrf.mxu1  ;;  %5126 = vmatprep.mubr.msk.bf16.mxu1 %vm8861_vm14, %v3156_v58  ;;  %v7771_v58 = vrot.slane %v3429_v5, 6  ;;  %v3489_v57 = vsel %vm8869_vm4, %v7730_v24, %v3488_v49  ;;  %vm8871_vm14 = vmmov %vm8866_vm2  ;;  %vm8875_vm2 = vcmask 1040384  }
 0x312   : > { %v3362_v17 = vmul.f32 %v5104_v50, %v7715_v39  ;;  %5127 = vmatmul.mubr.msk.bf16.gmra.mxu1 %vm8856_vm12, %v3158_v36  ;;  %vm8872_vm12 = vcmask 1044480   ;;  %vm8876_vm15 = vmmov %vm8869_vm4 }
 0x313   : > { %v3623_v9 = vpop.permute.xlu1 %3622  ;;  %v3244_v40 = vpop.f32.mrf.mxu1  ;;  %5136 = vmatprep.mubr.msk.bf16.mxu1 %vm8863_vm0, %v8862_v56  ;;  %vm8878_vm4 = vmmov %vm8874_vm6 }
 0x314   : > { %v3395_v51 = vadd.f32 %v7725_v48, %v3362_v17  ;;  %v3360_v34 = vmul.f32 %v7715_v39, %v3244_v40  ;;  %v3628_v4 = vpop.permute.xlu0 %3627  ;;  %v3493_v17 = vsel %vm8868_vm7, %v3490_v47, %v3492_v13  ;;  %vm8877_vm7 = vmmov %vm8872_vm12 }
 0x315   : > { %v5105_v38 = vpop.f32.mrf.mxu1 }
 0x316   : > { %v3393_v23 = vadd.f32 %v7725_v48, %v3360_v34  ;;  %v3363_v53 = vmul.f32 %v5105_v38, %v7715_v39  ;;  %v3566_v62 = vadd.f32 %v3485_v3, %v3395_v51  ;;  %v3495_v51 = vsel %vm8870_vm13, %v3492_v13, %v7771_v58 }
 0x317   : > { %v3247_v45 = vpop.f32.mrf.mxu1  ;;  %v3633_v43 = vpop.permute.xlu1 %3632  ;;  %vm8879_vm13 = vsmask.f32 4352 }
 0x318   : > { %v3396_v14 = vadd.f32 %v7725_v48, %v3363_v53  ;;  %v3361_v10 = vmul.f32 %v7715_v39, %v3247_v45  ;;  %v3564_v46 = vadd.f32 %v3481_v15, %v3393_v23  ;;  %v3638_v6 = vpop.permute.xlu0 %3637  ;;  %v3762_v31 = vmul.f32 %v3633_v43, %v3566_v62 }
 0x319   : > { %v3491_v23 = vsel %vm8871_vm14, %v3488_v49, %v3490_v47  ;;  %v5285_v47 = vld [vmem:[%s8759_s5 + $0x8] sm:$0xff]   ;;  %vm8880_vm14 = vsmask.f32 1280 }
 0x31a   : > { %v3394_v19 = vadd.f32 %v7725_v48, %v3361_v10  ;;  %v3567_v26 = vadd.f32 %v3487_v21, %v3396_v14  ;;  %v3760_v60 = vmul.f32 %v3623_v9, %v3564_v46 }
 0x31b   : > { %v3643_v36 = vpop.permute.xlu1 %3642 }
 0x31c   : > { %v3565_v33 = vadd.f32 %v3483_v63, %v3394_v19  ;;  %v3763_v8 = vmul.f32 %v3638_v6, %v3567_v26  ;;  %v3648_v28 = vpop.permute.xlu0 %3647 }
 0x31e   : > { %v3761_v44 = vmul.f32 %v3628_v4, %v3565_v33  ;;  %v7746_v54 = vpack.c.bf16 %v3763_v8, %v3762_v31 }
 0x31f   : > { %v3653_v21 = vpop.permute.xlu1 %3652 }
 0x320   : > { %v7748_v41 = vpack.c.bf16 %v3761_v44, %v3760_v60  ;;  %v3929_v61 = vrot.slane %v7746_v54, 1  ;;  %v3810_v52 = vshll.u32 %v7746_v54, 16  ;;  %v3658_v14 = vpop.permute.xlu0 %3657  ;;  %v3974_v26 = vrot.slane %v7746_v54, 3 }
 0x321   : > { %v3814_v18 = vshrl.u32 %v7746_v54, 16 }
 0x322   : > { %v3928_v16 = vrot.slane %v7748_v41, 1  ;;  %v3805_v27 = vshll.u32 %v7748_v41, 16  ;;  %v3803_v55 = vshrl.u32 %v7748_v41, 16  ;;  %v7763_v11 = vrot.slane %v3810_v52, 1 }
 0x324   : > { %v3930_v30 = vsel %vm705_vm1, %v3928_v16, %v3929_v61  ;;  %v3807_v1 = vrot.slane %v3805_v27, 1  ;;  %v4095_v27 = vrot.slane %v7746_v54, 4 }
 0x325   : > { %3951 = vrot.lane.b32.xlu0 %v3930_v30, %s5363_s25 }
 0x326   : > { %v3808_v59 = vor.u32 %v3807_v1, %v3803_v55 }
 0x328   : > { %v3813_v29 = vsel %vm535_vm3, %v3808_v59, %v7763_v11  ;;  %v5284_v59 = vld [vmem:[%s8759_s5 + $0x10] ss:$0 sps:$4 sm:$0x33]  }
 0x329   : > { %v5108_v20 = vpop.f32.mrf.mxu1  ;;  %3894 = vrot.lane.b32.xlu1 %v3813_v29, %s5365_s27  ;;  %v4529_v42 = vsel %vm8876_vm15, %v5284_v59, 0 }
 0x32a   : > { %v3366_v25 = vmul.f32 %v5108_v20, %v7715_v39  ;;  %5131 = vmatpush3.bf16.msra.mxu1 %v4529_v42 }
 0x32b   : > { %v3260_v32 = vpop.f32.mrf.mxu1  ;;  %5132 = vmatprep.subr.bf16.mxu1 %v8862_v56 }
 0x32c   : > { %v3399_v50 = vadd.f32 %v7725_v48, %v3366_v25  ;;  %v3364_v37 = vmul.f32 %v7715_v39, %v3260_v32  ;;  %v4019_v25 = vrot.slane %v3814_v18, 3 }
 0x32d   : > { %v5109_v35 = vpop.f32.mrf.mxu1 }
 0x32e   : > { %v3397_v9 = vadd.f32 %v7725_v48, %v3364_v37  ;;  %v3367_v40 = vmul.f32 %v5109_v35, %v7715_v39  ;;  %v3570_v4 = vadd.f32 %v3493_v17, %v3399_v50  ;;  %5133 = vmatpush3.bf16.msra.mxu1 %v5285_v47 }
 0x32f   : > { %v3263_v34 = vpop.f32.mrf.mxu1  ;;  %5134 = vmatprep.subr.bf16.mxu1 %v8862_v56 }
 0x330   : > { %v3400_v38 = vadd.f32 %v7725_v48, %v3367_v40  ;;  %v3365_v3 = vmul.f32 %v7715_v39, %v3263_v34  ;;  %v3568_v53 = vadd.f32 %v3489_v57, %v3397_v9  ;;  %v3766_v62 = vmul.f32 %v3653_v21, %v3570_v4  ;;  %v5286_v9 = vld [vmem:[%s8759_s5] sm:$0xff]  }
 0x331   : > { %v3816_v40 = vor.u32 %v3814_v18, %v7763_v11 }
 0x332   : > { %v3571_v15 = vadd.f32 %v3495_v51, %v3400_v38  ;;  %v3398_v45 = vadd.f32 %v7725_v48, %v3365_v3  ;;  %v3764_v43 = vmul.f32 %v3643_v36, %v3568_v53  ;;  %5135 = vmatpush3.bf16.msra.mxu1 %v5286_v9 }
 0x334   : > { %v3767_v10 = vmul.f32 %v3658_v14, %v3571_v15  ;;  %v3569_v24 = vadd.f32 %v3491_v23, %v3398_v45  ;;  %v5299_v14 = vld [vmem:[%s5461_s22 + $0x38] sm:$0xf] }
 0x336   : > { %v7786_v63 = vpack.c.bf16 %v3767_v10, %v3766_v62  ;;  %v3765_v46 = vmul.f32 %v3648_v28, %v3569_v24  ;;  %v3430_v62 = vunpack.c.l.bf16 %v5299_v14 }
 0x338   : > { %v7788_v19 = vpack.c.bf16 %v3765_v46, %v3764_v43  ;;  %v4142_v33 = vrot.slane %v7786_v63, 6  ;;  %v4261_v30 = vrot.slane %v7786_v63, 7  ;;  %v3977_v2 = vrot.slane %v7786_v63, 3  ;;  %v5300_v46 = vld [vmem:[%s5461_s22 + $0x3c] sm:$0xf] }
 0x339   : > { %v4098_v13 = vrot.slane %v7786_v63, 4  ;;  %v3933_v32 = vrot.slane %v7786_v63, 1  ;;  %v7835_v49 = vshll.u32 %v7786_v63, 16  ;;  %v7838_v36 = vshrl.u32 %v7786_v63, 16 }
 0x33a   : > { %v3975_v6 = vrot.slane %v7788_v19, 3  ;;  %v4141_v31 = vrot.slane %v7788_v19, 6  ;;  %v4096_v44 = vrot.slane %v7788_v19, 4  ;;  %v4260_v16 = vrot.slane %v7788_v19, 7 }
 0x33b   : > { %v3931_v55 = vrot.slane %v7788_v19, 1  ;;  %v3818_v12 = vshll.u32 %v7788_v19, 16  ;;  %v3822_v22 = vshrl.u32 %v7788_v19, 16  ;;  %v4189_v51 = vrot.slane %v7838_v36, 6 }
 0x33c   : > { %v3976_v8 = vsel %vm8872_vm12, %v3974_v26, %v3975_v6  ;;  %v4143_v60 = vsel %vm8873_vm5, %v4141_v31, %v4142_v33  ;;  %v4097_v1 = vsel %vm8874_vm6, %v4095_v27, %v4096_v44  ;;  %v4262_v7 = vsel %vm8875_vm2, %v4260_v16, %v4261_v30  ;;  %vm8881_vm12 = vmmov %vm8879_vm13  ;;  %v5302_v16 = vld [vmem:[%s5461_s22 + $0x40] sm:$0xf] }
 0x33d   : > { %3997 = vrot.lane.b32.xlu1 %v3976_v8, %s5362_s24  ;;  %4164 = vrot.lane.b32.xlu0 %v4143_v60, %s5364_s26  ;;  %v3932_v0 = vsel %vm705_vm1, %v3929_v61, %v3931_v55  ;;  %v3978_v5 = vsel %vm8877_vm7, %v3975_v6, %v3977_v2  ;;  %v4022_v29 = vrot.slane %v3822_v22, 3  ;;  %v4023_v20 = vrot.slane %v3818_v12, 4  ;;  %v5301_v60 = vld [vmem:[%s5461_s22 + $0x44] sm:$0xf]  ;;  %vm8882_vm6 = vmmov %vm8873_vm5 }
 0x33e   : > { %v4020_v61 = vrot.slane %v3810_v52, 4  ;;  %v4099_v50 = vsel %vm8878_vm4, %v4096_v44, %v4098_v13  ;;  %v3820_v37 = vrot.slane %v3818_v12, 1  ;;  %v3934_v28 = vsel %vm705_vm1, %v3931_v55, %v3933_v32  ;;  %vm8883_vm2 = vmmov %vm8873_vm5 }
 0x33f   : > { %v4024_v52 = vor.u32 %v4023_v20, %v4022_v29  ;;  %v4186_v17 = vrot.slane %v3822_v22, 6  ;;  %v4187_v35 = vrot.slane %v3818_v12, 7  ;;  %v4190_v34 = vrot.slane %v7835_v49, 7  ;;  %vm8884_vm15 = vmmov %vm8883_vm2 }
 0x340   : > { %v4021_v57 = vor.u32 %v4020_v61, %v4019_v25  ;;  %v4026_v4 = vrot.slane %v7838_v36, 3  ;;  %v4027_v38 = vrot.slane %v7835_v49, 4  ;;  %v3821_v3 = vsel %vm535_vm3, %v3816_v40, %v3820_v37  ;;  %vm8885_vm7 = vmmov %vm8883_vm2 }
 0x341   : > { %4118 = vrot.lane.b32.xlu1 %v4097_v1, %s5361_s23  ;;  %4283 = vrot.lane.b32.xlu0 %v4262_v7, %s5366_s28  ;;  %v4188_v53 = vor.u32 %v4187_v35, %v4186_v17  ;;  %v7862_v11 = vor.u32 %v4190_v34, %v4189_v51  ;;  %v3824_v10 = vor.u32 %v3822_v22, %v3820_v37  ;;  %v3828_v43 = vrot.slane %v7835_v49, 1 }
 0x342   : > { %v4025_v23 = vsel %vm8879_vm13, %v4021_v57, %v4024_v52  ;;  %v7864_v15 = vor.u32 %v4027_v38, %v4026_v4  ;;  %v3431_v26 = vunpack.c.l.bf16 %v5300_v46  ;;  %v3496_v31 = vrot.slane %v3430_v62, 6 }
 0x343   : > { %v4192_v45 = vsel %vm8880_vm14, %v4188_v53, %v7862_v11  ;;  %v3829_v8 = vsel %vm535_vm3, %v3824_v10, %v3828_v43  ;;  %v3433_v44 = vunpack.c.l.bf16 %v5301_v60  ;;  %v3432_v27 = vunpack.c.l.bf16 %v5302_v16  ;;  %v5303_v60 = vld [vmem:[%s5461_s22 + $0x48] sm:$0xf] }
 0x344   : > { %v4029_v21 = vsel %vm8881_vm12, %v4024_v52, %v7864_v15  ;;  %v3498_v18 = vrot.slane %v3431_v26, 6  ;;  %v3497_v59 = vsel %vm8873_vm5, %v7771_v58, %v3496_v31  ;;  %v3663_v58 = vpop.permute.xlu1 %3662  ;;  %vm8886_vm4 = vcmask 1044480   ;;  %vm8889_vm12 = vmmov %vm8883_vm2 }
 0x345   : > { %3953 = vrot.lane.b32.xlu0 %v3932_v0, %s5363_s25  ;;  %3999 = vrot.lane.b32.xlu1 %v3978_v5, %s5362_s24  ;;  %v7887_v42 = vrot.slane %v3433_v44, 6  ;;  %v3500_v5 = vrot.slane %v3432_v27, 6  ;;  %vm8887_vm13 = vcmask 1040384   ;;  %vm8888_vm14 = vcmask 1043456   ;;  %vm8890_vm5 = vmmov %vm8886_vm4 }
 0x346   : > { %v3499_v20 = vsel %vm8882_vm6, %v3496_v31, %v3498_v18  ;;  %v3434_v44 = vunpack.c.l.bf16 %v5303_v60  ;;  %vm8891_vm6 = vmmov %vm8887_vm13 }
 0x347   : > { %v3501_v52 = vsel %vm8884_vm15, %v3498_v18, %v3500_v5  ;;  %v5304_v18 = vld [vmem:[%s5461_s22 + $0x4c] sm:$0xf]  ;;  %vm8893_vm15 = vmmov %vm8885_vm7 }
 0x348   : > { %v3673_v4 = vpop.permute.xlu1 %3672 }
 0x349   : > { %4120 = vrot.lane.b32.xlu1 %v4099_v50, %s5361_s23  ;;  %3955 = vrot.lane.b32.xlu0 %v3934_v28, %s5363_s25  ;;  %v3668_v50 = vpop.permute.xlu0 %3667  ;;  %v3503_v28 = vsel %vm8883_vm2, %v3500_v5, %v7887_v42  ;;  %vm8892_vm2 = vmmov %vm8888_vm14  ;;  %v5305_v5 = vld [vmem:[%s5461_s22 + $0x50] sm:$0xf] }
 0x34d   : > { %3896 = vrot.lane.b32.xlu1 %v3821_v3, %s5365_s27  ;;  %4073 = vrot.lane.b32.xlu0 %v4025_v23, %s5368_s16  ;;  %v3678_v34 = vpop.permute.xlu0 %3677 }
 0x351   : > { %4238 = vrot.lane.b32.xlu1 %v4192_v45, %s5367_s29  ;;  %4075 = vrot.lane.b32.xlu0 %v4029_v21, %s5368_s16  ;;  %v3688_v60 = vpop.permute.xlu0 %3687 }
 0x352   : > { %v5112_v24 = vpop.f32.mrf.mxu1 }
 0x353   : > { %v3370_v22 = vmul.f32 %v5112_v24, %v7715_v39 }
 0x354   : > { %v3276_v6 = vpop.f32.mrf.mxu1 }
 0x355   : > { %v3368_v55 = vmul.f32 %v7715_v39, %v3276_v6  ;;  %3898 = vrot.lane.b32.xlu1 %v3829_v8, %s5365_s27  ;;  %v3403_v37 = vadd.f32 %v7725_v48, %v3370_v22 }
 0x356   : > { %v5113_v1 = vpop.f32.mrf.mxu1 }
 0x357   : > { %v3401_v7 = vadd.f32 %v7725_v48, %v3368_v55  ;;  %v3371_v12 = vmul.f32 %v5113_v1, %v7715_v39  ;;  %v3574_v57 = vadd.f32 %v3501_v52, %v3403_v37 }
 0x358   : > { %v3279_v0 = vpop.f32.mrf.mxu1 }
 0x359   : > { %v3369_v29 = vmul.f32 %v7715_v39, %v3279_v0  ;;  %v3572_v47 = vadd.f32 %v3497_v59, %v3401_v7  ;;  %v3404_v25 = vadd.f32 %v7725_v48, %v3371_v12  ;;  %v3770_v53 = vmul.f32 %v3673_v4, %v3574_v57 }
 0x35a   : > { %v3435_v59 = vunpack.c.l.bf16 %v5304_v18  ;;  %v3832_v0 = vor.u32 %v7838_v36, %v3828_v43 }
 0x35b   : > { %v3402_v61 = vadd.f32 %v7725_v48, %v3369_v29  ;;  %v3768_v35 = vmul.f32 %v3663_v58, %v3572_v47  ;;  %v3575_v9 = vadd.f32 %v3503_v28, %v3404_v25  ;;  %v3436_v29 = vunpack.c.l.bf16 %v5305_v5 }
 0x35d   : > { %v3573_v17 = vadd.f32 %v3499_v20, %v3402_v61  ;;  %v3771_v38 = vmul.f32 %v3678_v34, %v3575_v9  ;;  %v3504_v61 = vrot.slane %v3434_v44, 6 }
 0x35f   : > { %v3769_v40 = vmul.f32 %v3668_v50, %v3573_v17  ;;  %v7911_v10 = vpack.c.bf16 %v3771_v38, %v3770_v53  ;;  %v5306_v50 = vld [vmem:[%s5461_s22 + $0x54] sm:$0xf]  ;;  %v3506_v17 = vrot.slane %v3435_v59, 6  ;;  %v3508_v38 = vrot.slane %v3436_v29, 6 }
 0x360   : > { %v3437_v37 = vunpack.c.l.bf16 %v5306_v50 }
 0x361   : > { %v7897_v51 = vpack.c.bf16 %v3769_v40, %v3768_v35  ;;  %v3981_v46 = vrot.slane %v7911_v10, 3  ;;  %v4265_v31 = vrot.slane %v7911_v10, 7  ;;  %v4102_v8 = vrot.slane %v7911_v10, 4 }
 0x362   : > { %v7958_v20 = vshll.u32 %v7911_v10, 16  ;;  %v7961_v47 = vshrl.u32 %v7911_v10, 16  ;;  %v3937_v9 = vrot.slane %v7911_v10, 1 }
 0x363   : > { %v4144_v3 = vrot.slane %v7897_v51, 6  ;;  %v3979_v23 = vrot.slane %v7897_v51, 3  ;;  %v4263_v14 = vrot.slane %v7897_v51, 7  ;;  %v4100_v62 = vrot.slane %v7897_v51, 4 }
 0x364   : > { %v7924_v26 = vshll.u32 %v7897_v51, 16  ;;  %v3935_v16 = vrot.slane %v7897_v51, 1  ;;  %v4197_v57 = vrot.slane %v7961_v47, 6  ;;  %v4198_v34 = vrot.slane %v7958_v20, 7 }
 0x365   : > { %v4145_v45 = vsel %vm8885_vm7, %v4142_v33, %v4144_v3  ;;  %v3980_v21 = vsel %vm8886_vm4, %v3977_v2, %v3979_v23  ;;  %v4264_v24 = vsel %vm8887_vm13, %v4261_v30, %v4263_v14  ;;  %v4101_v33 = vsel %vm8888_vm14, %v4098_v13, %v4100_v62  ;;  %vm8895_vm4 = vmmov %vm8889_vm12 }
 0x366   : > { %4166 = vrot.lane.b32.xlu0 %v4145_v45, %s5364_s26  ;;  %4001 = vrot.lane.b32.xlu1 %v3980_v21, %s5362_s24  ;;  %v4146_v2 = vrot.slane %v7911_v10, 6  ;;  %v3982_v30 = vsel %vm8890_vm5, %v3979_v23, %v3981_v46  ;;  %v7933_v13 = vshrl.u32 %v7897_v51, 16  ;;  %v3836_v27 = vrot.slane %v7924_v26, 1  ;;  %vm8896_vm13 = vmmov %vm8895_vm4 }
 0x367   : > { %v4266_v55 = vsel %vm8891_vm6, %v4263_v14, %v4265_v31  ;;  %v4103_v1 = vsel %vm8892_vm2, %v4100_v62, %v4102_v8  ;;  %v4194_v12 = vrot.slane %v7924_v26, 7  ;;  %v3936_v28 = vsel %vm705_vm1, %v3933_v32, %v3935_v16  ;;  %vm8897_vm14 = vmmov %vm8895_vm4 }
 0x368   : > { %v4147_v6 = vsel %vm8889_vm12, %v4144_v3, %v4146_v2  ;;  %v4193_v7 = vrot.slane %v7933_v13, 6  ;;  %v3837_v49 = vsel %vm535_vm3, %v3832_v0, %v3836_v27  ;;  %v4030_v58 = vrot.slane %v7933_v13, 3  ;;  %vm8901_vm2 = vmmov %vm8895_vm4 }
 0x369   : > { %v4031_v52 = vrot.slane %v7924_v26, 4  ;;  %v3505_v3 = vsel %vm8893_vm15, %v7887_v42, %v3504_v61  ;;  %v7981_v23 = vrot.slane %v3437_v37, 6  ;;  %vm8894_vm7 = vsmask.f32 1280 }
 0x36a   : > { %4285 = vrot.lane.b32.xlu0 %v4264_v24, %s5366_s28  ;;  %4122 = vrot.lane.b32.xlu1 %v4101_v33, %s5361_s23  ;;  %v4195_v43 = vor.u32 %v4194_v12, %v4193_v7  ;;  %v3938_v14 = vsel %vm705_vm1, %v3935_v16, %v3937_v9  ;;  %v3507_v24 = vsel %vm8895_vm4, %v3504_v61, %v3506_v17  ;;  %v4034_v42 = vrot.slane %v7961_v47, 3  ;;  %vm8899_vm5 = vmmov %vm8894_vm7 }
 0x36b   : > { %v4032_v62 = vor.u32 %v4031_v52, %v4030_v58  ;;  %v4035_v33 = vrot.slane %v7958_v20, 4  ;;  %v3509_v16 = vsel %vm8896_vm13, %v3506_v17, %v3508_v38  ;;  %vm8898_vm12 = vsmask.f32 4352  ;;  %vm8905_vm13 = vmmov %vm8901_vm2 }
 0x36c   : > { %v4196_v21 = vsel %vm8894_vm7, %v7862_v11, %v4195_v43  ;;  %v3840_v18 = vor.u32 %v7933_v13, %v3836_v27  ;;  %v3844_v59 = vrot.slane %v7958_v20, 1  ;;  %vm8900_vm6 = vmmov %vm8898_vm12  ;;  %v3698_v13 = vpop.permute.xlu0 %3697  ;;  %vm8902_vm15 = vcmask 1044480  }
 0x36d   : > { %v4033_v12 = vsel %vm8898_vm12, %v7864_v15, %v4032_v62  ;;  %vm8903_vm7 = vcmask 1040384   ;;  %vm8904_vm4 = vcmask 1043456  }
 0x36e   : > { %4168 = vrot.lane.b32.xlu0 %v4147_v6, %s5364_s26  ;;  %4003 = vrot.lane.b32.xlu1 %v3982_v30, %s5362_s24  ;;  %v7996_v30 = vor.u32 %v4198_v34, %v4197_v57  ;;  %v3845_v37 = vsel %vm535_vm3, %v3840_v18, %v3844_v59  ;;  %vm8907_vm12 = vmmov %vm8903_vm7 }
 0x372   : > { %v5116_v22 = vpop.f32.mrf.mxu1  ;;  %4287 = vrot.lane.b32.xlu0 %v4266_v55, %s5366_s28  ;;  %4124 = vrot.lane.b32.xlu1 %v4103_v1, %s5361_s23  ;;  %v3511_v55 = vsel %vm8897_vm14, %v3508_v38, %v7981_v23  ;;  %v3683_v1 = vpop.permute.xlu1 %3682  ;;  %vm8906_vm14 = vmmov %vm8902_vm15 }
 0x373   : > { %v3374_v4 = vmul.f32 %v5116_v22, %v7715_v39  ;;  %v4200_v22 = vsel %vm8899_vm5, %v4195_v43, %v7996_v30  ;;  %vm8908_vm5 = vmmov %vm8904_vm4 }
 0x374   : > { %v3292_v25 = vpop.f32.mrf.mxu1 }
 0x375   : > { %v3372_v36 = vmul.f32 %v7715_v39, %v3292_v25  ;;  %v3407_v44 = vadd.f32 %v7725_v48, %v3374_v4  ;;  %v8010_v25 = vor.u32 %v4035_v33, %v4034_v42 }
 0x376   : > { %v5117_v35 = vpop.f32.mrf.mxu1  ;;  %3957 = vrot.lane.b32.xlu0 %v3936_v28, %s5363_s25  ;;  %3900 = vrot.lane.b32.xlu1 %v3837_v49, %s5365_s27  ;;  %v3693_v27 = vpop.permute.xlu1 %3692 }
 0x377   : > { %v3405_v40 = vadd.f32 %v7725_v48, %v3372_v36  ;;  %v3375_v32 = vmul.f32 %v5117_v35, %v7715_v39  ;;  %v3578_v61 = vadd.f32 %v3509_v16, %v3407_v44  ;;  %v4037_v15 = vsel %vm8900_vm6, %v4032_v62, %v8010_v25  ;;  %v5308_v44 = vld [vmem:[%s5461_s22 + $0x5c] sm:$0xf]  ;;  %vm8909_vm6 = vmmov %vm8901_vm2 }
 0x378   : > { %v3295_v53 = vpop.f32.mrf.mxu1  ;;  %v3439_v16 = vunpack.c.l.bf16 %v5308_v44 }
 0x379   : > { %v3373_v45 = vmul.f32 %v7715_v39, %v3295_v53  ;;  %v3576_v26 = vadd.f32 %v3505_v3, %v3405_v40  ;;  %v3408_v6 = vadd.f32 %v7725_v48, %v3375_v32  ;;  %v3774_v36 = vmul.f32 %v3693_v27, %v3578_v61  ;;  %v8035_v32 = vpop.permute.xlu0 %3707 }
 0x37a   : > { %4240 = vrot.lane.b32.xlu1 %v4196_v21, %s5367_s29  ;;  %3959 = vrot.lane.b32.xlu0 %v3938_v14, %s5363_s25  ;;  %v8033_v40 = vpop.permute.xlu1 %3702  ;;  %v5307_v14 = vld [vmem:[%s5461_s22 + $0x58] sm:$0xf] }
 0x37b   : > { %v3406_v11 = vadd.f32 %v7725_v48, %v3373_v45  ;;  %v3772_v0 = vmul.f32 %v3683_v1, %v3576_v26  ;;  %v3579_v5 = vadd.f32 %v3511_v55, %v3408_v6  ;;  %v3438_v62 = vunpack.c.l.bf16 %v5307_v14  ;;  %v5309_v1 = vld [vmem:[%s5461_s22 + $0x60] sm:$0xf] }
 0x37c   : > { %v3848_v55 = vor.u32 %v7961_v47, %v3844_v59 }
 0x37d   : > { %v3577_v7 = vadd.f32 %v3507_v24, %v3406_v11  ;;  %v3775_v20 = vmul.f32 %v3698_v13, %v3579_v5  ;;  %v8063_v53 = vpop.permute.xlu0 %3717  ;;  %v5310_v5 = vld [vmem:[%s5461_s22 + $0x64] sm:$0xf] }
 0x37e   : > { %4077 = vrot.lane.b32.xlu0 %v4033_v12, %s5368_s16  ;;  %4242 = vrot.lane.b32.xlu1 %v4200_v22, %s5367_s29  ;;  %v8061_v3 = vpop.permute.xlu1 %3712 }
 0x37f   : > { %v3773_v29 = vmul.f32 %v3688_v60, %v3577_v7  ;;  %v8031_v35 = vpack.c.bf16 %v3775_v20, %v3774_v36  ;;  %v3440_v7 = vunpack.c.l.bf16 %v5309_v1 }
 0x381   : > { %v8012_v50 = vpack.c.bf16 %v3773_v29, %v3772_v0  ;;  %v4150_v57 = vrot.slane %v8031_v35, 6  ;;  %v3985_v34 = vrot.slane %v8031_v35, 3  ;;  %v4269_v45 = vrot.slane %v8031_v35, 7 }
 0x382   : > { %4079 = vrot.lane.b32.xlu0 %v4037_v15, %s5368_s16  ;;  %3902 = vrot.lane.b32.xlu1 %v3845_v37, %s5365_s27  ;;  %v4106_v21 = vrot.slane %v8031_v35, 4  ;;  %v8084_v12 = vshll.u32 %v8031_v35, 16  ;;  %v8087_v22 = vshrl.u32 %v8031_v35, 16  ;;  %v3512_v0 = vrot.slane %v3438_v62, 6  ;;  %v8096_v59 = vpop.permute.xlu1 %3722  ;;  %v8098_v15 = vpop.permute.xlu0 %3727 }
 0x383   : > { %v4148_v28 = vrot.slane %v8012_v50, 6  ;;  %v3983_v49 = vrot.slane %v8012_v50, 3  ;;  %v4267_v52 = vrot.slane %v8012_v50, 7  ;;  %v4104_v17 = vrot.slane %v8012_v50, 4 }
 0x384   : > { %v8048_v4 = vshll.u32 %v8012_v50, 16  ;;  %v3939_v24 = vrot.slane %v8012_v50, 1  ;;  %v3441_v29 = vunpack.c.l.bf16 %v5310_v5 }
 0x385   : > { %v4149_v43 = vsel %vm8901_vm2, %v4146_v2, %v4148_v28  ;;  %v3984_v58 = vsel %vm8902_vm15, %v3981_v46, %v3983_v49  ;;  %v4268_v2 = vsel %vm8903_vm7, %v4265_v31, %v4267_v52  ;;  %v4105_v46 = vsel %vm8904_vm4, %v4102_v8, %v4104_v17  ;;  %vm8911_vm15 = vmmov %vm8909_vm6 }
 0x386   : > { %4170 = vrot.lane.b32.xlu0 %v4149_v43, %s5364_s26  ;;  %4005 = vrot.lane.b32.xlu1 %v3984_v58, %s5362_s24  ;;  %v4151_v31 = vsel %vm8905_vm13, %v4148_v28, %v4150_v57  ;;  %v3986_v38 = vsel %vm8906_vm14, %v3983_v49, %v3985_v34  ;;  %v8057_v8 = vshrl.u32 %v8012_v50, 16  ;;  %v3852_v42 = vrot.slane %v8048_v4, 1  ;;  %v8128_v44 = vpop.permute.xlu0 %3737  ;;  %vm8912_vm7 = vmmov %vm8909_vm6 }
 0x387   : > { %v4270_v33 = vsel %vm8907_vm12, %v4267_v52, %v4269_v45  ;;  %v4107_v26 = vsel %vm8908_vm5, %v4104_v17, %v4106_v21  ;;  %v4202_v11 = vrot.slane %v8048_v4, 7  ;;  %v3940_v61 = vsel %vm705_vm1, %v3937_v9, %v3939_v24  ;;  %vm8913_vm4 = vmmov %vm8909_vm6 }
 0x388   : > { %v4201_v6 = vrot.slane %v8057_v8, 6  ;;  %v3853_v47 = vsel %vm535_vm3, %v3848_v55, %v3852_v42  ;;  %v4038_v27 = vrot.slane %v8057_v8, 3  ;;  %v4039_v20 = vrot.slane %v8048_v4, 4  ;;  %vm8917_vm5 = vmmov %vm8913_vm4 }
 0x389   : > { %v3514_v28 = vrot.slane %v3439_v16, 6  ;;  %v3941_v9 = vrot.slane %v8031_v35, 1  ;;  %v4205_v58 = vrot.slane %v8087_v22, 6  ;;  %v4206_v52 = vrot.slane %v8084_v12, 7 }
 0x38a   : > { %4289 = vrot.lane.b32.xlu0 %v4268_v2, %s5366_s28  ;;  %4126 = vrot.lane.b32.xlu1 %v4105_v46, %s5361_s23  ;;  %v4203_v13 = vor.u32 %v4202_v11, %v4201_v6  ;;  %v3516_v2 = vrot.slane %v3440_v7, 6  ;;  %v3513_v46 = vsel %vm8909_vm6, %v7981_v23, %v3512_v0  ;;  %vm8910_vm2 = vsmask.f32 1280 }
 0x38b   : > { %v3515_v6 = vsel %vm8911_vm15, %v3512_v0, %v3514_v28  ;;  %v4042_v23 = vrot.slane %v8087_v22, 3  ;;  %v4043_v11 = vrot.slane %v8084_v12, 4  ;;  %v8132_v55 = vor.u32 %v4206_v52, %v4205_v58  ;;  %vm8915_vm14 = vmmov %vm8910_vm2 }
 0x38c   : > { %v4204_v62 = vsel %vm8910_vm2, %v7996_v30, %v4203_v13  ;;  %v3517_v7 = vsel %vm8912_vm7, %v3514_v28, %v3516_v2  ;;  %vm8914_vm13 = vsmask.f32 4352  ;;  %vm8918_vm6 = vcmask 1044480   ;;  %vm8921_vm7 = vmmov %vm8913_vm4 }
 0x38d   : > { %v8150_v28 = vor.u32 %v4043_v11, %v4042_v23  ;;  %vm8916_vm12 = vmmov %vm8914_vm13  ;;  %vm8919_vm2 = vcmask 1040384   ;;  %vm8920_vm15 = vcmask 1043456  }
 0x38e   : > { %4172 = vrot.lane.b32.xlu0 %v4151_v31, %s5364_s26  ;;  %4007 = vrot.lane.b32.xlu1 %v3986_v38, %s5362_s24  ;;  %v8113_v31 = vrot.slane %v3441_v29, 6  ;;  %v4208_v29 = vsel %vm8915_vm14, %v4203_v13, %v8132_v55  ;;  %v8154_v13 = vpop.permute.xlu0 %3747  ;;  %vm8924_vm14 = vmmov %vm8920_vm15 }
 0x392   : > { %v5120_v60 = vpop.f32.mrf.mxu1  ;;  %4291 = vrot.lane.b32.xlu0 %v4270_v33, %s5366_s28  ;;  %4128 = vrot.lane.b32.xlu1 %v4107_v26, %s5361_s23  ;;  %v3942_v33 = vsel %vm705_vm1, %v3939_v24, %v3941_v9  ;;  %v4040_v26 = vor.u32 %v4039_v20, %v4038_v27 }
 0x393   : > { %v3378_v17 = vmul.f32 %v5120_v60, %v7715_v39  ;;  %v8126_v60 = vpop.permute.xlu1 %3732 }
 0x394   : > { %v3308_v18 = vpop.f32.mrf.mxu1  ;;  %v4041_v5 = vsel %vm8914_vm13, %v8010_v25, %v4040_v26  ;;  %vm8923_vm13 = vmmov %vm8919_vm2 }
 0x395   : > { %v3376_v37 = vmul.f32 %v7715_v39, %v3308_v18  ;;  %v3411_v1 = vadd.f32 %v7725_v48, %v3378_v17  ;;  %v3519_v18 = vsel %vm8913_vm4, %v3516_v2, %v8113_v31  ;;  %v8179_v2 = vpop.permute.xlu0 %3757  ;;  %vm8922_vm4 = vmmov %vm8918_vm6 }
 0x396   : > { %v5121_v49 = vpop.f32.mrf.mxu1  ;;  %3961 = vrot.lane.b32.xlu0 %v3940_v61, %s5363_s25  ;;  %3904 = vrot.lane.b32.xlu1 %v3853_v47, %s5365_s27  ;;  %v3856_v61 = vor.u32 %v8057_v8, %v3852_v42  ;;  %v3860_v47 = vrot.slane %v8084_v12, 1  ;;  %v4045_v8 = vsel %vm8916_vm12, %v4040_v26, %v8150_v28  ;;  %vm8925_vm12 = vmmov %vm8917_vm5 }
 0x397   : > { %v3409_v36 = vadd.f32 %v7725_v48, %v3376_v37  ;;  %v3379_v43 = vmul.f32 %v5121_v49, %v7715_v39  ;;  %v3582_v25 = vadd.f32 %v3517_v7, %v3411_v1  ;;  %v8152_v49 = vpop.permute.xlu1 %3742 }
 0x398   : > { %v3311_v38 = vpop.f32.mrf.mxu1  ;;  %v3861_v42 = vsel %vm535_vm3, %v3856_v61, %v3860_v47 }
 0x399   : > { %v3377_v14 = vmul.f32 %v7715_v39, %v3311_v38  ;;  %v3580_v30 = vadd.f32 %v3513_v46, %v3409_v36  ;;  %v3412_v16 = vadd.f32 %v7725_v48, %v3379_v43  ;;  %v3778_v36 = vmul.f32 %v8061_v3, %v3582_v25  ;;  %v8191_v46 = vpop.permute.xlu0 %3951  ;;  %v5313_v25 = vld [vmem:[%s5461_s22 + $0x70] sm:$0xf] }
 0x39a   : > { %4244 = vrot.lane.b32.xlu1 %v4204_v62, %s5367_s29  ;;  %3963 = vrot.lane.b32.xlu0 %v3942_v33, %s5363_s25 }
 0x39b   : > { %v3410_v24 = vadd.f32 %v7725_v48, %v3377_v14  ;;  %v3776_v37 = vmul.f32 %v8033_v40, %v3580_v30  ;;  %v3583_v27 = vadd.f32 %v3519_v18, %v3412_v16  ;;  %v5311_v16 = vld [vmem:[%s5461_s22 + $0x68] sm:$0xf] }
 0x39d   : > { %v3581_v0 = vadd.f32 %v3515_v6, %v3410_v24  ;;  %v3779_v40 = vmul.f32 %v8063_v53, %v3583_v27  ;;  %v8177_v53 = vpop.permute.xlu1 %3752  ;;  %v3442_v24 = vunpack.c.l.bf16 %v5311_v16 }
 0x39e   : > { %4081 = vrot.lane.b32.xlu0 %v4041_v5, %s5368_s16  ;;  %4246 = vrot.lane.b32.xlu1 %v4208_v29, %s5367_s29 }
 0x39f   : > { %v3777_v20 = vmul.f32 %v8035_v32, %v3581_v0  ;;  %v8181_v3 = vpack.c.bf16 %v3779_v40, %v3778_v36 }
 0x3a1   : > { %v8156_v4 = vpack.c.bf16 %v3777_v20, %v3776_v37  ;;  %v8193_v38 = vpop.permute.xlu1 %3894  ;;  %v4154_v14 = vrot.slane %v8181_v3, 6  ;;  %v3989_v62 = vrot.slane %v8181_v3, 3  ;;  %v4273_v11 = vrot.slane %v8181_v3, 7  ;;  %v5312_v37 = vld [vmem:[%s5461_s22 + $0x6c] sm:$0xf] }
 0x3a2   : > { %4083 = vrot.lane.b32.xlu0 %v4045_v8, %s5368_s16  ;;  %3906 = vrot.lane.b32.xlu1 %v3861_v42, %s5365_s27  ;;  %v4110_v30 = vrot.slane %v8181_v3, 4  ;;  %v3443_v27 = vunpack.c.l.bf16 %v5312_v37  ;;  %v3864_v20 = vor.u32 %v8087_v22, %v3860_v47  ;;  %v3444_v8 = vunpack.c.l.bf16 %v5313_v25 }
 0x3a3   : > { %v4152_v32 = vrot.slane %v8156_v4, 6  ;;  %v3987_v12 = vrot.slane %v8156_v4, 3  ;;  %v4271_v52 = vrot.slane %v8156_v4, 7  ;;  %v4108_v17 = vrot.slane %v8156_v4, 4 }
 0x3a4   : > { %v8198_v33 = vshll.u32 %v8156_v4, 16  ;;  %v8207_v26 = vshrl.u32 %v8156_v4, 16  ;;  %v3943_v1 = vrot.slane %v8156_v4, 1 }
 0x3a5   : > { %v4153_v43 = vsel %vm8917_vm5, %v4150_v57, %v4152_v32  ;;  %v3988_v58 = vsel %vm8918_vm6, %v3985_v34, %v3987_v12  ;;  %v4272_v57 = vsel %vm8919_vm2, %v4269_v45, %v4271_v52  ;;  %v4109_v34 = vsel %vm8920_vm15, %v4106_v21, %v4108_v17  ;;  %vm8927_vm6 = vmmov %vm8921_vm7 }
 0x3a6   : > { %4174 = vrot.lane.b32.xlu0 %v4153_v43, %s5364_s26  ;;  %4009 = vrot.lane.b32.xlu1 %v3988_v58, %s5362_s24  ;;  %v4155_v45 = vsel %vm8921_vm7, %v4152_v32, %v4154_v14  ;;  %v3990_v21 = vsel %vm8922_vm4, %v3987_v12, %v3989_v62  ;;  %v3868_v7 = vrot.slane %v8198_v33, 1  ;;  %v4274_v18 = vsel %vm8923_vm13, %v4271_v52, %v4273_v11  ;;  %v5314_v58 = vld [vmem:[%s5461_s22 + $0x74] sm:$0xf]  ;;  %vm8928_vm2 = vmmov %vm8927_vm6 }
 0x3a7   : > { %v4111_v0 = vsel %vm8924_vm14, %v4108_v17, %v4110_v30  ;;  %v4209_v5 = vrot.slane %v8207_v26, 6  ;;  %v4210_v29 = vrot.slane %v8198_v33, 7  ;;  %v8238_v32 = vshll.u32 %v8181_v3, 16  ;;  %vm8929_vm15 = vmmov %vm8928_vm2 }
 0x3a8   : > { %v8241_v12 = vshrl.u32 %v8181_v3, 16  ;;  %v3520_v43 = vrot.slane %v3442_v24, 6  ;;  %v3445_v52 = vunpack.c.l.bf16 %v5314_v58  ;;  %v3944_v22 = vsel %vm705_vm1, %v3941_v9, %v3943_v1 }
 0x3a9   : > { %v3869_v47 = vsel %vm535_vm3, %v3864_v20, %v3868_v7  ;;  %v3945_v24 = vrot.slane %v8181_v3, 1  ;;  %v3524_v20 = vrot.slane %v3444_v8, 6  ;;  %vm8926_vm5 = vsmask.f32 1280 }
 0x3aa   : > { %4293 = vrot.lane.b32.xlu0 %v4272_v57, %s5366_s28  ;;  %4130 = vrot.lane.b32.xlu1 %v4109_v34, %s5361_s23  ;;  %v4211_v57 = vor.u32 %v4210_v29, %v4209_v5  ;;  %v4046_v34 = vrot.slane %v8207_v26, 3  ;;  %v4213_v5 = vrot.slane %v8241_v12, 6  ;;  %v4214_v29 = vrot.slane %v8238_v32, 7  ;;  %vm8931_vm4 = vmmov %vm8926_vm5 }
 0x3ab   : > { %v3521_v25 = vsel %vm8925_vm12, %v8113_v31, %v3520_v43  ;;  %v4051_v31 = vrot.slane %v8238_v32, 4  ;;  %vm8930_vm7 = vsmask.f32 4352  ;;  %vm8932_vm13 = vcmask 162816  }
 0x3ac   : > { %vm8933_vm14 = vmmov %vm8930_vm7  ;;  %vm8934_vm12 = vcmask 195584  }
 0x3ae   : > { %4176 = vrot.lane.b32.xlu0 %v4155_v45, %s5364_s26  ;;  %4011 = vrot.lane.b32.xlu1 %v3990_v21, %s5362_s24  ;;  %v4047_v45 = vrot.slane %v8198_v33, 4  ;;  %v3522_v21 = vrot.slane %v3443_v27, 6 }
 0x3af   : > { %v8211_v6 = vpop.permute.xlu1 %3997  ;;  %v8213_v23 = vpop.permute.xlu0 %4164 }
 0x3b0   : > { %v3523_v8 = vsel %vm8927_vm6, %v3520_v43, %v3522_v21  ;;  %v3525_v43 = vsel %vm8928_vm2, %v3522_v21, %v3524_v20  ;;  %v3876_v21 = vrot.slane %v8238_v32, 1  ;;  %vm8936_vm6 = vcmask 261120   ;;  %v5319_v32 = vld [vmem:[%s8761_s7] ss:$0 sm:$0xff] }
 0x3b2   : > { %v5124_v61 = vpop.f32.mrf.mxu1  ;;  %4295 = vrot.lane.b32.xlu0 %v4274_v18, %s5366_s28  ;;  %4132 = vrot.lane.b32.xlu1 %v4111_v0, %s5361_s23 }
 0x3b3   : > { %v8233_v42 = vpop.permute.xlu1 %4118  ;;  %v8235_v40 = vpop.permute.xlu0 %4283  ;;  %v3382_v27 = vmul.f32 %v5124_v61, %v7715_v39  ;;  %v4306_v61 = vsel %vm1355_vm8, %v7748_v41, %v8193_v38  ;;  %v8289_v41 = vor.u32 %v4214_v29, %v4213_v5 }
 0x3b4   : > { %v3324_v36 = vpop.f32.mrf.mxu1  ;;  %v4328_v5 = vsel %vm1390_vm9, %v4306_v61, %v8191_v46 }
 0x3b5   : > { %v3380_v17 = vmul.f32 %v7715_v39, %v3324_v36  ;;  %v8267_v36 = vrot.slane %v3445_v52, 6  ;;  %v3415_v38 = vadd.f32 %v7725_v48, %v3382_v27 }
 0x3b6   : > { %v5125_v16 = vpop.f32.mrf.mxu1  ;;  %3965 = vrot.lane.b32.xlu0 %v3944_v22, %s5363_s25  ;;  %3908 = vrot.lane.b32.xlu1 %v3869_v47, %s5365_s27  ;;  %v4212_v47 = vsel %vm8926_vm5, %v8132_v55, %v4211_v57  ;;  %vm8935_vm5 = vcmask 228352  }
 0x3b7   : > { %v3413_v9 = vadd.f32 %v7725_v48, %v3380_v17  ;;  %v3383_v18 = vmul.f32 %v5125_v16, %v7715_v39  ;;  %v8258_v0 = vpop.permute.xlu1 %3999  ;;  %v8260_v37 = vpop.permute.xlu0 %3953  ;;  %v3946_v17 = vsel %vm705_vm1, %v3943_v1, %v3945_v24  ;;  %v4048_v16 = vor.u32 %v4047_v45, %v4046_v34 }
 0x3b8   : > { %v3327_v58 = vpop.f32.mrf.mxu1  ;;  %v3586_v46 = vadd.f32 %v3525_v43, %v3415_v38 }
 0x3b9   : > { %v3381_v22 = vmul.f32 %v7715_v39, %v3327_v58  ;;  %v4050_v39 = vrot.slane %v8241_v12, 3  ;;  %v3584_v55 = vadd.f32 %v3521_v25, %v3413_v9  ;;  %v3416_v52 = vadd.f32 %v7725_v48, %v3383_v18 }
 0x3ba   : > { %4248 = vrot.lane.b32.xlu1 %v4212_v47, %s5367_s29  ;;  %3967 = vrot.lane.b32.xlu0 %v3946_v17, %s5363_s25  ;;  %v3527_v58 = vsel %vm8929_vm15, %v3524_v20, %v8267_v36  ;;  %v4049_v9 = vsel %vm8930_vm7, %v8150_v28, %v4048_v16  ;;  %v4216_v18 = vsel %vm8931_vm4, %v4211_v57, %v8289_v41  ;;  %vm8937_vm15 = vcmask 1044480  }
 0x3bb   : > { %v3414_v1 = vadd.f32 %v7725_v48, %v3381_v22  ;;  %v8285_v34 = vpop.permute.xlu1 %4120  ;;  %v8287_v45 = vpop.permute.xlu0 %3955  ;;  %v3872_v25 = vor.u32 %v8207_v26, %v3868_v7  ;;  %v8306_v48 = vor.u32 %v4051_v31, %v4050_v39  ;;  %v4350_v28 = vsel %vm1425_vm10, %v4328_v5, %v8211_v6  ;;  %v5316_v5 = vld [vmem:[%s5461_s22 + $0x84] sm:$0xf] }
 0x3bc   : > { %v3780_v57 = vmul.f32 %v8096_v59, %v3584_v55  ;;  %v3587_v29 = vadd.f32 %v3527_v58, %v3416_v52  ;;  %vm8938_vm7 = vcmask 293888   ;;  %vm8939_vm4 = vcmask 1040384  }
 0x3bd   : > { %v3585_v47 = vadd.f32 %v3523_v8, %v3414_v1  ;;  %v4053_v17 = vsel %vm8933_vm14, %v4048_v16, %v8306_v48  ;;  %v3877_v59 = vsel %vm535_vm3, %v3872_v25, %v3876_v21  ;;  %v3782_v16 = vmul.f32 %v8126_v60, %v3586_v46  ;;  %vm8941_vm14 = vmmov %vm8928_vm2 }
 0x3be   : > { %4085 = vrot.lane.b32.xlu0 %v4049_v9, %s5368_s16  ;;  %4250 = vrot.lane.b32.xlu1 %v4216_v18, %s5367_s29  ;;  %v3783_v6 = vmul.f32 %v8128_v44, %v3587_v29  ;;  %v5315_v18 = vld [vmem:[%s5461_s22 + $0x78] sm:$0xf] }
 0x3bf   : > { %v3781_v33 = vmul.f32 %v8098_v15, %v3585_v47  ;;  %v8313_v26 = vpop.permute.xlu1 %3896  ;;  %v4074_v7 = vpop.permute.xlu0 %4073  ;;  %v3446_v25 = vunpack.c.l.bf16 %v5315_v18  ;;  %v5320_v18 = vld [vmem:[%s8761_s7 + $0x1] ss:$0 sm:$0xff] }
 0x3c0   : > { %v4372_v27 = vsel %vm1460_vm11, %v4350_v28, %v4074_v7  ;;  %v8346_v60 = vpack.c.bf16 %v3783_v6, %v3782_v16  ;;  %v3449_v28 = vunpack.c.l.bf16 %v5316_v5  ;;  %v3880_v6 = vor.u32 %v8241_v12, %v3876_v21 }
 0x3c1   : > { %v8316_v20 = vpack.c.bf16 %v3781_v33, %v3780_v57  ;;  %v4394_v22 = vsel %vm8932_vm13, %v4372_v27, %v8233_v42  ;;  %vm8940_vm13 = vcmask 1043456  }
 0x3c2   : > { %4087 = vrot.lane.b32.xlu0 %v4053_v17, %s5368_s16  ;;  %3910 = vrot.lane.b32.xlu1 %v3877_v59, %s5365_s27  ;;  %v4416_v15 = vsel %vm8934_vm12, %v4394_v22, %v8213_v23  ;;  %v3993_v1 = vrot.slane %v8346_v60, 3  ;;  %vm8942_vm12 = vmmov %vm8937_vm15  ;;  %v4277_v58 = vrot.slane %v8346_v60, 7  ;;  %v4114_v47 = vrot.slane %v8346_v60, 4  ;;  %v5317_v22 = vld [vmem:[%s5461_s22 + $0x7c] sm:$0xf] }
 0x3c3   : > { %v4239_v61 = vpop.permute.xlu1 %4238  ;;  %v4156_v8 = vrot.slane %v8316_v20, 6  ;;  %v3991_v42 = vrot.slane %v8316_v20, 3  ;;  %v4275_v31 = vrot.slane %v8316_v20, 7  ;;  %v4112_v52 = vrot.slane %v8316_v20, 4  ;;  %v5318_v59 = vld [vmem:[%s5461_s22 + $0x80] sm:$0xf] }
 0x3c4   : > { %v4438_v39 = vsel %vm8935_vm5, %v4416_v15, %v4239_v61  ;;  %v8368_v43 = vshll.u32 %v8316_v20, 16  ;;  %vm8943_vm5 = vmmov %vm8939_vm4  ;;  %v3947_v57 = vrot.slane %v8316_v20, 1  ;;  %v3447_v17 = vunpack.c.l.bf16 %v5317_v22 }
 0x3c5   : > { %v4460_v55 = vsel %vm8936_vm6, %v4438_v39, %v8235_v40  ;;  %v4157_v23 = vsel %vm8928_vm2, %v4154_v14, %v4156_v8  ;;  %v3992_v44 = vsel %vm8937_vm15, %v3989_v62, %v3991_v42  ;;  %v4276_v14 = vsel %vm8939_vm4, %v4273_v11, %v4275_v31  ;;  %vm8944_vm6 = vmmov %vm8940_vm13 }
 0x3c6   : > { %4178 = vrot.lane.b32.xlu0 %v4157_v23, %s5364_s26  ;;  %4013 = vrot.lane.b32.xlu1 %v3992_v44, %s5362_s24  ;;  %v4113_v62 = vsel %vm8940_vm13, %v4110_v30, %v4112_v52  ;;  %v4158_v40 = vrot.slane %v8346_v60, 6  ;;  %v3994_v11 = vsel %vm8942_vm12, %v3991_v42, %v3993_v1  ;;  %v8371_v30 = vshrl.u32 %v8316_v20, 16  ;;  %v8406_v44 = vpop.permute.xlu0 %4075  ;;  %vm8945_vm15 = vmmov %vm8928_vm2 }
 0x3c7   : > { %5137 = vmatmul.mubr.msk.bf16.vlgmr.msra.gmra.mxu1 %vm8938_vm7, %v4460_v55  ;;  %v4278_v9 = vsel %vm8943_vm5, %v4275_v31, %v4277_v58  ;;  %v4115_v29 = vsel %vm8944_vm6, %v4112_v52, %v4114_v47  ;;  %v3884_v33 = vrot.slane %v8368_v43, 1  ;;  %v4218_v46 = vrot.slane %v8368_v43, 7  ;;  %v8400_v42 = vpop.permute.xlu1 %3898  ;;  %vm8947_vm4 = vmmov %vm8928_vm2 }
 0x3c8   : > { %5140 = vmatprep.mubr.msk.bf16.mxu1 %vm8863_vm0, %v8862_v56  ;;  %v4159_v38 = vsel %vm8941_vm14, %v4156_v8, %v4158_v40  ;;  %v4217_v7 = vrot.slane %v8371_v30, 6  ;;  %v3448_v15 = vunpack.c.l.bf16 %v5318_v59  ;;  %v8397_v61 = vshll.u32 %v8346_v60, 16  ;;  %vm8948_vm13 = vmmov %vm8928_vm2 }
 0x3c9   : > { %v4058_v8 = vshrl.u32 %v8346_v60, 16  ;;  %v3528_v39 = vrot.slane %v3446_v25, 6  ;;  %v3534_v31 = vrot.slane %v3449_v28, 6  ;;  %v3948_v55 = vsel %vm705_vm1, %v3945_v24, %v3947_v57 }
 0x3ca   : > { %4297 = vrot.lane.b32.xlu0 %v4276_v14, %s5366_s28  ;;  %4134 = vrot.lane.b32.xlu1 %v4113_v62, %s5361_s23  ;;  %v4055_v23 = vrot.slane %v8368_v43, 4  ;;  %v3885_v21 = vsel %vm535_vm3, %v3880_v6, %v3884_v33  ;;  %v4219_v52 = vor.u32 %v4218_v46, %v4217_v7  ;;  %v4054_v14 = vrot.slane %v8371_v30, 3 }
 0x3cb   : > { %v4221_v28 = vrot.slane %v4058_v8, 6  ;;  %v3529_v7 = vsel %vm8928_vm2, %v8267_v36, %v3528_v39  ;;  %vm8946_vm7 = vsmask.f32 1280  ;;  %vm8953_vm5 = vcmask 1044480  }
 0x3cc   : > { %vm8950_vm14 = vmmov %vm8946_vm7  ;;  %vm8954_vm6 = vcmask 1040384  }
 0x3ce   : > { %4180 = vrot.lane.b32.xlu0 %v4159_v38, %s5364_s26  ;;  %4015 = vrot.lane.b32.xlu1 %v3994_v11, %s5362_s24  ;;  %v3530_v38 = vrot.slane %v3447_v17, 6  ;;  %v3532_v11 = vrot.slane %v3448_v15, 6 }
 0x3d0   : > { %v3535_v46 = vsel %vm8945_vm15, %v3532_v11, %v3534_v31  ;;  %v3531_v36 = vsel %vm8948_vm13, %v3528_v39, %v3530_v38  ;;  %v4061_v31 = vrot.slane %v8397_v61, 4  ;;  %vm8956_vm15 = vcmask 162816  }
 0x3d2   : > { %v5128_v27 = vpop.f32.mrf.mxu1  ;;  %4299 = vrot.lane.b32.xlu0 %v4278_v9, %s5366_s28  ;;  %4136 = vrot.lane.b32.xlu1 %v4115_v29, %s5361_s23  ;;  %v3949_v9 = vrot.slane %v8346_v60, 1  ;;  %v4222_v29 = vrot.slane %v8397_v61, 7 }
 0x3d3   : > { %v3386_v62 = vmul.f32 %v5319_v32, %v5128_v27 }
 0x3d4   : > { %v3340_v16 = vpop.f32.mrf.mxu1  ;;  %v3950_v17 = vsel %vm705_vm1, %v3947_v57, %v3949_v9  ;;  %v4060_v9 = vrot.slane %v4058_v8, 3  ;;  %vm8949_vm1 = vsmask.f32 4352 }
 0x3d5   : > { %v3384_v12 = vmul.f32 %v5319_v32, %v3340_v16  ;;  %v4220_v16 = vsel %vm8946_vm7, %v8289_v41, %v4219_v52  ;;  %vm8951_vm12 = vmmov %vm8949_vm1 }
 0x3d6   : > { %v5129_v24 = vpop.f32.mrf.mxu1  ;;  %3969 = vrot.lane.b32.xlu0 %v3948_v55, %s5363_s25  ;;  %3912 = vrot.lane.b32.xlu1 %v3885_v21, %s5365_s27  ;;  %v4056_v55 = vor.u32 %v4055_v23, %v4054_v14  ;;  %v3533_v21 = vsel %vm8947_vm4, %v3530_v38, %v3532_v11  ;;  %v4308_v38 = vsel %vm1355_vm8, %v7746_v54, %v8313_v26  ;;  %vm8958_vm4 = vcmask 228352  }
 0x3d7   : > { %v3417_v25 = vadd.f32 %v5320_v18, %v3384_v12  ;;  %v3387_v5 = vmul.f32 %v5319_v32, %v5129_v24  ;;  %v3419_v12 = vadd.f32 %v5320_v18, %v3386_v62  ;;  %v3888_v62 = vor.u32 %v8371_v30, %v3884_v33 }
 0x3d8   : > { %v3343_v27 = vpop.f32.mrf.mxu1  ;;  %v8425_v22 = vpop.permute.xlu1 %4001  ;;  %v4057_v14 = vsel %vm8949_vm1, %v8306_v48, %v4056_v55  ;;  %v8454_v48 = vor.u32 %v4061_v31, %v4060_v9  ;;  %v4330_v54 = vsel %vm1390_vm9, %v4308_v38, %v8260_v37  ;;  %v4310_v38 = vsel %vm1355_vm8, %v7788_v19, %v8400_v42 }
 0x3d9   : > { %v3420_v59 = vadd.f32 %v5320_v18, %v3387_v5  ;;  %v3385_v15 = vmul.f32 %v5319_v32, %v3343_v27  ;;  %v8428_v6 = vpop.permute.xlu0 %4166  ;;  %v3588_v57 = vadd.f32 %v3529_v7, %v3417_v25  ;;  %v4223_v32 = vor.u32 %v4222_v29, %v4221_v28 }
 0x3da   : > { %4252 = vrot.lane.b32.xlu1 %v4220_v16, %s5367_s29  ;;  %3971 = vrot.lane.b32.xlu0 %v3950_v17, %s5363_s25  ;;  %v3590_v8 = vadd.f32 %v3533_v21, %v3419_v12  ;;  %v4352_v28 = vsel %vm1425_vm10, %v4330_v54, %v8258_v0  ;;  %vm8960_vm1 = vcmask 1043456   ;;  %v4332_v19 = vsel %vm1390_vm9, %v4310_v38, %v8287_v45 }
 0x3db   : > { %v3418_v24 = vadd.f32 %v5320_v18, %v3385_v15  ;;  %v3591_v5 = vadd.f32 %v3535_v46, %v3420_v59  ;;  %v4224_v39 = vsel %vm8950_vm14, %v4219_v52, %v4223_v32  ;;  %v3784_v11 = vmul.f32 %v8152_v49, %v3588_v57 }
 0x3dc   : > { %v8437_v27 = vpop.permute.xlu1 %4122  ;;  %v3892_v52 = vrot.slane %v8397_v61, 1  ;;  %v4063_v49 = vsel %vm8951_vm12, %v4056_v55, %v8454_v48  ;;  %v3786_v25 = vmul.f32 %v8177_v53, %v3590_v8  ;;  %v4374_v55 = vsel %vm1460_vm11, %v4352_v28, %v8406_v44 }
 0x3dd   : > { %v3589_v41 = vadd.f32 %v3531_v36, %v3418_v24  ;;  %v8439_v23 = vpop.permute.xlu0 %4285  ;;  %v3787_v43 = vmul.f32 %v8179_v2, %v3591_v5  ;;  %v4396_v44 = vsel %vm8956_vm15, %v4374_v55, %v8285_v34  ;;  %vm8961_vm14 = vcmask 261120  }
 0x3de   : > { %4089 = vrot.lane.b32.xlu0 %v4057_v14, %s5368_s16  ;;  %4254 = vrot.lane.b32.xlu1 %v4224_v39, %s5367_s29  ;;  %vm8962_vm12 = vcmask 293888   ;;  %v4354_v60 = vsel %vm1425_vm10, %v4332_v19, %v8425_v22 }
 0x3df   : > { %v3785_v18 = vmul.f32 %v8154_v13, %v3589_v41  ;;  %v3893_v13 = vsel %vm535_vm3, %v3888_v62, %v3892_v52  ;;  %v3801_v29 = vpack.c.bf16 %v3787_v43, %v3786_v25  ;;  %vm8952_vm3 = vmmov %vm8928_vm2 }
 0x3e0   : > { %v8458_v30 = vpop.permute.xlu1 %4003  ;;  %vm8955_vm2 = vmmov %vm8946_vm7  ;;  %vm8957_vm7 = vcmask 195584  }
 0x3e1   : > { %v8462_v26 = vpack.c.bf16 %v3785_v18, %v3784_v11  ;;  %v8464_v33 = vpop.permute.xlu0 %4168  ;;  %v4230_v36 = vshrl.u32 %v3801_v29, 16  ;;  %v4233_v31 = vshll.u32 %v3801_v29, 16  ;;  %v4162_v41 = vrot.slane %v3801_v29, 6  ;;  %vm8959_vm13 = vmmov %vm8952_vm3 }
 0x3e2   : > { %4091 = vrot.lane.b32.xlu0 %v4063_v49, %s5368_s16  ;;  %3914 = vrot.lane.b32.xlu1 %v3893_v13, %s5365_s27  ;;  %v4418_v14 = vsel %vm8957_vm7, %v4396_v44, %v8428_v6 }
 0x3e3   : > { %v4160_v2 = vrot.slane %v8462_v26, 6  ;;  %v3995_v61 = vrot.slane %v8462_v26, 3  ;;  %v4065_v37 = vshrl.u32 %v8462_v26, 16  ;;  %v4068_v46 = vshll.u32 %v8462_v26, 16 }
 0x3e4   : > { %v8477_v7 = vpop.permute.xlu1 %4124  ;;  %v4279_v15 = vrot.slane %v8462_v26, 7  ;;  %v4116_v5 = vrot.slane %v8462_v26, 4  ;;  %v4232_v62 = vrot.slane %v4230_v36, 6  ;;  %v4281_v26 = vrot.slane %v3801_v29, 7 }
 0x3e5   : > { %v4288_v17 = vpop.permute.xlu0 %4287  ;;  %v4161_v53 = vsel %vm8952_vm3, %v4158_v40, %v4160_v2  ;;  %v3996_v59 = vsel %vm8953_vm5, %v3993_v1, %v3995_v61  ;;  %v4225_v16 = vrot.slane %v4065_v37, 6  ;;  %v4226_v0 = vrot.slane %v4068_v46, 7  ;;  %vm8964_vm5 = vmmov %vm8955_vm2 }
 0x3e6   : > { %4182 = vrot.lane.b32.xlu0 %v4161_v53, %s5364_s26  ;;  %4017 = vrot.lane.b32.xlu1 %v3996_v59, %s5362_s24  ;;  %v4280_v1 = vsel %vm8954_vm6, %v4277_v58, %v4279_v15  ;;  %v4067_v57 = vrot.slane %v4065_v37, 3  ;;  %v4070_v24 = vrot.slane %v4068_v46, 4  ;;  %v4235_v58 = vrot.slane %v4233_v31, 7  ;;  %vm8965_vm6 = vmmov %vm8956_vm15  ;;  %s5186_s24 = smul.u32 44, %s9021_s10 }
 0x3e7   : > { %v4227_v21 = vor.u32 %v4226_v0, %v4225_v16  ;;  %v4163_v11 = vsel %vm8959_vm13, %v4160_v2, %v4162_v41  ;;  %v4117_v34 = vsel %vm8960_vm1, %v4114_v47, %v4116_v5  ;;  %vm8963_vm3 = vsmask.f32 4352  ;;  %vm8970_vm13 = vmmov %vm8962_vm12 }
 0x3e8   : > { %v3901_v12 = vpop.permute.xlu1 %3900  ;;  %v4071_v18 = vor.u32 %v4070_v24, %v4067_v57  ;;  %v4236_v52 = vor.u32 %v4235_v58, %v4232_v62  ;;  %vm8967_vm15 = vcmask 1040384   ;;  %vm8971_vm1 = vmmov %vm8965_vm6 }
 0x3e9   : > { %v3958_v40 = vpop.permute.xlu0 %3957  ;;  %v4228_v9 = vsel %vm8955_vm2, %v4223_v32, %v4227_v21  ;;  %vm8966_vm2 = vmmov %vm8957_vm7  ;;  %v4282_v25 = vsel %vm8967_vm15, %v4279_v15, %v4281_v26  ;;  %v4312_v29 = vsel %vm1355_vm8, %v7786_v63, %v3901_v12 }
 0x3ea   : > { %4301 = vrot.lane.b32.xlu0 %v4280_v1, %s5366_s28  ;;  %4256 = vrot.lane.b32.xlu1 %v4228_v9, %s5367_s29  ;;  %v4072_v43 = vsel %vm8963_vm3, %v8454_v48, %v4071_v18  ;;  %v4237_v54 = vsel %vm8964_vm5, %v4227_v21, %v4236_v52  ;;  %vm8968_vm7 = vmmov %vm8958_vm4  ;;  %v4334_v53 = vsel %vm1390_vm9, %v4312_v29, %v3958_v40 }
 0x3eb   : > { %vm8975_vm5 = vmmov %vm8970_vm13 }
 0x3ec   : > { %v4241_v39 = vpop.permute.xlu1 %4240  ;;  %vm8977_vm15 = vmmov %vm8968_vm7 }
 0x3ed   : > { %v4440_v32 = vsel %vm8958_vm4, %v4418_v14, %v4241_v39  ;;  %v3960_v8 = vpop.permute.xlu0 %3959  ;;  %vm8969_vm4 = vmmov %vm8961_vm14 }
 0x3ee   : > { %4184 = vrot.lane.b32.xlu0 %v4163_v11, %s5364_s26  ;;  %v4462_v6 = vsel %vm8961_vm14, %v4440_v32, %v8439_v23  ;;  %4138 = vrot.lane.b32.xlu1 %v4117_v34, %s5361_s23  ;;  %vm8972_vm14 = vmmov %vm8966_vm2  ;;  %s5185_s23 = smul.u32 22, %s9023_s30 }
 0x3ef   : > { %5141 = vmatmul.mubr.msk.bf16.gmra.mxu1 %vm8962_vm12, %v4462_v6  ;;  %vm8973_vm12 = vmmov %vm8968_vm7 }
 0x3f0   : > { %v4243_v42 = vpop.permute.xlu1 %4242  ;;  %5144 = vmatprep.mubr.msk.bf16.mxu1 %vm8863_vm0, %v8862_v56  ;;  %vm8974_vm3 = vmmov %vm8969_vm4  ;;  %s406_s25 = sadd.s32 %s5186_s24, %s5185_s23 }
 0x3f1   : > { %v4078_v47 = vpop.permute.xlu0 %4077 }
 0x3f2   : > { %v4376_v23 = vsel %vm1460_vm11, %v4354_v60, %v4078_v47  ;;  %4093 = vrot.lane.b32.xlu0 %v4072_v43, %s5368_s16  ;;  %4258 = vrot.lane.b32.xlu1 %v4237_v54, %s5367_s29 }
 0x3f3   : > { %v4398_v45 = vsel %vm8965_vm6, %v4376_v23, %v8437_v27  ;;  %vm8976_vm6 = vmmov %vm8971_vm1 }
 0x3f4   : > { %v4420_v49 = vsel %vm8966_vm2, %v4398_v45, %v8464_v33  ;;  %v3903_v22 = vpop.permute.xlu1 %3902 }
 0x3f5   : > { %v4080_v13 = vpop.permute.xlu0 %4079  ;;  %v4442_v48 = vsel %vm8968_vm7, %v4420_v49, %v4243_v42  ;;  %v4314_v63 = vsel %vm1355_vm8, %v7897_v51, %v3903_v22  ;;  %vm8978_vm7 = vmmov %vm8974_vm3 }
 0x3f6   : > { %4303 = vrot.lane.b32.xlu0 %v4282_v25, %s5366_s28  ;;  %v4464_v2 = vsel %vm8969_vm4, %v4442_v48, %v4288_v17  ;;  %v4356_v17 = vsel %vm1425_vm10, %v4334_v53, %v8458_v30  ;;  %v4336_v30 = vsel %vm1390_vm9, %v4314_v63, %v3960_v8  ;;  %vm8979_vm4 = vmmov %vm8975_vm5  ;;  %s4872_s28 = sshll.u32 %s406_s25, 3 }
 0x3f7   : > { %5145 = vmatmul.mubr.msk.bf16.gmra.mxu1 %vm8970_vm13, %v4464_v2  ;;  %v4378_v16 = vsel %vm1460_vm11, %v4356_v17, %v4080_v13  ;;  %vm8980_vm13 = vmmov %vm8971_vm1  ;;  %s8650_s30 = scalar_lea.vmem %s8763_s9, %s4872_s28 }
 0x3f8   : > { %v4006_v61 = vpop.permute.xlu1 %4005  ;;  %5148 = vmatprep.mubr.msk.bf16.mxu1 %vm8863_vm0, %v8862_v56  ;;  %v4400_v21 = vsel %vm8971_vm1, %v4378_v16, %v8477_v7  ;;  %vm8981_vm1 = vmmov %vm8966_vm2 }
 0x3f9   : > { %v4171_v27 = vpop.permute.xlu0 %4170  ;;  %v4358_v7 = vsel %vm1425_vm10, %v4336_v30, %v4006_v61 }
 0x3fa   : > { %v4422_v36 = vsel %vm8972_vm14, %v4400_v21, %v4171_v27  ;;  %vm8982_vm14 = vmmov %vm8973_vm12 }
 0x3fc   : > { %v4127_v37 = vpop.permute.xlu1 %4126 }
 0x3fd   : > { %v4290_v28 = vpop.permute.xlu0 %4289 }
 0x400   : > { %v4008_v33 = vpop.permute.xlu1 %4007 }
 0x401   : > { %v4173_v46 = vpop.permute.xlu0 %4172 }
 0x404   : > { %v4129_v59 = vpop.permute.xlu1 %4128 }
 0x405   : > { %v4292_v15 = vpop.permute.xlu0 %4291 }
 0x408   : > { %v3905_v0 = vpop.permute.xlu1 %3904 }
 0x409   : > { %v3962_v55 = vpop.permute.xlu0 %3961  ;;  %v4316_v11 = vsel %vm1355_vm8, %v7911_v10, %v3905_v0 }
 0x40a   : > { %v4338_v34 = vsel %vm1390_vm9, %v4316_v11, %v3962_v55 }
 0x40b   : > { %v4360_v42 = vsel %vm1425_vm10, %v4338_v34, %v4008_v33 }
 0x40c   : > { %v4245_v31 = vpop.permute.xlu1 %4244 }
 0x40d   : > { %v4444_v12 = vsel %vm8973_vm12, %v4422_v36, %v4245_v31  ;;  %v3964_v40 = vpop.permute.xlu0 %3963  ;;  %vm8983_vm12 = vmmov %vm8974_vm3 }
 0x40e   : > { %v4466_v1 = vsel %vm8974_vm3, %v4444_v12, %v4290_v28  ;;  %vm8984_vm3 = vmmov %vm8979_vm4 }
 0x40f   : > { %5149 = vmatmul.mubr.msk.bf16.gmra.mxu1 %vm8975_vm5, %v4466_v1  ;;  %vm8985_vm5 = vmmov %vm8976_vm6 }
 0x410   : > { %v4247_v57 = vpop.permute.xlu1 %4246  ;;  %5152 = vmatprep.mubr.msk.bf16.mxu1 %vm8863_vm0, %v8862_v56 }
 0x411   : > { %v4082_v24 = vpop.permute.xlu0 %4081 }
 0x412   : > { %v4380_v9 = vsel %vm1460_vm11, %v4358_v7, %v4082_v24 }
 0x413   : > { %v4402_v51 = vsel %vm8976_vm6, %v4380_v9, %v4127_v37  ;;  %vm8986_vm6 = vmmov %vm8981_vm1 }
 0x414   : > { %v4424_v5 = vsel %vm8966_vm2, %v4402_v51, %v4173_v46  ;;  %v3907_v44 = vpop.permute.xlu1 %3906  ;;  %vm8987_vm2 = vmmov %vm8982_vm14 }
 0x415   : > { %v4084_v41 = vpop.permute.xlu0 %4083  ;;  %v4446_v14 = vsel %vm8977_vm15, %v4424_v5, %v4247_v57  ;;  %v4318_v45 = vsel %vm1355_vm8, %v8012_v50, %v3907_v44  ;;  %vm8988_vm15 = vmmov %vm8978_vm7 }
 0x416   : > { %v4468_v39 = vsel %vm8978_vm7, %v4446_v14, %v4292_v15  ;;  %v4382_v52 = vsel %vm1460_vm11, %v4360_v42, %v4084_v41  ;;  %v4340_v22 = vsel %vm1390_vm9, %v4318_v45, %v3964_v40  ;;  %vm8989_vm7 = vmmov %vm8984_vm3 }
 0x417   : > { %5153 = vmatmul.mubr.msk.bf16.gmra.mxu1 %vm8979_vm4, %v4468_v39  ;;  %v4404_v43 = vsel %vm8980_vm13, %v4382_v52, %v4129_v59  ;;  %vm8990_vm4 = vmmov %vm8985_vm5 }
 0x418   : > { %v4010_v62 = vpop.permute.xlu1 %4009  ;;  %5156 = vmatprep.mubr.msk.bf16.mxu1 %vm8863_vm0, %v8862_v56  ;;  %vm8991_vm13 = vmmov %vm8981_vm1 }
 0x419   : > { %v4175_v58 = vpop.permute.xlu0 %4174  ;;  %v4362_v25 = vsel %vm1425_vm10, %v4340_v22, %v4010_v62 }
 0x41a   : > { %v4426_v23 = vsel %vm8981_vm1, %v4404_v43, %v4175_v58  ;;  %vm8992_vm1 = vmmov %vm8987_vm2 }
 0x41c   : > { %v4131_v38 = vpop.permute.xlu1 %4130 }
 0x41d   : > { %v4294_v32 = vpop.permute.xlu0 %4293 }
 0x420   : > { %v4012_v8 = vpop.permute.xlu1 %4011 }
 0x421   : > { %v4177_v18 = vpop.permute.xlu0 %4176 }
 0x424   : > { %v4133_v6 = vpop.permute.xlu1 %4132 }
 0x425   : > { %v4296_v19 = vpop.permute.xlu0 %4295 }
 0x428   : > { %v3909_v60 = vpop.permute.xlu1 %3908 }
 0x429   : > { %v3966_v47 = vpop.permute.xlu0 %3965  ;;  %v4320_v17 = vsel %vm1355_vm8, %v8031_v35, %v3909_v60 }
 0x42a   : > { %v4342_v0 = vsel %vm1390_vm9, %v4320_v17, %v3966_v47 }
 0x42b   : > { %v4364_v36 = vsel %vm1425_vm10, %v4342_v0, %v4012_v8 }
 0x42c   : > { %v4249_v54 = vpop.permute.xlu1 %4248 }
 0x42d   : > { %v4448_v10 = vsel %vm8982_vm14, %v4426_v23, %v4249_v54  ;;  %v3968_v26 = vpop.permute.xlu0 %3967  ;;  %vm8993_vm14 = vmmov %vm8983_vm12 }
 0x42e   : > { %v4470_v49 = vsel %vm8983_vm12, %v4448_v10, %v4294_v32  ;;  %vm8994_vm12 = vmmov %vm8984_vm3 }
 0x42f   : > { %5157 = vmatmul.mubr.msk.bf16.gmra.mxu1 %vm8984_vm3, %v4470_v49  ;;  %vm8995_vm3 = vmmov %vm8990_vm4 }
 0x430   : > { %v4251_v13 = vpop.permute.xlu1 %4250  ;;  %5160 = vmatprep.mubr.msk.bf16.mxu1 %vm8863_vm0, %v8862_v56 }
 0x431   : > { %v4086_v48 = vpop.permute.xlu0 %4085 }
 0x432   : > { %v4384_v2 = vsel %vm1460_vm11, %v4362_v25, %v4086_v48 }
 0x433   : > { %v4406_v50 = vsel %vm8985_vm5, %v4384_v2, %v4131_v38  ;;  %vm8996_vm5 = vmmov %vm8986_vm6 }
 0x434   : > { %v4428_v61 = vsel %vm8986_vm6, %v4406_v50, %v4177_v18  ;;  %v3911_v27 = vpop.permute.xlu1 %3910  ;;  %vm8997_vm6 = vmmov %vm8992_vm1 }
 0x435   : > { %v4088_v37 = vpop.permute.xlu0 %4087  ;;  %v4450_v28 = vsel %vm8987_vm2, %v4428_v61, %v4251_v13  ;;  %v4322_v57 = vsel %vm1355_vm8, %v8156_v4, %v3911_v27  ;;  %vm8998_vm2 = vmmov %vm8993_vm14  ;;  %v8644_v61 = vld [vmem:[%s8762_s8 + $0x1] ss:$0 sm:$0xff] }
 0x436   : > { %v4472_v33 = vsel %vm8988_vm15, %v4450_v28, %v4296_v19  ;;  %v4386_v31 = vsel %vm1460_vm11, %v4364_v36, %v4088_v37  ;;  %v4344_v9 = vsel %vm1390_vm9, %v4322_v57, %v3968_v26  ;;  %vm8999_vm15 = vmmov %vm8989_vm7 }
 0x437   : > { %5161 = vmatmul.mubr.msk.bf16.gmra.mxu1 %vm8989_vm7, %v4472_v33  ;;  %v4408_v40 = vsel %vm8990_vm4, %v4386_v31, %v4133_v6  ;;  %vm9000_vm7 = vmmov %vm8995_vm3 }
 0x438   : > { %v4014_v29 = vpop.permute.xlu1 %4013  ;;  %5164 = vmatprep.mubr.msk.bf16.mxu1 %vm8863_vm0, %v8862_v56  ;;  %vm9001_vm4 = vmmov %vm8996_vm5 }
 0x439   : > { %v4179_v46 = vpop.permute.xlu0 %4178  ;;  %v4366_v5 = vsel %vm1425_vm10, %v4344_v9, %v4014_v29 }
 0x43a   : > { %v4430_v1 = vsel %vm8991_vm13, %v4408_v40, %v4179_v46  ;;  %vm9002_vm13 = vmmov %vm8992_vm1 }
 0x43c   : > { %v4135_v53 = vpop.permute.xlu1 %4134 }
 0x43d   : > { %v4298_v59 = vpop.permute.xlu0 %4297 }
 0x440   : > { %v4016_v15 = vpop.permute.xlu1 %4015 }
 0x441   : > { %v4181_v16 = vpop.permute.xlu0 %4180 }
 0x444   : > { %v4137_v55 = vpop.permute.xlu1 %4136 }
 0x445   : > { %v4300_v21 = vpop.permute.xlu0 %4299 }
 0x448   : > { %v3913_v63 = vpop.permute.xlu1 %3912 }
 0x449   : > { %v3970_v12 = vpop.permute.xlu0 %3969  ;;  %v4324_v41 = vsel %vm1355_vm8, %v8181_v3, %v3913_v63 }
 0x44a   : > { %v4346_v58 = vsel %vm1390_vm9, %v4324_v41, %v3970_v12 }
 0x44b   : > { %v4368_v11 = vsel %vm1425_vm10, %v4346_v58, %v4016_v15 }
 0x44c   : > { %v4253_v30 = vpop.permute.xlu1 %4252 }
 0x44d   : > { %v4452_v35 = vsel %vm8992_vm1, %v4430_v1, %v4253_v30  ;;  %v3972_v7 = vpop.permute.xlu0 %3971  ;;  %vm9003_vm1 = vmmov %vm8998_vm2 }
 0x44e   : > { %v4474_v24 = vsel %vm8993_vm14, %v4452_v35, %v4298_v59  ;;  %vm9004_vm14 = vmmov %vm8994_vm12 }
 0x44f   : > { %5165 = vmatmul.mubr.msk.bf16.gmra.mxu1 %vm8994_vm12, %v4474_v24  ;;  %vm9005_vm12 = vmmov %vm8995_vm3 }
 0x450   : > { %v4255_v51 = vpop.permute.xlu1 %4254  ;;  %5168 = vmatprep.mubr.msk.bf16.mxu1 %vm8863_vm0, %v8862_v56 }
 0x451   : > { %v4090_v44 = vpop.permute.xlu0 %4089 }
 0x452   : > { %v4388_v4 = vsel %vm1460_vm11, %v4366_v5, %v4090_v44 }
 0x453   : > { %v4410_v14 = vsel %vm8995_vm3, %v4388_v4, %v4135_v53  ;;  %vm9006_vm3 = vmmov %vm9001_vm4 }
 0x454   : > { %v4432_v39 = vsel %vm8996_vm5, %v4410_v14, %v4181_v16  ;;  %v3915_v62 = vpop.permute.xlu1 %3914  ;;  %vm9007_vm5 = vmmov %vm8997_vm6 }
 0x455   : > { %v4092_v38 = vpop.permute.xlu0 %4091  ;;  %v4454_v32 = vsel %vm8997_vm6, %v4432_v39, %v4255_v51  ;;  %v4326_v43 = vsel %vm1355_vm8, %v8316_v20, %v3915_v62  ;;  %vm9008_vm8 = vmmov %vm9003_vm1 }
 0x456   : > { %v4476_v8 = vsel %vm8998_vm2, %v4454_v32, %v4300_v21  ;;  %v4390_v3 = vsel %vm1460_vm11, %v4368_v11, %v4092_v38  ;;  %v4348_v45 = vsel %vm1390_vm9, %v4326_v43, %v3972_v7  ;;  %vm9009_vm6 = vmmov %vm9004_vm14 }
 0x457   : > { %5169 = vmatmul.mubr.msk.bf16.gmra.mxu1 %vm8999_vm15, %v4476_v8  ;;  %v4412_v6 = vsel %vm9000_vm7, %v4390_v3, %v4137_v55 }
 0x458   : > { %v4018_v18 = vpop.permute.xlu1 %4017  ;;  %5172 = vmatprep.mubr.msk.bf16.mxu1 %vm8863_vm0, %v8862_v56 }
 0x459   : > { %v4183_v34 = vpop.permute.xlu0 %4182  ;;  %v4370_v10 = vsel %vm1425_vm10, %v4348_v45, %v4018_v18 }
 0x45a   : > { %v4434_v19 = vsel %vm9001_vm4, %v4412_v6, %v4183_v34 }
 0x45c   : > { %v4257_v42 = vpop.permute.xlu1 %4256 }
 0x45d   : > { %v4302_v52 = vpop.permute.xlu0 %4301  ;;  %v4456_v60 = vsel %vm9002_vm13, %v4434_v19, %v4257_v42 }
 0x45e   : > { %v4478_v47 = vsel %vm9003_vm1, %v4456_v60, %v4302_v52 }
 0x45f   : > { %5173 = vmatmul.mubr.msk.bf16.gmra.mxu1 %vm9004_vm14, %v4478_v47 }
 0x460   : > { %5176 = vmatprep.mubr.msk.bf16.mxu1 %vm8863_vm0, %v8862_v56  ;;  %v4139_v54 = vpop.permute.xlu1 %4138  ;;  %v8639_v56 = vld [vmem:[%s8762_s8] ss:$0 sm:$0xff] }
 0x461   : > { %v4185_v23 = vpop.permute.xlu0 %4184 }
 0x464   : > { %v4259_v13 = vpop.permute.xlu1 %4258 }
 0x465   : > { %v4094_v26 = vpop.permute.xlu0 %4093 }
 0x466   : > { %v4392_v49 = vsel %vm1460_vm11, %v4370_v10, %v4094_v26 }
 0x467   : > { %v4414_v22 = vsel %vm9005_vm12, %v4392_v49, %v4139_v54 }
 0x468   : > { %v4436_v25 = vsel %vm9006_vm3, %v4414_v22, %v4185_v23 }
 0x469   : > { %v4458_v20 = vsel %vm9007_vm5, %v4436_v25, %v4259_v13  ;;  %v4304_v48 = vpop.permute.xlu0 %4303 }
 0x46a   : > { %v4480_v2 = vsel %vm9008_vm8, %v4458_v20, %v4304_v48 }
 0x46b   : > { %5177 = vmatmul.mubr.msk.bf16.gmra.mxu1 %vm9009_vm6, %v4480_v2 }
 0x487   : > { %v4565_v50 = vpop.f32.mrf.mxu1 }
 0x488   : > { %v4566_v27 = vadd.f32 %v8639_v56, %v4565_v50 }
 0x489   : > { %v5138_v37 = vpop.f32.mrf.mxu1 }
 0x48a   : > { %vm4652_vm9 = vcmp.gt.f32.partialorder %v4566_v27, 0.0  ;;  %v4679_v28 = vmul.f32 %v8644_v61, %v4566_v27 }
 0x48b   : > { %v4568_v33 = vpop.f32.mrf.mxu1 }
 0x48c   : > { %v4701_v29 = vsel %vm4652_vm9, %v4566_v27, %v4679_v28  ;;  %v4569_v46 = vadd.f32 %v8639_v56, %v4568_v33 }
 0x48d   : > { %4723 = vst.msk [vmem:[%s8650_s30] sm:$0xff] %vm1460_vm11, %v4701_v29  ;;  %v5139_v53 = vpop.f32.mrf.mxu1 }
 0x48e   : > { %vm4653_vm10 = vcmp.gt.f32.partialorder %v4569_v46, 0.0  ;;  %v4680_v59 = vmul.f32 %v8644_v61, %v4569_v46 }
 0x490   : > { %v4702_v15 = vsel %vm4653_vm10, %v4569_v46, %v4680_v59 }
 0x491   : > { %4724 = vst.msk [vmem:[%s8650_s30 + $0x8] sm:$0xff] %vm1460_vm11, %v4702_v15 }
 0x4af   : > { %v4573_v17 = vpop.f32.mrf.mxu1 }
 0x4b0   : > { %v4574_v16 = vadd.f32 %v8639_v56, %v4573_v17 }
 0x4b1   : > { %v5142_v0 = vpop.f32.mrf.mxu1 }
 0x4b2   : > { %vm4654_vm0 = vcmp.gt.f32.partialorder %v4574_v16, 0.0  ;;  %v4681_v55 = vmul.f32 %v8644_v61, %v4574_v16 }
 0x4b3   : > { %v4576_v21 = vpop.f32.mrf.mxu1 }
 0x4b4   : > { %v4703_v36 = vsel %vm4654_vm0, %v4574_v16, %v4681_v55  ;;  %v4577_v31 = vadd.f32 %v8639_v56, %v4576_v21 }
 0x4b5   : > { %4725 = vst.msk [vmem:[%s8650_s30 + $0x10] sm:$0xff] %vm1460_vm11, %v4703_v36  ;;  %v5143_v63 = vpop.f32.mrf.mxu1 }
 0x4b6   : > { %vm4655_vm2 = vcmp.gt.f32.partialorder %v4577_v31, 0.0  ;;  %v4682_v12 = vmul.f32 %v8644_v61, %v4577_v31 }
 0x4b7   : > { %v4581_v40 = vpop.f32.mrf.mxu1 }
 0x4b8   : > { %v4704_v1 = vsel %vm4655_vm2, %v4577_v31, %v4682_v12  ;;  %v4582_v30 = vadd.f32 %v8639_v56, %v4581_v40 }
 0x4b9   : > { %4726 = vst.msk [vmem:[%s8650_s30 + $0x18] sm:$0xff] %vm1460_vm11, %v4704_v1  ;;  %v5146_v57 = vpop.f32.mrf.mxu1 }
 0x4ba   : > { %vm4656_vm15 = vcmp.gt.f32.partialorder %v4582_v30, 0.0  ;;  %v4683_v35 = vmul.f32 %v8644_v61, %v4582_v30 }
 0x4bb   : > { %v4584_v7 = vpop.f32.mrf.mxu1 }
 0x4bc   : > { %v4705_v24 = vsel %vm4656_vm15, %v4582_v30, %v4683_v35  ;;  %v4585_v9 = vadd.f32 %v8639_v56, %v4584_v7 }
 0x4bd   : > { %4727 = vst.msk [vmem:[%s8650_s30 + $0x20] sm:$0xff] %vm1460_vm11, %v4705_v24  ;;  %v5147_v51 = vpop.f32.mrf.mxu1 }
 0x4be   : > { %vm4657_vm7 = vcmp.gt.f32.partialorder %v4585_v9, 0.0  ;;  %v4684_v5 = vmul.f32 %v8644_v61, %v4585_v9 }
 0x4c0   : > { %v4706_v44 = vsel %vm4657_vm7, %v4585_v9, %v4684_v5 }
 0x4c1   : > { %4728 = vst.msk [vmem:[%s8650_s30 + $0x28] sm:$0xff] %vm1460_vm11, %v4706_v44 }
 0x4cf   : > { %v4589_v41 = vpop.f32.mrf.mxu1 }
 0x4d0   : > { %v4590_v4 = vadd.f32 %v8639_v56, %v4589_v41 }
 0x4d1   : > { %v5150_v14 = vpop.f32.mrf.mxu1 }
 0x4d2   : > { %vm4658_vm4 = vcmp.gt.f32.partialorder %v4590_v4, 0.0  ;;  %v4685_v39 = vmul.f32 %v8644_v61, %v4590_v4 }
 0x4d3   : > { %v4592_v62 = vpop.f32.mrf.mxu1 }
 0x4d4   : > { %v4707_v58 = vsel %vm4658_vm4, %v4590_v4, %v4685_v39  ;;  %v4593_v38 = vadd.f32 %v8639_v56, %v4592_v62 }
 0x4d5   : > { %4729 = vst.msk [vmem:[%s8650_s30 + $0x30] sm:$0xff] %vm1460_vm11, %v4707_v58  ;;  %v5151_v32 = vpop.f32.mrf.mxu1 }
 0x4d6   : > { %vm4659_vm13 = vcmp.gt.f32.partialorder %v4593_v38, 0.0  ;;  %v4686_v8 = vmul.f32 %v8644_v61, %v4593_v38 }
 0x4d7   : > { %v4597_v11 = vpop.f32.mrf.mxu1 }
 0x4d8   : > { %v4708_v18 = vsel %vm4659_vm13, %v4593_v38, %v4686_v8  ;;  %v4598_v3 = vadd.f32 %v8639_v56, %v4597_v11 }
 0x4d9   : > { %4730 = vst.msk [vmem:[%s8650_s30 + $0x38] sm:$0xff] %vm1460_vm11, %v4708_v18  ;;  %v5154_v34 = vpop.f32.mrf.mxu1 }
 0x4da   : > { %vm4660_vm1 = vcmp.gt.f32.partialorder %v4598_v3, 0.0  ;;  %v4687_v6 = vmul.f32 %v8644_v61, %v4598_v3 }
 0x4db   : > { %v4600_v19 = vpop.f32.mrf.mxu1 }
 0x4dc   : > { %v4709_v42 = vsel %vm4660_vm1, %v4598_v3, %v4687_v6  ;;  %v4601_v52 = vadd.f32 %v8639_v56, %v4600_v19 }
 0x4dd   : > { %4731 = vst.msk [vmem:[%s8650_s30 + $0x40] sm:$0xff] %vm1460_vm11, %v4709_v42  ;;  %v5155_v60 = vpop.f32.mrf.mxu1 }
 0x4de   : > { %vm4661_vm14 = vcmp.gt.f32.partialorder %v4601_v52, 0.0  ;;  %v4688_v47 = vmul.f32 %v8644_v61, %v4601_v52 }
 0x4e0   : > { %v4710_v43 = vsel %vm4661_vm14, %v4601_v52, %v4688_v47 }
 0x4e1   : > { %4732 = vst.msk [vmem:[%s8650_s30 + $0x48] sm:$0xff] %vm1460_vm11, %v4710_v43 }
 0x4ef   : > { %v4605_v23 = vpop.f32.mrf.mxu1 }
 0x4f0   : > { %v4606_v54 = vadd.f32 %v8639_v56, %v4605_v23 }
 0x4f1   : > { %v5158_v45 = vpop.f32.mrf.mxu1 }
 0x4f2   : > { %vm4662_vm12 = vcmp.gt.f32.partialorder %v4606_v54, 0.0  ;;  %v4689_v10 = vmul.f32 %v8644_v61, %v4606_v54 }
 0x4f3   : > { %v4608_v26 = vpop.f32.mrf.mxu1 }
 0x4f4   : > { %v4711_v49 = vsel %vm4662_vm12, %v4606_v54, %v4689_v10  ;;  %v4609_v22 = vadd.f32 %v8639_v56, %v4608_v26 }
 0x4f5   : > { %4733 = vst.msk [vmem:[%s8650_s30 + $0x50] sm:$0xff] %vm1460_vm11, %v4711_v49  ;;  %v5159_v13 = vpop.f32.mrf.mxu1 }
 0x4f6   : > { %vm4663_vm3 = vcmp.gt.f32.partialorder %v4609_v22, 0.0  ;;  %v4690_v25 = vmul.f32 %v8644_v61, %v4609_v22 }
 0x4f7   : > { %v4613_v20 = vpop.f32.mrf.mxu1 }
 0x4f8   : > { %v4712_v48 = vsel %vm4663_vm3, %v4609_v22, %v4690_v25  ;;  %v4614_v2 = vadd.f32 %v8639_v56, %v4613_v20 }
 0x4f9   : > { %4734 = vst.msk [vmem:[%s8650_s30 + $0x58] sm:$0xff] %vm1460_vm11, %v4712_v48  ;;  %v5162_v50 = vpop.f32.mrf.mxu1 }
 0x4fa   : > { %vm4664_vm5 = vcmp.gt.f32.partialorder %v4614_v2, 0.0  ;;  %v4691_v27 = vmul.f32 %v8644_v61, %v4614_v2 }
 0x4fb   : > { %v4616_v37 = vpop.f32.mrf.mxu1 }
 0x4fc   : > { %v4713_v28 = vsel %vm4664_vm5, %v4614_v2, %v4691_v27  ;;  %v4617_v33 = vadd.f32 %v8639_v56, %v4616_v37 }
 0x4fd   : > { %4735 = vst.msk [vmem:[%s8650_s30 + $0x60] sm:$0xff] %vm1460_vm11, %v4713_v28  ;;  %v5163_v29 = vpop.f32.mrf.mxu1 }
 0x4fe   : > { %vm4665_vm8 = vcmp.gt.f32.partialorder %v4617_v33, 0.0  ;;  %v4692_v46 = vmul.f32 %v8644_v61, %v4617_v33 }
 0x500   : > { %v4714_v53 = vsel %vm4665_vm8, %v4617_v33, %v4692_v46 }
 0x501   : > { %4736 = vst.msk [vmem:[%s8650_s30 + $0x68] sm:$0xff] %vm1460_vm11, %v4714_v53 }
 0x50f   : > { %v4621_v59 = vpop.f32.mrf.mxu1 }
 0x510   : > { %v4622_v15 = vadd.f32 %v8639_v56, %v4621_v59 }
 0x511   : > { %v5166_v17 = vpop.f32.mrf.mxu1 }
 0x512   : > { %vm4666_vm6 = vcmp.gt.f32.partialorder %v4622_v15, 0.0  ;;  %v4693_v16 = vmul.f32 %v8644_v61, %v4622_v15 }
 0x513   : > { %v4624_v0 = vpop.f32.mrf.mxu1 }
 0x514   : > { %v4715_v55 = vsel %vm4666_vm6, %v4622_v15, %v4693_v16  ;;  %v4625_v21 = vadd.f32 %v8639_v56, %v4624_v0 }
 0x515   : > { %4737 = vst.msk [vmem:[%s8650_s30 + $0x70] sm:$0xff] %vm1460_vm11, %v4715_v55  ;;  %v5167_v36 = vpop.f32.mrf.mxu1 }
 0x516   : > { %vm4667_vm9 = vcmp.gt.f32.partialorder %v4625_v21, 0.0  ;;  %v4694_v31 = vmul.f32 %v8644_v61, %v4625_v21 }
 0x517   : > { %v4629_v63 = vpop.f32.mrf.mxu1 }
 0x518   : > { %v4716_v12 = vsel %vm4667_vm9, %v4625_v21, %v4694_v31  ;;  %v4630_v40 = vadd.f32 %v8639_v56, %v4629_v63 }
 0x519   : > { %4738 = vst.msk [vmem:[%s8650_s30 + $0x78] sm:$0xff] %vm1460_vm11, %v4716_v12  ;;  %v5170_v1 = vpop.f32.mrf.mxu1 }
 0x51a   : > { %vm4668_vm10 = vcmp.gt.f32.partialorder %v4630_v40, 0.0  ;;  %v4695_v30 = vmul.f32 %v8644_v61, %v4630_v40 }
 0x51b   : > { %v4632_v57 = vpop.f32.mrf.mxu1 }
 0x51c   : > { %v4717_v35 = vsel %vm4668_vm10, %v4630_v40, %v4695_v30  ;;  %v4633_v7 = vadd.f32 %v8639_v56, %v4632_v57 }
 0x51d   : > { %4739 = vst.msk [vmem:[%s8650_s30 + $0x80] sm:$0xff] %vm1460_vm11, %v4717_v35  ;;  %v5171_v24 = vpop.f32.mrf.mxu1 }
 0x51e   : > { %vm4669_vm0 = vcmp.gt.f32.partialorder %v4633_v7, 0.0  ;;  %v4696_v9 = vmul.f32 %v8644_v61, %v4633_v7 }
 0x51f   : > { %v4637_v5 = vpop.f32.mrf.mxu1 }
 0x520   : > { %v4718_v51 = vsel %vm4669_vm0, %v4633_v7, %v4696_v9  ;;  %v4638_v44 = vadd.f32 %v8639_v56, %v4637_v5 }
 0x521   : > { %4740 = vst.msk [vmem:[%s8650_s30 + $0x88] sm:$0xff] %vm1460_vm11, %v4718_v51  ;;  %v5174_v41 = vpop.f32.mrf.mxu1 }
 0x522   : > { %vm4670_vm2 = vcmp.gt.f32.partialorder %v4638_v44, 0.0  ;;  %v4697_v4 = vmul.f32 %v8644_v61, %v4638_v44 }
 0x523   : > { %v4640_v14 = vpop.f32.mrf.mxu1 }
 0x524   : > { %v4719_v39 = vsel %vm4670_vm2, %v4638_v44, %v4697_v4  ;;  %v4641_v62 = vadd.f32 %v8639_v56, %v4640_v14 }
 0x525   : > { %4741 = vst.msk [vmem:[%s8650_s30 + $0x90] sm:$0xff] %vm1460_vm11, %v4719_v39  ;;  %v5175_v58 = vpop.f32.mrf.mxu1 }
 0x526   : > { %vm4671_vm15 = vcmp.gt.f32.partialorder %v4641_v62, 0.0  ;;  %v4698_v38 = vmul.f32 %v8644_v61, %v4641_v62 }
 0x528   : > { %v4720_v32 = vsel %vm4671_vm15, %v4641_v62, %v4698_v38 }
 0x529   : > { %4742 = vst.msk [vmem:[%s8650_s30 + $0x98] sm:$0xff] %vm1460_vm11, %v4720_v32 }
 0x52b   : > { %v4645_v8 = vpop.f32.mrf.mxu1 }
 0x52c   : > { %v4646_v11 = vadd.f32 %v8639_v56, %v4645_v8 }
 0x52d   : > { %v5178_v18 = vpop.f32.mrf.mxu1 }
 0x52e   : > { %vm4672_vm7 = vcmp.gt.f32.partialorder %v4646_v11, 0.0  ;;  %v4699_v3 = vmul.f32 %v8644_v61, %v4646_v11 }
 0x52f   : > { %v4648_v34 = vpop.f32.mrf.mxu1 }
 0x530   : > { %v4721_v6 = vsel %vm4672_vm7, %v4646_v11, %v4699_v3  ;;  %v4649_v19 = vadd.f32 %v8639_v56, %v4648_v34 }
 0x531   : > { %4743 = vst.msk [vmem:[%s8650_s30 + $0xa0] sm:$0xff] %vm1460_vm11, %v4721_v6  ;;  %v5179_v42 = vpop.f32.mrf.mxu1 }
 0x532   : > { %vm4673_vm4 = vcmp.gt.f32.partialorder %v4649_v19, 0.0  ;;  %v4700_v52 = vmul.f32 %v8644_v61, %v4649_v19 }
 0x534   : > { %v4722_v60 = vsel %vm4673_vm4, %v4649_v19, %v4700_v52 }
 0x535   : > { %4744 = vst.msk [vmem:[%s8650_s30 + $0xa8] sm:$0xff] %vm1460_vm11, %v4722_v60 }
 0x536 PF: > { %s19_s13 = sadd.s32 1, %s5359_s13   ;;  %s9010_s30 = smov %s5351_s11 }
 0x537   : > { %p16_p7 = scmp.ge.s32.totalorder %s19_s13, 6   ;;  %s9011_s10 = smov %s5355_s12 }
 0x538   : > { %s9012_s11 = smov %s9015_s14  ;;  %s9013_s12 = smov %s9019_s15 }
 0x539   :  { %18 = sbr.rel (!%p16_p7) target bundleno = 3 (0x3), region = 92 }

</bundles_post_ra>
